<compile_context>
chip_gen: v7x
topology: tpu7x:2x2x1
jax: 0.10.0
libtpu: 0.0.40
codegen_flags: <defaults>
</compile_context>

<pallas_src>
import jax
import jax.numpy as jnp
from jax.experimental import pallas as pl
from jax.experimental.pallas import tpu as pltpu

_EPS = 1e-5     # nn.InstanceNorm2d default (affine=False, biased variance)
_LANES = 128    # TPU vreg lane width


def _residual_block_kernel(x_ref, w1_ref, w2_ref, o_ref):
    # x_ref block: (1, H, W, C); w*_ref: (9, Cin, Cout), tap-major (dy*3+dx).
    _, H, W, C = x_ref.shape
    HW = H * W
    inv_hw = 1.0 / float(HW)

    x = x_ref[0]                       # (H, W, C), compute dtype
    cdt = x.dtype

    def reflect_pad(a):
        # ReflectionPad2d(1): two concatenates total (rows, then cols).
        rows = jnp.concatenate([a[1:2], a, a[H - 2:H - 1]], axis=0)
        return jnp.concatenate(
            [rows[:, 1:2], rows, rows[:, W - 2:W - 1]], axis=1)

    def conv3x3(a, w_ref):
        # 9 per-tap matmuls (K=C) accumulated in f32 -- no im2col scratch,
        # taps feed the MXU straight from slices of the padded image.
        ap = reflect_pad(a)            # (H+2, W+2, C)
        acc = None
        for dy in range(3):
            for dx in range(3):
                tap = ap[dy:dy + H, dx:dx + W, :].reshape(HW, C)
                part = jnp.dot(tap, w_ref[dy * 3 + dx],
                               preferred_element_type=jnp.float32)
                acc = part if acc is None else acc + part
        return acc                     # (HW, C) f32; conv bias cancels in IN

    def instance_norm(y):
        # Two-pass per-channel spatial stats in f32.
        mean = jnp.sum(y, axis=0, keepdims=True) * inv_hw      # (1, C)
        c = y - mean
        var = jnp.sum(c * c, axis=0, keepdims=True) * inv_hw   # (1, C)
        return c * jax.lax.rsqrt(var + _EPS)

    y = instance_norm(conv3x3(x, w1_ref))
    y = jnp.maximum(y, 0.0)
    y = instance_norm(conv3x3(y.astype(cdt).reshape(H, W, C), w2_ref))

    out = x.reshape(HW, C).astype(jnp.float32) + y              # residual, f32
    o_ref[0] = out.reshape(H, W, C).astype(o_ref.dtype)


def _vmem_limit_bytes(H, W, C, compute_dtype, out_dtype):
    cs = jnp.dtype(compute_dtype).itemsize
    osz = jnp.dtype(out_dtype).itemsize
    blocks = 2 * H * W * C * cs + 2 * H * W * C * osz        # 2x-buffered in/out
    weights = 2 * 2 * 9 * C * C * cs
    temps = (H + 2) * (W + 2) * C * cs + 4 * H * W * C * 4   # padded + f32 temps
    est = 2 * (blocks + weights + temps)                     # headroom
    return int(min(max(est, 32 * 1024 * 1024), 56 * 1024 * 1024))


def residual_block(x_nchw, w1, b1, w2, b2, *, mxu_dtype=None):
    """Forward pass of the PyTorch ResidualBlock.

    x_nchw: (N, C, H, W); w1, w2: (3, 3, Cin, Cout) HWIO; b1, b2: (C,).
    b1/b2 are accepted for parity with nn.Conv2d but are not used: a per-
    channel bias cancels exactly under InstanceNorm2d(affine=False).
    mxu_dtype: optional MXU compute dtype (e.g. jnp.bfloat16 for f32 callers);
    accumulation, stats and the residual add stay in f32.
    """
    del b1, b2  # exact cancellation under InstanceNorm (affine=False)
    x = jnp.transpose(x_nchw, (0, 2, 3, 1))                   # NCHW -> NHWC
    N, H, W, C = x.shape
    out_dtype = x.dtype
    cdt = jnp.dtype(mxu_dtype) if mxu_dtype is not None else x.dtype

    # Lane-dense layout for small C: zero-pad channels to the 128-lane width.
    # Padded channels stay exactly 0 through conv/IN/ReLU/residual and are
    # sliced off at the end.  No padding when C >= 128.
    Cp = C if C >= _LANES else _LANES
    if Cp != C:
        p = Cp - C
        x = jnp.pad(x, ((0, 0), (0, 0), (0, 0), (0, p)))
        w1 = jnp.pad(w1, ((0, 0), (0, 0), (0, p), (0, p)))
        w2 = jnp.pad(w2, ((0, 0), (0, 0), (0, p), (0, p)))

    xk = x.astype(cdt)
    w1f = w1.reshape(9, Cp, Cp).astype(cdt)                   # tap-major (Cin,Cout)
    w2f = w2.reshape(9, Cp, Cp).astype(cdt)

    flops = 2 * 2 * N * H * W * 9 * Cp * Cp                   # two 3x3 convs
    bytes_accessed = (N * H * W * Cp * (jnp.dtype(cdt).itemsize
                                        + jnp.dtype(out_dtype).itemsize)
                      + 2 * 9 * Cp * Cp * jnp.dtype(cdt).itemsize)

    out = pl.pallas_call(
        _residual_block_kernel,
        out_shape=jax.ShapeDtypeStruct((N, H, W, Cp), out_dtype),
        grid_spec=pltpu.PrefetchScalarGridSpec(
            num_scalar_prefetch=0,
            grid=(N,),                      # one image per step, independent
            in_specs=[
                pl.BlockSpec((1, H, W, Cp), lambda n: (n, 0, 0, 0)),
                pl.BlockSpec((9, Cp, Cp), lambda n: (0, 0, 0)),
                pl.BlockSpec((9, Cp, Cp), lambda n: (0, 0, 0)),
            ],
            out_specs=pl.BlockSpec((1, H, W, Cp), lambda n: (n, 0, 0, 0)),
        ),
        compiler_params=pltpu.CompilerParams(
            dimension_semantics=("parallel",),   # batch shards across TCs
            vmem_limit_bytes=_vmem_limit_bytes(H, W, Cp, cdt, out_dtype)),
        cost_estimate=pl.CostEstimate(
            flops=int(flops), transcendentals=int(4 * N * Cp),
            bytes_accessed=int(bytes_accessed)),
    )(xk, w1f, w2f)

    out = out[..., :C]                                        # drop channel pad
    return jnp.transpose(out, (0, 3, 1, 2))                   # back to NCHW


def _reference(x_nchw, w1, b1, w2, b2):
    # Pure-JAX reference (NHWC), including the (mathematically redundant) bias.
    x = jnp.transpose(x_nchw, (0, 2, 3, 1)).astype(jnp.float32)

    def conv(a, w, b):
        ap = jnp.pad(a, ((0, 0), (1, 1), (1, 1), (0, 0)), mode="reflect")
        y = jax.lax.conv_general_dilated(
            ap, w, window_strides=(1, 1), padding="VALID",
            dimension_numbers=("NHWC", "HWIO", "NHWC"))
        return y + b

    def inorm(a):
        m = jnp.mean(a, axis=(1, 2), keepdims=True)
        v = jnp.mean((a - m) ** 2, axis=(1, 2), keepdims=True)
        return (a - m) * jax.lax.rsqrt(v + _EPS)

    y = jnp.maximum(inorm(conv(x, w1, b1)), 0.0)
    y = inorm(conv(y, w2, b2))
    return jnp.transpose(x + y, (0, 3, 1, 2))


if __name__ == "__main__":
    N, C, H, W = 2, 4, 16, 16
    key = jax.random.PRNGKey(0)
    kx, k1, kb1, k2, kb2 = jax.random.split(key, 5)

    x = jax.random.normal(kx, (N, C, H, W), jnp.float32)
    bound = 1.0 / (C * 3 * 3) ** 0.5                # Conv2d default init range
    w1 = jax.random.uniform(k1, (3, 3, C, C), jnp.float32, -bound, bound)
    b1 = jax.random.uniform(kb1, (C,), jnp.float32, -bound, bound)
    w2 = jax.random.uniform(k2, (3, 3, C, C), jnp.float32, -bound, bound)
    b2 = jax.random.uniform(kb2, (C,), jnp.float32, -bound, bound)

    ref = jax.block_until_ready(_reference(x, w1, b1, w2, b2))

    # f32 path: tight tolerance vs. the f32 reference.
    out = jax.block_until_ready(residual_block(x, w1, b1, w2, b2))
    assert out.shape == (N, C, H, W) and out.dtype == x.dtype
    err = float(jnp.max(jnp.abs(out - ref)))
    assert err < 2e-4, f"f32 path max error {err}"

    # bf16-MXU path for f32 callers (flagged numeric change): loose tolerance.
    out_bf = jax.block_until_ready(
        residual_block(x, w1, b1, w2, b2, mxu_dtype=jnp.bfloat16))
    err_bf = float(jnp.max(jnp.abs(out_bf - ref)))
    assert err_bf < 1.5e-1, f"bf16 path max error {err_bf}"

    print("KERNEL_OK")
</pallas_src>

<mosaic_0001>
module attributes {stable_mosaic.version = 11 : i64} {
  func.func @_residual_block_kernel(%arg0: i32, %arg1: memref<1x16x16x128xf32, #tpu.memory_space<vmem>>, %arg2: memref<9x128x128xf32, #tpu.memory_space<vmem>>, %arg3: memref<9x128x128xf32, #tpu.memory_space<vmem>>, %arg4: memref<1x16x16x128xf32, #tpu.memory_space<vmem>>) attributes {dimension_semantics = [#tpu.dimension_semantics<parallel>], iteration_bounds = array<i64: 2>, scalar_prefetch = 0 : i64, scratch_operands = 0 : i64, tpu.core_type = #tpu.core_type<tc>, window_params = [{transform_indices = @transform_0, window_bounds = array<i64: 1, 16, 16, 128>}, {pipeline_mode = #tpu.pipeline_mode<synchronous>, transform_indices = @transform_1, window_bounds = array<i64: 9, 128, 128>}, {pipeline_mode = #tpu.pipeline_mode<synchronous>, transform_indices = @transform_2, window_bounds = array<i64: 9, 128, 128>}, {transform_indices = @transform_3, window_bounds = array<i64: 1, 16, 16, 128>}]} {
    %c0 = arith.constant 0 : index
    %c0_0 = arith.constant 0 : index
    %c0_1 = arith.constant 0 : index
    %c0_2 = arith.constant 0 : index
    %0 = vector.load %arg1[%c0, %c0_0, %c0_1, %c0_2] : memref<1x16x16x128xf32, #tpu.memory_space<vmem>>, vector<1x16x16x128xf32>
    %1 = vector.shape_cast %0 : vector<1x16x16x128xf32> to vector<16x16x128xf32>
    %2 = vector.extract_strided_slice %1 {offsets = [1, 0, 0], sizes = [1, 16, 128], strides = [1, 1, 1]} : vector<16x16x128xf32> to vector<1x16x128xf32>
    %3 = vector.extract_strided_slice %1 {offsets = [14, 0, 0], sizes = [1, 16, 128], strides = [1, 1, 1]} : vector<16x16x128xf32> to vector<1x16x128xf32>
    %4 = tpu.concatenate %2, %1, %3 in 0 : vector<1x16x128xf32>, vector<16x16x128xf32>, vector<1x16x128xf32> -> vector<18x16x128xf32>
    %5 = vector.extract_strided_slice %4 {offsets = [0, 1, 0], sizes = [18, 1, 128], strides = [1, 1, 1]} : vector<18x16x128xf32> to vector<18x1x128xf32>
    %6 = vector.extract_strided_slice %4 {offsets = [0, 14, 0], sizes = [18, 1, 128], strides = [1, 1, 1]} : vector<18x16x128xf32> to vector<18x1x128xf32>
    %7 = tpu.concatenate %5, %4, %6 in 1 : vector<18x1x128xf32>, vector<18x16x128xf32>, vector<18x1x128xf32> -> vector<18x18x128xf32>
    %8 = vector.extract_strided_slice %7 {offsets = [0, 0, 0], sizes = [16, 16, 128], strides = [1, 1, 1]} : vector<18x18x128xf32> to vector<16x16x128xf32>
    %9 = vector.shape_cast %8 : vector<16x16x128xf32> to vector<256x128xf32>
    %c0_3 = arith.constant 0 : index
    %c0_4 = arith.constant 0 : index
    %c0_5 = arith.constant 0 : index
    %10 = vector.load %arg2[%c0_3, %c0_4, %c0_5] : memref<9x128x128xf32, #tpu.memory_space<vmem>>, vector<1x128x128xf32>
    %11 = vector.shape_cast %10 : vector<1x128x128xf32> to vector<128x128xf32>
    %cst = arith.constant dense<0.000000e+00> : vector<256x128xf32>
    %12 = tpu.matmul %9, %11, %cst {dimension_numbers = #tpu.dot_dimension_numbers<[1], [0], [0], [1], [0, 0, 1, 1], [], []>} : vector<256x128xf32>, vector<128x128xf32>, vector<256x128xf32> -> vector<256x128xf32>
    %13 = vector.extract_strided_slice %7 {offsets = [0, 1, 0], sizes = [16, 16, 128], strides = [1, 1, 1]} : vector<18x18x128xf32> to vector<16x16x128xf32>
    %14 = vector.shape_cast %13 : vector<16x16x128xf32> to vector<256x128xf32>
    %c1 = arith.constant 1 : index
    %c0_6 = arith.constant 0 : index
    %c0_7 = arith.constant 0 : index
    %15 = vector.load %arg2[%c1, %c0_6, %c0_7] : memref<9x128x128xf32, #tpu.memory_space<vmem>>, vector<1x128x128xf32>
    %16 = vector.shape_cast %15 : vector<1x128x128xf32> to vector<128x128xf32>
    %cst_8 = arith.constant dense<0.000000e+00> : vector<256x128xf32>
    %17 = tpu.matmul %14, %16, %cst_8 {dimension_numbers = #tpu.dot_dimension_numbers<[1], [0], [0], [1], [0, 0, 1, 1], [], []>} : vector<256x128xf32>, vector<128x128xf32>, vector<256x128xf32> -> vector<256x128xf32>
    %18 = arith.addf %12, %17 : vector<256x128xf32>
    %19 = vector.extract_strided_slice %7 {offsets = [0, 2, 0], sizes = [16, 16, 128], strides = [1, 1, 1]} : vector<18x18x128xf32> to vector<16x16x128xf32>
    %20 = vector.shape_cast %19 : vector<16x16x128xf32> to vector<256x128xf32>
    %c2 = arith.constant 2 : index
    %c0_9 = arith.constant 0 : index
    %c0_10 = arith.constant 0 : index
    %21 = vector.load %arg2[%c2, %c0_9, %c0_10] : memref<9x128x128xf32, #tpu.memory_space<vmem>>, vector<1x128x128xf32>
    %22 = vector.shape_cast %21 : vector<1x128x128xf32> to vector<128x128xf32>
    %cst_11 = arith.constant dense<0.000000e+00> : vector<256x128xf32>
    %23 = tpu.matmul %20, %22, %cst_11 {dimension_numbers = #tpu.dot_dimension_numbers<[1], [0], [0], [1], [0, 0, 1, 1], [], []>} : vector<256x128xf32>, vector<128x128xf32>, vector<256x128xf32> -> vector<256x128xf32>
    %24 = arith.addf %18, %23 : vector<256x128xf32>
    %25 = vector.extract_strided_slice %7 {offsets = [1, 0, 0], sizes = [16, 16, 128], strides = [1, 1, 1]} : vector<18x18x128xf32> to vector<16x16x128xf32>
    %26 = vector.shape_cast %25 : vector<16x16x128xf32> to vector<256x128xf32>
    %c3 = arith.constant 3 : index
    %c0_12 = arith.constant 0 : index
    %c0_13 = arith.constant 0 : index
    %27 = vector.load %arg2[%c3, %c0_12, %c0_13] : memref<9x128x128xf32, #tpu.memory_space<vmem>>, vector<1x128x128xf32>
    %28 = vector.shape_cast %27 : vector<1x128x128xf32> to vector<128x128xf32>
    %cst_14 = arith.constant dense<0.000000e+00> : vector<256x128xf32>
    %29 = tpu.matmul %26, %28, %cst_14 {dimension_numbers = #tpu.dot_dimension_numbers<[1], [0], [0], [1], [0, 0, 1, 1], [], []>} : vector<256x128xf32>, vector<128x128xf32>, vector<256x128xf32> -> vector<256x128xf32>
    %30 = arith.addf %24, %29 : vector<256x128xf32>
    %31 = vector.extract_strided_slice %7 {offsets = [1, 1, 0], sizes = [16, 16, 128], strides = [1, 1, 1]} : vector<18x18x128xf32> to vector<16x16x128xf32>
    %32 = vector.shape_cast %31 : vector<16x16x128xf32> to vector<256x128xf32>
    %c4 = arith.constant 4 : index
    %c0_15 = arith.constant 0 : index
    %c0_16 = arith.constant 0 : index
    %33 = vector.load %arg2[%c4, %c0_15, %c0_16] : memref<9x128x128xf32, #tpu.memory_space<vmem>>, vector<1x128x128xf32>
    %34 = vector.shape_cast %33 : vector<1x128x128xf32> to vector<128x128xf32>
    %cst_17 = arith.constant dense<0.000000e+00> : vector<256x128xf32>
    %35 = tpu.matmul %32, %34, %cst_17 {dimension_numbers = #tpu.dot_dimension_numbers<[1], [0], [0], [1], [0, 0, 1, 1], [], []>} : vector<256x128xf32>, vector<128x128xf32>, vector<256x128xf32> -> vector<256x128xf32>
    %36 = arith.addf %30, %35 : vector<256x128xf32>
    %37 = vector.extract_strided_slice %7 {offsets = [1, 2, 0], sizes = [16, 16, 128], strides = [1, 1, 1]} : vector<18x18x128xf32> to vector<16x16x128xf32>
    %38 = vector.shape_cast %37 : vector<16x16x128xf32> to vector<256x128xf32>
    %c5 = arith.constant 5 : index
    %c0_18 = arith.constant 0 : index
    %c0_19 = arith.constant 0 : index
    %39 = vector.load %arg2[%c5, %c0_18, %c0_19] : memref<9x128x128xf32, #tpu.memory_space<vmem>>, vector<1x128x128xf32>
    %40 = vector.shape_cast %39 : vector<1x128x128xf32> to vector<128x128xf32>
    %cst_20 = arith.constant dense<0.000000e+00> : vector<256x128xf32>
    %41 = tpu.matmul %38, %40, %cst_20 {dimension_numbers = #tpu.dot_dimension_numbers<[1], [0], [0], [1], [0, 0, 1, 1], [], []>} : vector<256x128xf32>, vector<128x128xf32>, vector<256x128xf32> -> vector<256x128xf32>
    %42 = arith.addf %36, %41 : vector<256x128xf32>
    %43 = vector.extract_strided_slice %7 {offsets = [2, 0, 0], sizes = [16, 16, 128], strides = [1, 1, 1]} : vector<18x18x128xf32> to vector<16x16x128xf32>
    %44 = vector.shape_cast %43 : vector<16x16x128xf32> to vector<256x128xf32>
    %c6 = arith.constant 6 : index
    %c0_21 = arith.constant 0 : index
    %c0_22 = arith.constant 0 : index
    %45 = vector.load %arg2[%c6, %c0_21, %c0_22] : memref<9x128x128xf32, #tpu.memory_space<vmem>>, vector<1x128x128xf32>
    %46 = vector.shape_cast %45 : vector<1x128x128xf32> to vector<128x128xf32>
    %cst_23 = arith.constant dense<0.000000e+00> : vector<256x128xf32>
    %47 = tpu.matmul %44, %46, %cst_23 {dimension_numbers = #tpu.dot_dimension_numbers<[1], [0], [0], [1], [0, 0, 1, 1], [], []>} : vector<256x128xf32>, vector<128x128xf32>, vector<256x128xf32> -> vector<256x128xf32>
    %48 = arith.addf %42, %47 : vector<256x128xf32>
    %49 = vector.extract_strided_slice %7 {offsets = [2, 1, 0], sizes = [16, 16, 128], strides = [1, 1, 1]} : vector<18x18x128xf32> to vector<16x16x128xf32>
    %50 = vector.shape_cast %49 : vector<16x16x128xf32> to vector<256x128xf32>
    %c7 = arith.constant 7 : index
    %c0_24 = arith.constant 0 : index
    %c0_25 = arith.constant 0 : index
    %51 = vector.load %arg2[%c7, %c0_24, %c0_25] : memref<9x128x128xf32, #tpu.memory_space<vmem>>, vector<1x128x128xf32>
    %52 = vector.shape_cast %51 : vector<1x128x128xf32> to vector<128x128xf32>
    %cst_26 = arith.constant dense<0.000000e+00> : vector<256x128xf32>
    %53 = tpu.matmul %50, %52, %cst_26 {dimension_numbers = #tpu.dot_dimension_numbers<[1], [0], [0], [1], [0, 0, 1, 1], [], []>} : vector<256x128xf32>, vector<128x128xf32>, vector<256x128xf32> -> vector<256x128xf32>
    %54 = arith.addf %48, %53 : vector<256x128xf32>
    %55 = vector.extract_strided_slice %7 {offsets = [2, 2, 0], sizes = [16, 16, 128], strides = [1, 1, 1]} : vector<18x18x128xf32> to vector<16x16x128xf32>
    %56 = vector.shape_cast %55 : vector<16x16x128xf32> to vector<256x128xf32>
    %c8 = arith.constant 8 : index
    %c0_27 = arith.constant 0 : index
    %c0_28 = arith.constant 0 : index
    %57 = vector.load %arg2[%c8, %c0_27, %c0_28] : memref<9x128x128xf32, #tpu.memory_space<vmem>>, vector<1x128x128xf32>
    %58 = vector.shape_cast %57 : vector<1x128x128xf32> to vector<128x128xf32>
    %cst_29 = arith.constant dense<0.000000e+00> : vector<256x128xf32>
    %59 = tpu.matmul %56, %58, %cst_29 {dimension_numbers = #tpu.dot_dimension_numbers<[1], [0], [0], [1], [0, 0, 1, 1], [], []>} : vector<256x128xf32>, vector<128x128xf32>, vector<256x128xf32> -> vector<256x128xf32>
    %60 = arith.addf %54, %59 : vector<256x128xf32>
    %cst_30 = arith.constant dense<0.000000e+00> : vector<128xf32>
    %61 = vector.multi_reduction <add>, %60, %cst_30 [0] : vector<256x128xf32> to vector<128xf32>
    %62 = vector.shape_cast %61 : vector<128xf32> to vector<1x128xf32>
    %cst_31 = arith.constant 3.906250e-03 : f32
    %63 = vector.broadcast %cst_31 : f32 to vector<1x128xf32>
    %64 = arith.mulf %62, %63 : vector<1x128xf32>
    %65 = vector.broadcast %64 : vector<1x128xf32> to vector<256x128xf32>
    %66 = arith.subf %60, %65 : vector<256x128xf32>
    %67 = arith.mulf %66, %66 : vector<256x128xf32>
    %cst_32 = arith.constant dense<0.000000e+00> : vector<128xf32>
    %68 = vector.multi_reduction <add>, %67, %cst_32 [0] : vector<256x128xf32> to vector<128xf32>
    %69 = vector.shape_cast %68 : vector<128xf32> to vector<1x128xf32>
    %cst_33 = arith.constant 3.906250e-03 : f32
    %70 = vector.broadcast %cst_33 : f32 to vector<1x128xf32>
    %71 = arith.mulf %69, %70 : vector<1x128xf32>
    %cst_34 = arith.constant 9.99999974E-6 : f32
    %72 = vector.broadcast %cst_34 : f32 to vector<1x128xf32>
    %73 = arith.addf %71, %72 : vector<1x128xf32>
    %74 = math.rsqrt %73 : vector<1x128xf32>
    %75 = vector.broadcast %74 : vector<1x128xf32> to vector<256x128xf32>
    %76 = arith.mulf %66, %75 : vector<256x128xf32>
    %cst_35 = arith.constant 0.000000e+00 : f32
    %77 = vector.broadcast %cst_35 : f32 to vector<256x128xf32>
    %78 = arith.maximumf %76, %77 : vector<256x128xf32>
    %79 = vector.shape_cast %78 : vector<256x128xf32> to vector<16x16x128xf32>
    %80 = vector.extract_strided_slice %79 {offsets = [1, 0, 0], sizes = [1, 16, 128], strides = [1, 1, 1]} : vector<16x16x128xf32> to vector<1x16x128xf32>
    %81 = vector.extract_strided_slice %79 {offsets = [14, 0, 0], sizes = [1, 16, 128], strides = [1, 1, 1]} : vector<16x16x128xf32> to vector<1x16x128xf32>
    %82 = tpu.concatenate %80, %79, %81 in 0 : vector<1x16x128xf32>, vector<16x16x128xf32>, vector<1x16x128xf32> -> vector<18x16x128xf32>
    %83 = vector.extract_strided_slice %82 {offsets = [0, 1, 0], sizes = [18, 1, 128], strides = [1, 1, 1]} : vector<18x16x128xf32> to vector<18x1x128xf32>
    %84 = vector.extract_strided_slice %82 {offsets = [0, 14, 0], sizes = [18, 1, 128], strides = [1, 1, 1]} : vector<18x16x128xf32> to vector<18x1x128xf32>
    %85 = tpu.concatenate %83, %82, %84 in 1 : vector<18x1x128xf32>, vector<18x16x128xf32>, vector<18x1x128xf32> -> vector<18x18x128xf32>
    %86 = vector.extract_strided_slice %85 {offsets = [0, 0, 0], sizes = [16, 16, 128], strides = [1, 1, 1]} : vector<18x18x128xf32> to vector<16x16x128xf32>
    %87 = vector.shape_cast %86 : vector<16x16x128xf32> to vector<256x128xf32>
    %c0_36 = arith.constant 0 : index
    %c0_37 = arith.constant 0 : index
    %c0_38 = arith.constant 0 : index
    %88 = vector.load %arg3[%c0_36, %c0_37, %c0_38] : memref<9x128x128xf32, #tpu.memory_space<vmem>>, vector<1x128x128xf32>
    %89 = vector.shape_cast %88 : vector<1x128x128xf32> to vector<128x128xf32>
    %cst_39 = arith.constant dense<0.000000e+00> : vector<256x128xf32>
    %90 = tpu.matmul %87, %89, %cst_39 {dimension_numbers = #tpu.dot_dimension_numbers<[1], [0], [0], [1], [0, 0, 1, 1], [], []>} : vector<256x128xf32>, vector<128x128xf32>, vector<256x128xf32> -> vector<256x128xf32>
    %91 = vector.extract_strided_slice %85 {offsets = [0, 1, 0], sizes = [16, 16, 128], strides = [1, 1, 1]} : vector<18x18x128xf32> to vector<16x16x128xf32>
    %92 = vector.shape_cast %91 : vector<16x16x128xf32> to vector<256x128xf32>
    %c1_40 = arith.constant 1 : index
    %c0_41 = arith.constant 0 : index
    %c0_42 = arith.constant 0 : index
    %93 = vector.load %arg3[%c1_40, %c0_41, %c0_42] : memref<9x128x128xf32, #tpu.memory_space<vmem>>, vector<1x128x128xf32>
    %94 = vector.shape_cast %93 : vector<1x128x128xf32> to vector<128x128xf32>
    %cst_43 = arith.constant dense<0.000000e+00> : vector<256x128xf32>
    %95 = tpu.matmul %92, %94, %cst_43 {dimension_numbers = #tpu.dot_dimension_numbers<[1], [0], [0], [1], [0, 0, 1, 1], [], []>} : vector<256x128xf32>, vector<128x128xf32>, vector<256x128xf32> -> vector<256x128xf32>
    %96 = arith.addf %90, %95 : vector<256x128xf32>
    %97 = vector.extract_strided_slice %85 {offsets = [0, 2, 0], sizes = [16, 16, 128], strides = [1, 1, 1]} : vector<18x18x128xf32> to vector<16x16x128xf32>
    %98 = vector.shape_cast %97 : vector<16x16x128xf32> to vector<256x128xf32>
    %c2_44 = arith.constant 2 : index
    %c0_45 = arith.constant 0 : index
    %c0_46 = arith.constant 0 : index
    %99 = vector.load %arg3[%c2_44, %c0_45, %c0_46] : memref<9x128x128xf32, #tpu.memory_space<vmem>>, vector<1x128x128xf32>
    %100 = vector.shape_cast %99 : vector<1x128x128xf32> to vector<128x128xf32>
    %cst_47 = arith.constant dense<0.000000e+00> : vector<256x128xf32>
    %101 = tpu.matmul %98, %100, %cst_47 {dimension_numbers = #tpu.dot_dimension_numbers<[1], [0], [0], [1], [0, 0, 1, 1], [], []>} : vector<256x128xf32>, vector<128x128xf32>, vector<256x128xf32> -> vector<256x128xf32>
    %102 = arith.addf %96, %101 : vector<256x128xf32>
    %103 = vector.extract_strided_slice %85 {offsets = [1, 0, 0], sizes = [16, 16, 128], strides = [1, 1, 1]} : vector<18x18x128xf32> to vector<16x16x128xf32>
    %104 = vector.shape_cast %103 : vector<16x16x128xf32> to vector<256x128xf32>
    %c3_48 = arith.constant 3 : index
    %c0_49 = arith.constant 0 : index
    %c0_50 = arith.constant 0 : index
    %105 = vector.load %arg3[%c3_48, %c0_49, %c0_50] : memref<9x128x128xf32, #tpu.memory_space<vmem>>, vector<1x128x128xf32>
    %106 = vector.shape_cast %105 : vector<1x128x128xf32> to vector<128x128xf32>
    %cst_51 = arith.constant dense<0.000000e+00> : vector<256x128xf32>
    %107 = tpu.matmul %104, %106, %cst_51 {dimension_numbers = #tpu.dot_dimension_numbers<[1], [0], [0], [1], [0, 0, 1, 1], [], []>} : vector<256x128xf32>, vector<128x128xf32>, vector<256x128xf32> -> vector<256x128xf32>
    %108 = arith.addf %102, %107 : vector<256x128xf32>
    %109 = vector.extract_strided_slice %85 {offsets = [1, 1, 0], sizes = [16, 16, 128], strides = [1, 1, 1]} : vector<18x18x128xf32> to vector<16x16x128xf32>
    %110 = vector.shape_cast %109 : vector<16x16x128xf32> to vector<256x128xf32>
    %c4_52 = arith.constant 4 : index
    %c0_53 = arith.constant 0 : index
    %c0_54 = arith.constant 0 : index
    %111 = vector.load %arg3[%c4_52, %c0_53, %c0_54] : memref<9x128x128xf32, #tpu.memory_space<vmem>>, vector<1x128x128xf32>
    %112 = vector.shape_cast %111 : vector<1x128x128xf32> to vector<128x128xf32>
    %cst_55 = arith.constant dense<0.000000e+00> : vector<256x128xf32>
    %113 = tpu.matmul %110, %112, %cst_55 {dimension_numbers = #tpu.dot_dimension_numbers<[1], [0], [0], [1], [0, 0, 1, 1], [], []>} : vector<256x128xf32>, vector<128x128xf32>, vector<256x128xf32> -> vector<256x128xf32>
    %114 = arith.addf %108, %113 : vector<256x128xf32>
    %115 = vector.extract_strided_slice %85 {offsets = [1, 2, 0], sizes = [16, 16, 128], strides = [1, 1, 1]} : vector<18x18x128xf32> to vector<16x16x128xf32>
    %116 = vector.shape_cast %115 : vector<16x16x128xf32> to vector<256x128xf32>
    %c5_56 = arith.constant 5 : index
    %c0_57 = arith.constant 0 : index
    %c0_58 = arith.constant 0 : index
    %117 = vector.load %arg3[%c5_56, %c0_57, %c0_58] : memref<9x128x128xf32, #tpu.memory_space<vmem>>, vector<1x128x128xf32>
    %118 = vector.shape_cast %117 : vector<1x128x128xf32> to vector<128x128xf32>
    %cst_59 = arith.constant dense<0.000000e+00> : vector<256x128xf32>
    %119 = tpu.matmul %116, %118, %cst_59 {dimension_numbers = #tpu.dot_dimension_numbers<[1], [0], [0], [1], [0, 0, 1, 1], [], []>} : vector<256x128xf32>, vector<128x128xf32>, vector<256x128xf32> -> vector<256x128xf32>
    %120 = arith.addf %114, %119 : vector<256x128xf32>
    %121 = vector.extract_strided_slice %85 {offsets = [2, 0, 0], sizes = [16, 16, 128], strides = [1, 1, 1]} : vector<18x18x128xf32> to vector<16x16x128xf32>
    %122 = vector.shape_cast %121 : vector<16x16x128xf32> to vector<256x128xf32>
    %c6_60 = arith.constant 6 : index
    %c0_61 = arith.constant 0 : index
    %c0_62 = arith.constant 0 : index
    %123 = vector.load %arg3[%c6_60, %c0_61, %c0_62] : memref<9x128x128xf32, #tpu.memory_space<vmem>>, vector<1x128x128xf32>
    %124 = vector.shape_cast %123 : vector<1x128x128xf32> to vector<128x128xf32>
    %cst_63 = arith.constant dense<0.000000e+00> : vector<256x128xf32>
    %125 = tpu.matmul %122, %124, %cst_63 {dimension_numbers = #tpu.dot_dimension_numbers<[1], [0], [0], [1], [0, 0, 1, 1], [], []>} : vector<256x128xf32>, vector<128x128xf32>, vector<256x128xf32> -> vector<256x128xf32>
    %126 = arith.addf %120, %125 : vector<256x128xf32>
    %127 = vector.extract_strided_slice %85 {offsets = [2, 1, 0], sizes = [16, 16, 128], strides = [1, 1, 1]} : vector<18x18x128xf32> to vector<16x16x128xf32>
    %128 = vector.shape_cast %127 : vector<16x16x128xf32> to vector<256x128xf32>
    %c7_64 = arith.constant 7 : index
    %c0_65 = arith.constant 0 : index
    %c0_66 = arith.constant 0 : index
    %129 = vector.load %arg3[%c7_64, %c0_65, %c0_66] : memref<9x128x128xf32, #tpu.memory_space<vmem>>, vector<1x128x128xf32>
    %130 = vector.shape_cast %129 : vector<1x128x128xf32> to vector<128x128xf32>
    %cst_67 = arith.constant dense<0.000000e+00> : vector<256x128xf32>
    %131 = tpu.matmul %128, %130, %cst_67 {dimension_numbers = #tpu.dot_dimension_numbers<[1], [0], [0], [1], [0, 0, 1, 1], [], []>} : vector<256x128xf32>, vector<128x128xf32>, vector<256x128xf32> -> vector<256x128xf32>
    %132 = arith.addf %126, %131 : vector<256x128xf32>
    %133 = vector.extract_strided_slice %85 {offsets = [2, 2, 0], sizes = [16, 16, 128], strides = [1, 1, 1]} : vector<18x18x128xf32> to vector<16x16x128xf32>
    %134 = vector.shape_cast %133 : vector<16x16x128xf32> to vector<256x128xf32>
    %c8_68 = arith.constant 8 : index
    %c0_69 = arith.constant 0 : index
    %c0_70 = arith.constant 0 : index
    %135 = vector.load %arg3[%c8_68, %c0_69, %c0_70] : memref<9x128x128xf32, #tpu.memory_space<vmem>>, vector<1x128x128xf32>
    %136 = vector.shape_cast %135 : vector<1x128x128xf32> to vector<128x128xf32>
    %cst_71 = arith.constant dense<0.000000e+00> : vector<256x128xf32>
    %137 = tpu.matmul %134, %136, %cst_71 {dimension_numbers = #tpu.dot_dimension_numbers<[1], [0], [0], [1], [0, 0, 1, 1], [], []>} : vector<256x128xf32>, vector<128x128xf32>, vector<256x128xf32> -> vector<256x128xf32>
    %138 = arith.addf %132, %137 : vector<256x128xf32>
    %cst_72 = arith.constant dense<0.000000e+00> : vector<128xf32>
    %139 = vector.multi_reduction <add>, %138, %cst_72 [0] : vector<256x128xf32> to vector<128xf32>
    %140 = vector.shape_cast %139 : vector<128xf32> to vector<1x128xf32>
    %cst_73 = arith.constant 3.906250e-03 : f32
    %141 = vector.broadcast %cst_73 : f32 to vector<1x128xf32>
    %142 = arith.mulf %140, %141 : vector<1x128xf32>
    %143 = vector.broadcast %142 : vector<1x128xf32> to vector<256x128xf32>
    %144 = arith.subf %138, %143 : vector<256x128xf32>
    %145 = arith.mulf %144, %144 : vector<256x128xf32>
    %cst_74 = arith.constant dense<0.000000e+00> : vector<128xf32>
    %146 = vector.multi_reduction <add>, %145, %cst_74 [0] : vector<256x128xf32> to vector<128xf32>
    %147 = vector.shape_cast %146 : vector<128xf32> to vector<1x128xf32>
    %cst_75 = arith.constant 3.906250e-03 : f32
    %148 = vector.broadcast %cst_75 : f32 to vector<1x128xf32>
    %149 = arith.mulf %147, %148 : vector<1x128xf32>
    %cst_76 = arith.constant 9.99999974E-6 : f32
    %150 = vector.broadcast %cst_76 : f32 to vector<1x128xf32>
    %151 = arith.addf %149, %150 : vector<1x128xf32>
    %152 = math.rsqrt %151 : vector<1x128xf32>
    %153 = vector.broadcast %152 : vector<1x128xf32> to vector<256x128xf32>
    %154 = arith.mulf %144, %153 : vector<256x128xf32>
    %155 = vector.shape_cast %1 : vector<16x16x128xf32> to vector<256x128xf32>
    %156 = arith.addf %155, %154 : vector<256x128xf32>
    %157 = vector.shape_cast %156 : vector<256x128xf32> to vector<16x16x128xf32>
    %c0_77 = arith.constant 0 : index
    %c0_78 = arith.constant 0 : index
    %c0_79 = arith.constant 0 : index
    %c0_80 = arith.constant 0 : index
    %158 = vector.load %arg4[%c0_77, %c0_78, %c0_79, %c0_80] : memref<1x16x16x128xf32, #tpu.memory_space<vmem>>, vector<1x16x16x128xf32>
    %159 = vector.shape_cast %158 : vector<1x16x16x128xf32> to vector<16x16x128xf32>
    %160 = vector.shape_cast %157 : vector<16x16x128xf32> to vector<1x16x16x128xf32>
    tpu.vector_store %arg4[%c0_77, %c0_78, %c0_79, %c0_80], %160 {strides = array<i32>} : memref<1x16x16x128xf32, #tpu.memory_space<vmem>>, vector<1x16x16x128xf32>,
    return
  }
  func.func @transform_0(%arg0: i32) -> (i32, i32, i32, i32) {
    %c0_i32 = arith.constant 0 : i32
    %c0_i32_0 = arith.constant 0 : i32
    %c0_i32_1 = arith.constant 0 : i32
    %c0_i32_2 = arith.constant 0 : i32
    return %arg0, %c0_i32, %c0_i32_0, %c0_i32_1 : i32, i32, i32, i32
  }
  func.func @transform_1(%arg0: i32) -> (i32, i32, i32) {
    %c0_i32 = arith.constant 0 : i32
    %c0_i32_0 = arith.constant 0 : i32
    %c0_i32_1 = arith.constant 0 : i32
    %c0_i32_2 = arith.constant 0 : i32
    return %c0_i32, %c0_i32_0, %c0_i32_1 : i32, i32, i32
  }
  func.func @transform_2(%arg0: i32) -> (i32, i32, i32) {
    %c0_i32 = arith.constant 0 : i32
    %c0_i32_0 = arith.constant 0 : i32
    %c0_i32_1 = arith.constant 0 : i32
    %c0_i32_2 = arith.constant 0 : i32
    return %c0_i32, %c0_i32_0, %c0_i32_1 : i32, i32, i32
  }
  func.func @transform_3(%arg0: i32) -> (i32, i32, i32, i32) {
    %c0_i32 = arith.constant 0 : i32
    %c0_i32_0 = arith.constant 0 : i32
    %c0_i32_1 = arith.constant 0 : i32
    %c0_i32_2 = arith.constant 0 : i32
    return %arg0, %c0_i32, %c0_i32_0, %c0_i32_1 : i32, i32, i32, i32
  }
}

</mosaic_0001>

<bundles_post_ra>
// kernel: tpu_custom_call.1
= control target key start
LH: loop header
LB: loop body
LE: loop exit
PB: predicated region body
PF: predicated region fallthrough
CT: control target
= control target key end

     0   :  { %8 = vsyncpa [#allocation3], 0  ;;  %s12702_s0 = inlined_call_operand.hbm [shape: f32[2,16,16,128], index: 0, kind: input, shape index: {}]   ;;  %s12703_s1 = inlined_call_operand.hbm [shape: f32[9,128,128], index: 1, kind: input, shape index: {}]   ;;  %s12704_s2 = inlined_call_operand.hbm [shape: f32[9,128,128], index: 2, kind: input, shape index: {}]   ;;  %s12705_s3 = inlined_call_operand.hbm [shape: f32[2,16,16,128], index: 3, kind: output, shape index: {}]  }
   0x1   :  { %10 = vsyncpa [#allocation3 + $0x1], 0 }
   0x2   :  { %11 = vsyncpa [#allocation6], 0 }
   0x3   :  { %12 = vsyncpa [#allocation4], 0 }
   0x4   :  { %14 = vsyncpa [#allocation4 + $0x1], 0  ;;  %s10270_s12 = smov 0   ;;  %s10272_s13 = smov 0  }
   0x5   :  { %s10274_s14 = smov 0   ;;  %s10276_s15 = smov 0  }
   0x6 LB: > { %s10291_s16 = sadd.s32 4294967295, %s10240_s15   ;;  %s6565_s17 = sadd.s32 4294967294, %s10240_s15   ;;  %s10240_s15 = sphi %s10276_s15, %s13151_s15   ;;  %s10236_s14 = sphi %s10274_s14, %s13150_s14   ;;  %s10232_s13 = sphi %s10272_s13, %s13149_s13   ;;  %s10228_s12 = sphi %s10270_s12, %s13148_s12  }
   0x7   : > { %p40_p0 = scmp.ne.s32.totalorder %s10232_s13, %s10228_s12  ;;  %p12706_p1 = scmp.eq.s32.totalorder %s10291_s16, 0 }
   0x8   : > { %p112_p3 = scmp.eq.s32.totalorder %s6565_s17, 1  ;;  %p6566_p5 = scmp.ge.s32.totalorder %s10240_s15, 1 }
   0x9   : > { %p10300_p4 = por %p12706_p1, %p40_p0  ;;  %p119_p7 = scmp.lt.s32.totalorder %s10240_s15, 3 }
   0xa   : > { %p10305_p6 = por %p112_p3, %p40_p0  ;;  %s10242_s21 = smov [#allocation5]  }
   0xb   : > { %s12885_s18 = scalar_select %p10300_p4, 1, 0 }
   0xc   : > { %s12886_s19 = scalar_select %p10305_p6, 1, 0 }
   0xd   : > { %p10310_p8 = pnand %p6566_p5, %p119_p7  ;;  %s131_s22 = sshll.u32 %s10242_s21, 4  ;;  %s10314_s22 = int_to_ptr.vmem [resolvable:$true] %s131_s22 }
   0xe   : > { %s10243_s24 = smov [#allocation7]   ;;  %s10084_s28 = scalar_lea.hbm %s12703_s1, 18432 }
   0xf   : > { %p9989_p9 = pneg %p10310_p8  ;;  %s144_s25 = sshll.u32 %s10243_s24, 4  ;;  %s10325_s25 = int_to_ptr.vmem [resolvable:$true] %s144_s25 }
  0x10   : > { %p10085_p12 = scmp.ne.s32.totalorder %s12703_s1, %s10084_s28  ;;  %p10091_p5 = scmp.lt.u32.totalorder %s10084_s28, %s12703_s1 }
  0x11   : > { %p10321_p11 = pnand %p9989_p9, %p12706_p1 }
  0x13   : > { %p10086_p13 = pneg %p10321_p11 }
  0x15   : > { %p10087_p0 = pnand %p10086_p13, %p10085_p12 }
  0x17   : > { %p10088_p3 = pneg %p10087_p0 }
  0x19   : > { %p10093_p7 = pnand %p10091_p5, %p10088_p3 }
  0x1b   : > { %10096 = shalt.err (!%p10093_p7)
}
  0x1c   : > { %s10097_s6 = scalar_lea.vmem %s10314_s22, 18432  ;;  %p10105_p2 = scmp.lt.s32.totalorder %s10314_s22, %s10314_s22 }
  0x1d   : > { %p10098_p9 = scmp.ne.s32.totalorder %s10314_s22, %s10097_s6  ;;  %p10106_p12 = scmp.lt.s32.totalorder %s10097_s6, %s10097_s6 }
  0x1f   : > { %p10100_p10 = pnand %p10098_p9, %p10086_p13  ;;  %p10107_p0 = por %p10106_p12, %p10105_p2 }
  0x21   : > { %p10101_p1 = pneg %p10100_p10 }
  0x23   : > { %p10108_p6 = pnand %p10107_p0, %p10101_p1 }
  0x25   : > { %10111 = shalt.err (!%p10108_p6)
}
  0x26   : > { %s10244_s7 = smov 128   ;;  %s10245_s8 = smov 8  }
  0x27   : > { %9992 = dma.hbm_to_vmem [thread:$0]  (!%p10321_p11), %s12703_s1, 18432, %s10314_s22, [#allocation6], %s10244_s7, %s10244_s7, %s10245_s8  }
  0x28   : > { %s10112_s21 = scalar_lea.hbm %s12704_s2, 18432 }
  0x29   : > { %p10113_p1 = scmp.ne.s32.totalorder %s12704_s2, %s10112_s21  ;;  %p10119_p10 = scmp.lt.u32.totalorder %s10112_s21, %s12704_s2 }
  0x2b   : > { %p10115_p2 = pnand %p10113_p1, %p10086_p13 }
  0x2d   : > { %p10116_p6 = pneg %p10115_p2 }
  0x2f   : > { %p10121_p3 = pnand %p10119_p10, %p10116_p6 }
  0x31   : > { %10124 = shalt.err (!%p10121_p3)
}
  0x32   : > { %s10125_s22 = scalar_lea.vmem %s10325_s25, 18432  ;;  %p10133_p12 = scmp.lt.s32.totalorder %s10325_s25, %s10325_s25 }
  0x33   : > { %p10126_p5 = scmp.ne.s32.totalorder %s10325_s25, %s10125_s22  ;;  %p10134_p0 = scmp.lt.s32.totalorder %s10125_s22, %s10125_s22 }
  0x35   : > { %p10128_p7 = pnand %p10126_p5, %p10086_p13  ;;  %p10135_p1 = por %p10134_p0, %p10133_p12 }
  0x37   : > { %p10129_p9 = pneg %p10128_p7 }
  0x39   : > { %p10136_p2 = pnand %p10135_p1, %p10129_p9 }
  0x3b   : > { %10139 = shalt.err (!%p10136_p2)
}
  0x3c   : > { %9995 = dma.hbm_to_vmem [thread:$0]  (!%p10321_p11), %s12704_s2, 18432, %s10325_s25, [#allocation6], %s10244_s7, %s10244_s7, %s10245_s8  }
  0x3d   : > { %s10386_s23 = sadd.s32 1, %s10240_s15   ;;  %s27_s4 = sadd.s32 1, %s10236_s14 }
  0x3e   : > { %s24_s5 = ssub.s32 %s10240_s15, %s10386_s23  ;;  %p34_p13 = scmp.ne.s32.totalorder %s10236_s14, %s10232_s13 }
  0x3f   : > { %p25_p6 = scmp.eq.s32.totalorder %s24_s5, 0  ;;  %p35_p10 = scmp.eq.s32.totalorder %s10240_s15, 0 }
  0x40   : > { %p12889_p3 = scmp.eq.s32.totalorder %s10291_s16, 1  ;;  %p10006_p7 = scmp.lt.s32.totalorder %s10240_s15, 2 }
  0x41   : > { %s10402_s9 = scalar_select %p25_p6, %s10236_s14, %s27_s4  }
  0x42   : > { %p10396_p5 = por %p12889_p3, %p34_p13  ;;  %p36_p9 = por %p35_p10, %p34_p13 }
  0x43   : > { %s158_s10 = sand.u32 1, %s10236_s14   ;;  %s6583_s25 = sshll.u32 %s10240_s15, 12 }
  0x44   : > { %s12890_s6 = scalar_select %p10396_p5, 1, 0 }
  0x45   : > { %s6570_s11 = sshll.u32 %s158_s10, 8  ;;  %s10409_s24 = scalar_lea.hbm %s12702_s0, %s6583_s25 }
  0x46   : > { %s162_s26 = scalar_lea.vmem [#allocation2], %s6570_s11  ;;  %p10413_p11 = pnand %p10006_p7, %p36_p9 }
  0x47   : > { %s169_s27 = sshll.u32 %s162_s26, 4  ;;  %s10417_s22 = scalar_lea.sflag [#allocation3], %s158_s10  ;;  %s10411_s27 = int_to_ptr.vmem [resolvable:$true] %s169_s27 }
  0x48   : > { %s10140_s29 = scalar_lea.hbm %s10409_s24, 4096  ;;  %p10142_p0 = pneg %p10413_p11 }
  0x49   : > { %p10141_p12 = scmp.ne.s32.totalorder %s10409_s24, %s10140_s29  ;;  %s10145_s5 = scalar_lea.hbm %s12702_s0, 8192 }
  0x4a   : > { %p10146_p13 = scmp.lt.u32.totalorder %s10409_s24, %s12702_s0  ;;  %p10147_p6 = scmp.lt.u32.totalorder %s10145_s5, %s10140_s29 }
  0x4b   : > { %p10143_p1 = pnand %p10142_p0, %p10141_p12  ;;  %p10149_p3 = scmp.lt.u32.totalorder %s10140_s29, %s10409_s24 }
  0x4c   : > { %p10148_p10 = por %p10147_p6, %p10146_p13 }
  0x4d   : > { %p10144_p2 = pneg %p10143_p1 }
  0x4e   : > { %p10150_p7 = por %p10149_p3, %p10148_p10 }
  0x50   : > { %p10151_p9 = pnand %p10150_p7, %p10144_p2 }
  0x52   : > { %10154 = shalt.err (!%p10151_p9)
}
  0x53   : > { %s10155_s10 = scalar_lea.vmem %s10411_s27, 4096  ;;  %s10246_s17 = smov [#allocation2]  }
  0x54   : > { %p10156_p12 = scmp.ne.s32.totalorder %s10411_s27, %s10155_s10  ;;  %s10160_s21 = sshll.u32 %s10246_s17, 4  ;;  %s10161_s21 = int_to_ptr.vmem [resolvable:$false] %s10160_s21 }
  0x55   : > { %s10162_s26 = scalar_lea.vmem %s10161_s21, 8192  ;;  %p10163_p4 = scmp.lt.s32.totalorder %s10411_s27, %s10161_s21 }
  0x56   : > { %p10158_p1 = pnand %p10156_p12, %p10142_p0  ;;  %p10164_p13 = scmp.lt.s32.totalorder %s10162_s26, %s10155_s10 }
  0x58   : > { %p10159_p5 = pneg %p10158_p1  ;;  %p10165_p6 = por %p10164_p13, %p10163_p4 }
  0x5a   : > { %p10166_p10 = pnand %p10165_p6, %p10159_p5 }
  0x5c   : > { %10169 = shalt.err (!%p10166_p10)
}
  0x5d   : > { %9999 = dma.hbm_to_vmem [thread:$0]  (!%p10413_p11), %s10409_s24, 4096, %s10411_s27, %s10417_s22, %s10244_s7, %s10244_s7, %s10245_s8  }
  0x5e   : > { %181 = sbr.rel (%p10310_p8) target bundleno = 1999 (0x7cf), region = 32 }
  0x65   : > { %s10451_s29 = sand.u32 1, %s10232_s13   ;;  %p12892_p4 = scmp.ne.s32.totalorder %s12885_s18, 0 }
  0x66   : > { %s6574_s30 = sshll.u32 %s10451_s29, 8  ;;  %s184_s4 = scalar_lea.sflag [#allocation3], %s10451_s29 }
  0x67   : > { %s10457_s28 = scalar_lea.vmem [#allocation2], %s6574_s30 }
  0x68   : > { %10215 = dma.done.wait (%p12892_p4), %s184_s4, 4096  }
  0x69   : > { %10217 = vsyncadd (%p12892_p4), %s184_s4, 4294963200  ;;  %p12893_p5 = scmp.eq.s32.totalorder %s10291_s16, 0 }
  0x6b   : > { %10219 = dma.done.wait (%p12893_p5), [#allocation6], 36864   ;;  %p12894_p8 = pmov %p12893_p5 }
  0x6c   : > { %v628_v0 = vld [vmem:[#allocation5 + $0x80] sm:$0xff]  ;;  %v629_v1 = vld [vmem:[#allocation5 + $0x88] sm:$0xff]  ;;  %v630_v2 = vld [vmem:[#allocation5 + $0x90] sm:$0xff]  ;;  %vm314_vm0 = vcmask 1040384   ;;  %vm521_vm1 = vcmask 1046528   ;;  %vm1094_vm2 = vcmask 1045504  }
  0x6d   : > { %10221 = vsyncadd (%p12894_p8), [#allocation6], 4294930432  ;;  %v8889_v3 = vpack.c.bf16 %v629_v1, %v628_v0  ;;  %v631_v4 = vld [vmem:[#allocation5 + $0x98] sm:$0xff]  ;;  %v632_v6 = vld [vmem:[#allocation5 + $0xa0] sm:$0xff]  ;;  %s12529_s18 = scalar_lea.vmem [#allocation8], %s6574_s30  ;;  %s6584_s20 = sshll.u32 %s10291_s16, 12 }
  0x6e   : > { %v8893_v5 = vpack.c.bf16 %v631_v4, %v630_v2  ;;  %v633_v7 = vld [vmem:[#allocation5 + $0xa8] sm:$0xff]  ;;  %v220_v9 = vld [vmem:[%s10457_s28 + $0x10] sm:$0xff]  ;;  %v221_v10 = vld [vmem:[%s10457_s28 + $0x18] sm:$0xff]  ;;  %s6473_s7 = sshll.u32 %s12529_s18, 4  ;;  %s12634_s27 = scalar_lea.hbm %s12705_s3, %s6584_s20  ;;  %s12638_s7 = int_to_ptr.vmem [resolvable:$true] %s6473_s7 }
  0x6f   : > { %8890 = vmatprep.subr.bf16.mxu0 %v8889_v3  ;;  %v8897_v8 = vpack.c.bf16 %v633_v7, %v632_v6  ;;  %v634_v11 = vld [vmem:[#allocation5 + $0xb0] sm:$0xff]  ;;  %v635_v12 = vld [vmem:[#allocation5 + $0xb8] sm:$0xff]  ;;  %v266_v13 = vrot.slane %v220_v9, 1  ;;  %v315_v14 = vrot.slane %v220_v9, 7  ;;  %v316_v15 = vrot.slane %v221_v10, 7  ;;  %v636_v21 = vld [vmem:[#allocation5 + $0xc0] sm:$0xff] }
  0x70   : > { %8892 = vmatpush3.bf16.msra.mxu0 %v8889_v3  ;;  %v8901_v18 = vpack.c.bf16 %v635_v12, %v634_v11  ;;  %v637_v22 = vld [vmem:[#allocation5 + $0xc8] sm:$0xff]  ;;  %v638_v25 = vld [vmem:[#allocation5 + $0xd0] sm:$0xff]  ;;  %v639_v26 = vld [vmem:[#allocation5 + $0xd8] sm:$0xff]  ;;  %v411_v33 = vrot.slane %v221_v10, 5  ;;  %s6460_s16 = scalar_lea.sflag [#allocation4], %s10451_s29  ;;  %s10170_s22 = scalar_lea.vmem %s12638_s7, 4096 }
  0x71   : > { %8894 = vmatprep.subr.bf16.mxu0 %v8893_v5  ;;  %v10470_v16 = vsel %vm314_vm0, %v315_v14, %v316_v15  ;;  %v10473_v17 = vsel %vm314_vm0, %v266_v13, %v315_v14  ;;  %v8905_v24 = vpack.c.bf16 %v637_v22, %v636_v21  ;;  %v8909_v27 = vpack.c.bf16 %v639_v26, %v638_v25  ;;  %v640_v28 = vld [vmem:[#allocation5 + $0xe0] sm:$0xff]  ;;  %v641_v29 = vld [vmem:[#allocation5 + $0xe8] sm:$0xff]  ;;  %v642_v36 = vld [vmem:[#allocation5 + $0xf0] sm:$0xff]  ;;  %p10171_p11 = scmp.ne.s32.totalorder %s12638_s7, %s10170_s22  ;;  %p13145_p0 = scmp.ne.s32.totalorder %s12890_s6, 0 }
  0x72   : > { %v522_v19 = vrot.slane %v10473_v17, 1  ;;  %v523_v20 = vrot.slane %v10470_v16, 1  ;;  %v218_v30 = vld [vmem:[%s10457_s28] sm:$0xff]  ;;  %v219_v31 = vld [vmem:[%s10457_s28 + $0x8] sm:$0xff]  ;;  %v8913_v32 = vpack.c.bf16 %v641_v29, %v640_v28  ;;  %v643_v37 = vld [vmem:[#allocation5 + $0xf8] sm:$0xff]  ;;  %v10484_v40 = vsel %vm314_vm0, %v316_v15, %v411_v33  ;;  %s10247_s5 = smov [#allocation8]  }
  0x73   : > { %v267_v34 = vrot.slane %v218_v30, 1  ;;  %v318_v35 = vrot.slane %v218_v30, 7  ;;  %v319_v38 = vrot.slane %v219_v31, 7  ;;  %v8917_v39 = vpack.c.bf16 %v643_v37, %v642_v36  ;;  %v475_v41 = vld [vmem:[#allocation5] sm:$0xff]  ;;  %v476_v42 = vld [vmem:[#allocation5 + $0x8] sm:$0xff]  ;;  %v477_v53 = vld [vmem:[#allocation5 + $0x10] sm:$0xff]  ;;  %p10172_p2 = pnand %p10171_p11, %p13145_p0 }
  0x74   : > { %8896 = vmatpush3.bf16.msra.mxu0 %v8893_v5  ;;  %v10478_v23 = vsel %vm521_vm1, %v522_v19, %v523_v20  ;;  %v412_v44 = vrot.slane %v219_v31, 5  ;;  %v222_v46 = vld [vmem:[%s10457_s28 + $0x20] sm:$0xff]  ;;  %v223_v47 = vld [vmem:[%s10457_s28 + $0x28] sm:$0xff]  ;;  %v525_v48 = vrot.slane %v10484_v40, 1  ;;  %v8921_v49 = vpack.c.bf16 %v476_v42, %v475_v41  ;;  %v478_v54 = vld [vmem:[#allocation5 + $0x18] sm:$0xff]  ;;  %s10174_s11 = sshll.u32 %s10247_s5, 4  ;;  %s10175_s11 = int_to_ptr.vmem [resolvable:$false] %s10174_s11 }
  0x75   : > { %8898 = vmatprep.subr.bf16.mxu0 %v8897_v8  ;;  %12895 = vst [vmem:[#allocation12_spill] sm:$0xff] %v10478_v23  ;;  %7481 = vmatprep.mubr.f32.mxu0 %v10478_v23  ;;  %v10487_v43 = vsel %vm314_vm0, %v267_v34, %v318_v35  ;;  %v10490_v45 = vsel %vm314_vm0, %v318_v35, %v319_v38  ;;  %v268_v55 = vrot.slane %v222_v46, 1  ;;  %v321_v56 = vrot.slane %v222_v46, 7  ;;  %v224_v58 = vld [vmem:[%s10457_s28 + $0x30] sm:$0xff]  ;;  %v225_v59 = vld [vmem:[%s10457_s28 + $0x38] sm:$0xff]  ;;  %v479_v6 = vld [vmem:[#allocation5 + $0x20] sm:$0xff]  ;;  %p10173_p3 = pneg %p10172_p2  ;;  %p10177_p7 = scmp.lt.s32.totalorder %s12638_s7, %s10175_s11 }
  0x76   : > { %v527_v50 = vrot.slane %v10487_v43, 1  ;;  %v528_v51 = vrot.slane %v10490_v45, 1  ;;  %v10498_v52 = vsel %vm314_vm0, %v319_v38, %v412_v44  ;;  %v322_v57 = vrot.slane %v223_v47, 7  ;;  %v480_v7 = vld [vmem:[#allocation5 + $0x28] sm:$0xff]  ;;  %v228_v19 = vld [vmem:[%s10457_s28 + $0x50] sm:$0xff]  ;;  %v483_v41 = vld [vmem:[#allocation5 + $0x40] sm:$0xff] }
  0x77   : > { %v10503_v60 = vsel %vm521_vm1, %v523_v20, %v525_v48  ;;  %v530_v61 = vrot.slane %v10498_v52, 1  ;;  %v8925_v62 = vpack.c.bf16 %v478_v54, %v477_v53  ;;  %v413_v63 = vrot.slane %v223_v47, 5  ;;  %v227_v9 = vld [vmem:[%s10457_s28 + $0x48] sm:$0xff]  ;;  %v229_v20 = vld [vmem:[%s10457_s28 + $0x58] sm:$0xff]  ;;  %v481_v26 = vld [vmem:[#allocation5 + $0x30] sm:$0xff]  ;;  %s10176_s25 = scalar_lea.vmem %s10175_s11, 8192 }
  0x78   : > { %8900 = vmatpush3.bf16.msra.mxu0 %v8897_v8  ;;  %12896 = vst [vmem:[#allocation13_spill] sm:$0xff] %v10503_v60  ;;  %v10507_v0 = vsel %vm521_vm1, %v527_v50, %v528_v51  ;;  %v10510_v1 = vsel %vm314_vm0, %v268_v55, %v321_v56  ;;  %v269_v2 = vrot.slane %v224_v58, 1  ;;  %v324_v3 = vrot.slane %v224_v58, 7  ;;  %v226_v8 = vld [vmem:[%s10457_s28 + $0x40] sm:$0xff]  ;;  %v484_v42 = vld [vmem:[#allocation5 + $0x48] sm:$0xff]  ;;  %v233_v58 = vld [vmem:[%s10457_s28 + $0x78] sm:$0xff]  ;;  %p10178_p9 = scmp.lt.s32.totalorder %s10176_s25, %s10170_s22 }
  0x79   : > { %8902 = vmatprep.subr.bf16.mxu0 %v8901_v18  ;;  %v10513_v4 = vsel %vm314_vm0, %v321_v56, %v322_v57  ;;  %v325_v5 = vrot.slane %v225_v59, 7  ;;  %v10520_v10 = vsel %vm521_vm1, %v528_v51, %v530_v61  ;;  %v532_v11 = vrot.slane %v10510_v1, 1  ;;  %v230_v47 = vld [vmem:[%s10457_s28 + $0x60] sm:$0xff]  ;;  %v231_v48 = vld [vmem:[%s10457_s28 + $0x68] sm:$0xff] }
  0x7a   : > { %v10524_v12 = vsel %vm314_vm0, %v322_v57, %v413_v63  ;;  %v533_v13 = vrot.slane %v10513_v4, 1  ;;  %v10528_v14 = vsel %vm314_vm0, %v269_v2, %v324_v3  ;;  %v414_v15 = vrot.slane %v225_v59, 5  ;;  %v232_v57 = vld [vmem:[%s10457_s28 + $0x70] sm:$0xff]  ;;  %p10179_p12 = por %p10178_p9, %p10177_p7 }
  0x7b   : > { %v10533_v21 = vsel %vm314_vm0, %v324_v3, %v325_v5  ;;  %v270_v22 = vrot.slane %v226_v8, 1  ;;  %v328_v25 = vrot.slane %v227_v9, 7  ;;  %v535_v28 = vrot.slane %v10524_v12, 1  ;;  %v485_v3 = vld [vmem:[#allocation5 + $0x50] sm:$0xff] }
  0x7c   : > { %8904 = vmatpush3.bf16.msra.mxu0 %v8901_v18  ;;  %v8929_v18 = vpack.c.bf16 %v480_v7, %v479_v6  ;;  %v415_v29 = vrot.slane %v227_v9, 5  ;;  %v537_v30 = vrot.slane %v10528_v14, 1  ;;  %v271_v31 = vrot.slane %v228_v19, 1  ;;  %p10180_p1 = pnand %p10179_p12, %p10173_p3 }
  0x7d   : > { %8906 = vmatprep.subr.bf16.mxu0 %v8905_v24  ;;  %v331_v33 = vrot.slane %v229_v20, 7  ;;  %v10540_v34 = vsel %vm521_vm1, %v532_v11, %v533_v13  ;;  %v538_v35 = vrot.slane %v10533_v21, 1  ;;  %v10544_v36 = vsel %vm314_vm0, %v325_v5, %v414_v15  ;;  %v486_v5 = vld [vmem:[#allocation5 + $0x58] sm:$0xff] }
  0x7e   : > { %12897 = vst [vmem:[#allocation14_spill] sm:$0xff] %v10540_v34  ;;  %v10554_v44 = vsel %vm314_vm0, %v328_v25, %v415_v29  ;;  %v416_v46 = vrot.slane %v229_v20, 5  ;;  %v540_v50 = vrot.slane %v10544_v36, 1  ;;  %v8937_v59 = vpack.c.bf16 %v484_v42, %v483_v41  ;;  %v234_v20 = vld [vmem:[%s10457_s28 + $0x80] sm:$0xff]  ;;  %v488_v29 = vld [vmem:[#allocation5 + $0x68] sm:$0xff] }
  0x7f   : > { %v10570_v54 = vsel %vm521_vm1, %v537_v30, %v538_v35  ;;  %v545_v61 = vrot.slane %v10554_v44, 1  ;;  %v333_v63 = vrot.slane %v230_v47, 7  ;;  %v334_v2 = vrot.slane %v231_v48, 7 }
  0x80   : > { %8908 = vmatpush3.bf16.msra.mxu0 %v8905_v24  ;;  %v327_v24 = vrot.slane %v226_v8, 7  ;;  %12899 = vst [vmem:[#allocation16_spill] sm:$0xff] %v10570_v54  ;;  %v10581_v8 = vsel %vm314_vm0, %v331_v33, %v416_v46  ;;  %v417_v9 = vrot.slane %v231_v48, 5  ;;  %v10585_v11 = vsel %vm521_vm1, %v538_v35, %v540_v50  ;;  %v236_v50 = vld [vmem:[%s10457_s28 + $0x90] sm:$0xff] }
  0x81   : > { %8910 = vmatprep.subr.bf16.mxu0 %v8909_v27  ;;  %12900 = vst [vmem:[#allocation17_spill] sm:$0xff] %v10585_v11  ;;  %v336_v15 = vrot.slane %v232_v57, 7  ;;  %v274_v41 = vrot.slane %v234_v20, 1  ;;  %v339_v42 = vrot.slane %v234_v20, 7  ;;  %v238_v20 = vld [vmem:[%s10457_s28 + $0xa0] sm:$0xff] }
  0x82   : > { %v10547_v38 = vsel %vm314_vm0, %v327_v24, %v328_v25  ;;  %v10593_v25 = vsel %vm314_vm0, %v333_v63, %v334_v2 }
  0x83   : > { %v543_v56 = vrot.slane %v10547_v38, 1 }
  0x84   : > { %8912 = vmatpush3.bf16.msra.mxu0 %v8909_v27  ;;  %v482_v27 = vld [vmem:[#allocation5 + $0x38] sm:$0xff] }
  0x85   : > { %8914 = vmatprep.subr.bf16.mxu0 %v8913_v32  ;;  %v8933_v37 = vpack.c.bf16 %v482_v27, %v481_v26  ;;  %v235_v27 = vld [vmem:[%s10457_s28 + $0x88] sm:$0xff]  ;;  %v10601_v30 = vsel %vm521_vm1, %v543_v56, %v545_v61  ;;  %v489_v61 = vld [vmem:[#allocation5 + $0x70] sm:$0xff] }
  0x86   : > { %12902 = vst [vmem:[#allocation19_spill] sm:$0xff] %v10601_v30  ;;  %v340_v48 = vrot.slane %v235_v27, 7 }
  0x88   : > { %8916 = vmatpush3.bf16.msra.mxu0 %v8913_v32  ;;  %v330_v32 = vrot.slane %v228_v19, 7 }
  0x89   : > { %8918 = vmatprep.subr.bf16.mxu0 %v8917_v39 }
  0x8a   : > { %v10564_v51 = vsel %vm314_vm0, %v330_v32, %v331_v33  ;;  %v10567_v53 = vsel %vm314_vm0, %v271_v31, %v330_v32  ;;  %v10607_v32 = vsel %vm314_vm0, %v334_v2, %v417_v9  ;;  %v418_v33 = vrot.slane %v233_v58, 5 }
  0x8b   : > { %v547_v6 = vrot.slane %v10567_v53, 1  ;;  %v548_v7 = vrot.slane %v10564_v51, 1 }
  0x8c   : > { %8920 = vmatpush3.bf16.msra.mxu0 %v8917_v39  ;;  %v10550_v39 = vsel %vm314_vm0, %v270_v22, %v327_v24  ;;  %v8941_v22 = vpack.c.bf16 %v486_v5, %v485_v3  ;;  %v550_v24 = vrot.slane %v10581_v8, 1  ;;  %v419_v3 = vrot.slane %v235_v27, 5  ;;  %v239_v27 = vld [vmem:[%s10457_s28 + $0xa8] sm:$0xff] }
  0x8d   : > { %8922 = vmatprep.subr.bf16.mxu0 %v8921_v49  ;;  %v542_v55 = vrot.slane %v10550_v39, 1  ;;  %v10604_v31 = vsel %vm521_vm1, %v547_v6, %v548_v7  ;;  %v10632_v5 = vsel %vm314_vm0, %v274_v41, %v339_v42  ;;  %v275_v6 = vrot.slane %v236_v50, 1 }
  0x8e   : > { %12903 = vst [vmem:[#allocation20_spill] sm:$0xff] %v10604_v31  ;;  %v562_v41 = vrot.slane %v10632_v5, 1 }
  0x8f   : > { %7482 = vmatmul.mubr.f32.vlgmr.msra.gmra.mrb[0].mxu0 %v10503_v60  ;;  %v10588_v19 = vsel %vm521_vm1, %v542_v55, %v543_v56  ;;  %v237_v55 = vld [vmem:[%s10457_s28 + $0x98] sm:$0xff] }
  0x90   : > { %8924 = vmatpush3.bf16.msra.mxu0 %v8921_v49  ;;  %7484 = vmatprep.mubr.f32.mxu0 %v10507_v0  ;;  %v10560_v49 = vsel %vm521_vm1, %v533_v13, %v535_v28  ;;  %v273_v13 = vrot.slane %v232_v57, 1  ;;  %12901 = vst [vmem:[#allocation18_spill] sm:$0xff] %v10588_v19  ;;  %v487_v28 = vld [vmem:[#allocation5 + $0x60] sm:$0xff]  ;;  %v10621_v57 = vsel %vm521_vm1, %v548_v7, %v550_v24  ;;  %v342_v7 = vrot.slane %v236_v50, 7 }
  0x91   : > { %8926 = vmatprep.subr.bf16.mxu0 %v8925_v62  ;;  %12898 = vst [vmem:[#allocation15_spill] sm:$0xff] %v10560_v49  ;;  %v8945_v56 = vpack.c.bf16 %v488_v29, %v487_v28  ;;  %12904 = vst [vmem:[#allocation21_spill] sm:$0xff] %v10621_v57  ;;  %v343_v9 = vrot.slane %v237_v55, 7  ;;  %v1201_v28 = vld [vmem:[#allocation5 + $0x100] sm:$0xff]  ;;  %v1202_v29 = vld [vmem:[#allocation5 + $0x108] sm:$0xff] }
  0x92   : > { %v10660_v50 = vsel %vm314_vm0, %v275_v6, %v342_v7 }
  0x93   : > { %7485 = vmatmul.mubr.f32.gmra.mrb[2].mxu0 %v10520_v10  ;;  %v567_v6 = vrot.slane %v10660_v50, 1 }
  0x94   : > { %7487 = vmatprep.mubr.f32.mxu0 %v10478_v23  ;;  %8928 = vmatpush3.bf16.msra.mxu0 %v8925_v62  ;;  %v272_v62 = vrot.slane %v230_v47, 1  ;;  %v553_v47 = vrot.slane %v10593_v25, 1 }
  0x95   : > { %8930 = vmatprep.subr.bf16.mxu0 %v8929_v18 }
  0x96   : > { %v10596_v26 = vsel %vm314_vm0, %v272_v62, %v333_v63  ;;  %v490_v62 = vld [vmem:[#allocation5 + $0x78] sm:$0xff] }
  0x97   : > { %7488 = vmatmul.mubr.f32.gmra.mrb[4].mxu0 %v10503_v60  ;;  %v552_v46 = vrot.slane %v10596_v26, 1 }
  0x98   : > { %7490 = vmatprep.mubr.f32.mxu0 %v10540_v34  ;;  %8932 = vmatpush3.bf16.msra.mxu0 %v8929_v18  ;;  %v337_v18 = vrot.slane %v233_v58, 7  ;;  %v555_v58 = vrot.slane %v10607_v32, 1 }
  0x99   : > { %8934 = vmatprep.subr.bf16.mxu0 %v8933_v37 }
  0x9a   : > { %v10611_v35 = vsel %vm314_vm0, %v336_v15, %v337_v18  ;;  %v10628_v2 = vsel %vm314_vm0, %v337_v18, %v418_v33  ;;  %v8949_v18 = vpack.c.bf16 %v490_v62, %v489_v61  ;;  %v10642_v24 = vsel %vm521_vm1, %v553_v47, %v555_v58 }
  0x9b   : > { %7491 = vmatmul.mubr.f32.gmra.mrb[6].mxu0 %v10560_v49  ;;  %v558_v63 = vrot.slane %v10611_v35, 1  ;;  %12906 = vst [vmem:[#allocation23_spill] sm:$0xff] %v10642_v24  ;;  %v560_v33 = vrot.slane %v10628_v2, 1  ;;  %v420_v58 = vrot.slane %v237_v55, 5  ;;  %v276_v61 = vrot.slane %v238_v20, 1  ;;  %v247_v49 = vld [vmem:[%s10457_s28 + $0xe8] sm:$0xff] }
  0x9c   : > { %7493 = vmatprep.mubr.f32.mxu0 %v10570_v54  ;;  %8936 = vmatpush3.bf16.msra.mxu0 %v8933_v37  ;;  %v10614_v37 = vsel %vm314_vm0, %v273_v13, %v336_v15  ;;  %v10635_v13 = vsel %vm521_vm1, %v552_v46, %v553_v47  ;;  %v10638_v15 = vsel %vm314_vm0, %v339_v42, %v340_v48  ;;  %v345_v62 = vrot.slane %v238_v20, 7 }
  0x9d   : > { %8938 = vmatprep.subr.bf16.mxu0 %v8937_v59  ;;  %12905 = vst [vmem:[#allocation22_spill] sm:$0xff] %v10635_v13  ;;  %v10652_v42 = vsel %vm314_vm0, %v340_v48, %v419_v3  ;;  %v563_v46 = vrot.slane %v10638_v15, 1  ;;  %v10657_v47 = vsel %vm314_vm0, %v342_v7, %v343_v9  ;;  %v241_v48 = vld [vmem:[%s10457_s28 + $0xb8] sm:$0xff]  ;;  %v10668_v3 = vsel %vm521_vm1, %v558_v63, %v560_v33 }
  0x9e   : > { %12908 = vst [vmem:[#allocation25_spill] sm:$0xff] %v10668_v3  ;;  %v568_v55 = vrot.slane %v10657_v47, 1  ;;  %v10678_v7 = vsel %vm314_vm0, %v343_v9, %v420_v58  ;;  %v421_v20 = vrot.slane %v239_v27, 5 }
  0x9f   : > { %7494 = vmatmul.mubr.f32.gmra.mrb[8].mxu0 %v10585_v11 }
  0xa0   : > { %7496 = vmatprep.mubr.f32.mxu0 %v10588_v19  ;;  %8940 = vmatpush3.bf16.msra.mxu0 %v8937_v59  ;;  %v557_v59 = vrot.slane %v10614_v37, 1  ;;  %v244_v19 = vld [vmem:[%s10457_s28 + $0xd0] sm:$0xff] }
  0xa1   : > { %8942 = vmatprep.subr.bf16.mxu0 %v8941_v22  ;;  %v354_v11 = vrot.slane %v244_v19, 7 }
  0xa3   : > { %7497 = vmatmul.mubr.f32.gmra.mrb[10].mxu0 %v10601_v30 }
  0xa4   : > { %7499 = vmatprep.mubr.f32.mxu0 %v10604_v31  ;;  %8944 = vmatpush3.bf16.msra.mxu0 %v8941_v22  ;;  %v10647_v22 = vsel %vm521_vm1, %v557_v59, %v558_v63  ;;  %v346_v59 = vrot.slane %v239_v27, 7  ;;  %v10663_v31 = vpack.c.bf16 %v1202_v29, %v1201_v28  ;;  %v10684_v29 = vsel %vm314_vm0, %v276_v61, %v345_v62 }
  0xa5   : > { %8946 = vmatprep.subr.bf16.mxu0 %v8945_v56  ;;  %12907 = vst [vmem:[#allocation24_spill] sm:$0xff] %v10647_v22  ;;  %v10693_v27 = vsel %vm521_vm1, %v567_v6, %v568_v55 }
  0xa6   : > { %v10681_v63 = vsel %vm314_vm0, %v345_v62, %v346_v59  ;;  %12911 = vst [vmem:[#allocation28_spill] sm:$0xff] %v10693_v27  ;;  %v10701_v61 = vsel %vm314_vm0, %v346_v59, %v421_v20  ;;  %v422_v62 = vrot.slane %v241_v48, 5 }
  0xa7   : > { %7500 = vmatmul.mubr.f32.gmra.mrb[12].mxu0 %v10621_v57  ;;  %v240_v57 = vld [vmem:[%s10457_s28 + $0xb0] sm:$0xff]  ;;  %v573_v58 = vrot.slane %v10681_v63, 1  ;;  %v575_v59 = vrot.slane %v10701_v61, 1 }
  0xa8   : > { %7502 = vmatprep.mubr.f32.mxu0 %v10635_v13  ;;  %8948 = vmatpush3.bf16.msra.mxu0 %v8945_v56  ;;  %v565_v13 = vrot.slane %v10652_v42, 1  ;;  %v10675_v56 = vsel %vm521_vm1, %v562_v41, %v563_v46  ;;  %v277_v28 = vrot.slane %v240_v57, 1  ;;  %v348_v33 = vrot.slane %v240_v57, 7  ;;  %v243_v41 = vld [vmem:[%s10457_s28 + $0xc8] sm:$0xff] }
  0xa9   : > { %8950 = vmatprep.subr.bf16.mxu0 %v8949_v18  ;;  %12909 = vst [vmem:[#allocation26_spill] sm:$0xff] %v10675_v56  ;;  %v572_v57 = vrot.slane %v10684_v29, 1  ;;  %v352_v30 = vrot.slane %v243_v41, 7  ;;  %v10736_v34 = vsel %vm521_vm1, %v573_v58, %v575_v59 }
  0xaa   : > { %v10690_v9 = vsel %vm521_vm1, %v563_v46, %v565_v13  ;;  %v10707_v46 = vsel %vm314_vm0, %v277_v28, %v348_v33  ;;  %12914 = vst [vmem:[#allocation31_spill] sm:$0xff] %v10736_v34 }
  0xab   : > { %7503 = vmatmul.mubr.f32.gmra.mrb[14].mxu0 %v10642_v24  ;;  %v349_v24 = vrot.slane %v241_v48, 7  ;;  %12910 = vst [vmem:[#allocation27_spill] sm:$0xff] %v10690_v9  ;;  %v245_v48 = vld [vmem:[%s10457_s28 + $0xd8] sm:$0xff]  ;;  %v10718_v20 = vsel %vm521_vm1, %v572_v57, %v573_v58  ;;  %v577_v28 = vrot.slane %v10707_v46, 1  ;;  %v246_v57 = vld [vmem:[%s10457_s28 + $0xe0] sm:$0xff] }
  0xac   : > { %7505 = vmatprep.mubr.f32.mxu0 %v10647_v22  ;;  %8952 = vmatpush3.bf16.msra.mxu0 %v8949_v18  ;;  %v242_v22 = vld [vmem:[%s10457_s28 + $0xc0] sm:$0xff]  ;;  %v570_v18 = vrot.slane %v10678_v7, 1  ;;  %12913 = vst [vmem:[#allocation30_spill] sm:$0xff] %v10718_v20  ;;  %v280_v58 = vrot.slane %v246_v57, 1  ;;  %v357_v59 = vrot.slane %v246_v57, 7  ;;  %v425_v57 = vrot.slane %v247_v49, 5 }
  0xad   : > { %8954 = vmatprep.subr.bf16.mxu0 %v10663_v31  ;;  %v10704_v13 = vsel %vm314_vm0, %v348_v33, %v349_v24  ;;  %v278_v6 = vrot.slane %v242_v22, 1  ;;  %v10723_v33 = vsel %vm314_vm0, %v349_v24, %v422_v62 }
  0xaf   : > { %7506 = vmatmul.mubr.f32.gmra.mrb[16].mxu0 %v10668_v3  ;;  %v351_v3 = vrot.slane %v242_v22, 7  ;;  %v578_v22 = vrot.slane %v10704_v13, 1 }
  0xb0   : > { %7508 = vmatprep.mubr.f32.mxu0 %v10675_v56  ;;  %v10712_v56 = vsel %vm521_vm1, %v568_v55, %v570_v18  ;;  %v423_v55 = vrot.slane %v243_v41, 5  ;;  %v279_v18 = vrot.slane %v244_v19, 1  ;;  %v580_v41 = vrot.slane %v10723_v33, 1 }
  0xb1   : > { %12912 = vst [vmem:[#allocation29_spill] sm:$0xff] %v10712_v56  ;;  %v10729_v54 = vsel %vm314_vm0, %v351_v3, %v352_v30  ;;  %v10739_v24 = vsel %vm521_vm1, %v577_v28, %v578_v22  ;;  %v358_v28 = vrot.slane %v247_v49, 7 }
  0xb2   : > { %12915 = vst [vmem:[#allocation32_spill] sm:$0xff] %v10739_v24  ;;  %v10745_v62 = vsel %vm314_vm0, %v352_v30, %v423_v55  ;;  %v10756_v60 = vsel %vm521_vm1, %v578_v22, %v580_v41 }
  0xb3   : > { %7509 = vmatmul.mubr.f32.gmra.mrb[18].mxu0 %v10690_v9  ;;  %v10726_v9 = vsel %vm314_vm0, %v278_v6, %v351_v3  ;;  %v583_v3 = vrot.slane %v10729_v54, 1  ;;  %v10748_v6 = vsel %vm314_vm0, %v279_v18, %v354_v11  ;;  %12917 = vst [vmem:[#allocation34_spill] sm:$0xff] %v10756_v60  ;;  %v585_v30 = vrot.slane %v10745_v62, 1 }
  0xb4   : > { %7511 = vmatprep.mubr.f32.mxu0 %v10693_v27  ;;  %v355_v27 = vrot.slane %v245_v48, 7  ;;  %v582_v19 = vrot.slane %v10726_v9, 1  ;;  %v587_v55 = vrot.slane %v10748_v6, 1 }
  0xb5   : > { %v10776_v22 = vsel %vm521_vm1, %v583_v3, %v585_v30 }
  0xb6   : > { %v10761_v18 = vsel %vm521_vm1, %v582_v19, %v583_v3  ;;  %12921 = vst [vmem:[#allocation38_spill] sm:$0xff] %v10776_v22 }
  0xb7   : > { %7512 = vmatmul.mubr.f32.gmra.mrb[20].mxu0 %v10712_v56  ;;  %v424_v56 = vrot.slane %v245_v48, 5  ;;  %12918 = vst [vmem:[#allocation35_spill] sm:$0xff] %v10761_v18 }
  0xb8   : > { %7514 = vmatprep.mubr.f32.mxu0 %v10718_v20  ;;  %v10751_v20 = vsel %vm314_vm0, %v354_v11, %v355_v27 }
  0xb9   : > { %12916 = vst [vmem:[#allocation33_spill] sm:$0xff] %v10751_v20  ;;  %v588_v11 = vrot.slane %v10751_v20, 1  ;;  %v10765_v48 = vsel %vm314_vm0, %v355_v27, %v424_v56  ;;  %v10785_v27 = vsel %vm314_vm0, %v358_v28, %v425_v57  ;;  %v1205_v57 = vld [vmem:[#allocation5 + $0x120] sm:$0xff] }
  0xba   : > { %v590_v41 = vrot.slane %v10765_v48, 1  ;;  %v595_v3 = vrot.slane %v10785_v27, 1 }
  0xbb   : > { %7515 = vmatmul.mubr.f32.gmra.mrb[22].mxu0 %v10736_v34  ;;  %v10768_v34 = vsel %vm314_vm0, %v357_v59, %v358_v28  ;;  %v10780_v19 = vsel %vm521_vm1, %v587_v55, %v588_v11  ;;  %v1203_v28 = vld [vmem:[#allocation5 + $0x110] sm:$0xff]  ;;  %v1204_v55 = vld [vmem:[#allocation5 + $0x118] sm:$0xff] }
  0xbc   : > { %7517 = vmatprep.mubr.f32.mxu0 %v10739_v24  ;;  %12919 = vst [vmem:[#allocation36_spill] sm:$0xff] %v10768_v34  ;;  %v10771_v24 = vsel %vm314_vm0, %v280_v58, %v357_v59  ;;  %12922 = vst [vmem:[#allocation39_spill] sm:$0xff] %v10780_v19  ;;  %v593_v56 = vrot.slane %v10768_v34, 1  ;;  %v10790_v58 = vsel %vm521_vm1, %v588_v11, %v590_v41  ;;  %v1206_v41 = vld [vmem:[#allocation5 + $0x128] sm:$0xff] }
  0xbd   : > { %12920 = vst [vmem:[#allocation37_spill] sm:$0xff] %v10771_v24  ;;  %v592_v49 = vrot.slane %v10771_v24, 1  ;;  %12923 = vst [vmem:[#allocation40_spill] sm:$0xff] %v10790_v58  ;;  %v8957_v11 = vpack.c.bf16 %v1204_v55, %v1203_v28  ;;  %v1209_v28 = vld [vmem:[#allocation5 + $0x140] sm:$0xff]  ;;  %v1210_v55 = vld [vmem:[#allocation5 + $0x148] sm:$0xff] }
  0xbe   : > { %v10799_v30 = vsel %vm521_vm1, %v593_v56, %v595_v3 }
  0xbf   : > { %7518 = vmatmul.mubr.f32.gmra.mrb[24].mxu0 %v10756_v60  ;;  %v10794_v59 = vsel %vm521_vm1, %v592_v49, %v593_v56  ;;  %12925 = vst [vmem:[#allocation42_spill] sm:$0xff] %v10799_v30  ;;  %v8961_v49 = vpack.c.bf16 %v1206_v41, %v1205_v57  ;;  %v1208_v56 = vld [vmem:[#allocation5 + $0x138] sm:$0xff]  ;;  %v1213_v41 = vld [vmem:[#allocation5 + $0x160] sm:$0xff] }
  0xc0   : > { %7520 = vmatprep.mubr.f32.mxu0 %v10761_v18  ;;  %12924 = vst [vmem:[#allocation41_spill] sm:$0xff] %v10794_v59  ;;  %v1212_v57 = vld [vmem:[#allocation5 + $0x158] sm:$0xff]  ;;  %v1481_v18 = vld [vmem:[#allocation5 + $0x1b0] sm:$0xff] }
  0xc3   : > { %7521 = vmatmul.mubr.f32.gmra.mrb[26].mxu0 %v10776_v22 }
  0xc4   : > { %7523 = vmatprep.mubr.f32.mxu0 %v10780_v19  ;;  %v1480_v19 = vld [vmem:[#allocation5 + $0x1a8] sm:$0xff] }
  0xc7   : > { %7524 = vmatmul.mubr.f32.gmra.mrb[28].mxu0 %v10790_v58  ;;  %v1479_v58 = vld [vmem:[#allocation5 + $0x1a0] sm:$0xff] }
  0xc8   : > { %7526 = vmatprep.mubr.f32.mxu0 %v10794_v59  ;;  %v1207_v59 = vld [vmem:[#allocation5 + $0x130] sm:$0xff] }
  0xc9   : > { %v8965_v3 = vpack.c.bf16 %v1208_v56, %v1207_v59  ;;  %v1214_v59 = vld [vmem:[#allocation5 + $0x168] sm:$0xff]  ;;  %v1215_v56 = vld [vmem:[#allocation5 + $0x170] sm:$0xff] }
  0xcb   : > { %7527 = vmatmul.mubr.f32.gmra.mrb[30].mxu0 %v10799_v30  ;;  %v1211_v30 = vld [vmem:[#allocation5 + $0x150] sm:$0xff] }
  0xcc   : > { %7561 = vmatprep.mubr.f32.mxu0 %v10473_v17 }
  0xcf   : > { %7562 = vmatmul.mubr.f32.vlgmr.msra.gmra.mrb[0].mxu0 %v10470_v16 }
  0xd0   : > { %8956 = vmatpush3.bf16.msra.mxu0 %v10663_v31  ;;  %7564 = vmatprep.mubr.f32.mxu0 %v10487_v43  ;;  %v8969_v31 = vpack.c.bf16 %v1210_v55, %v1209_v28  ;;  %v1216_v28 = vld [vmem:[#allocation5 + $0x178] sm:$0xff]  ;;  %v1475_v55 = vld [vmem:[#allocation5 + $0x180] sm:$0xff] }
  0xd1   : > { %8958 = vmatprep.subr.bf16.mxu0 %v8957_v11 }
  0xd3   : > { %7565 = vmatmul.mubr.f32.gmra.mrb[2].mxu0 %v10490_v45 }
  0xd4   : > { %7567 = vmatprep.mubr.f32.mxu0 %v10473_v17  ;;  %8960 = vmatpush3.bf16.msra.mxu0 %v8957_v11  ;;  %v8973_v11 = vpack.c.bf16 %v1212_v57, %v1211_v30  ;;  %v1476_v30 = vld [vmem:[#allocation5 + $0x188] sm:$0xff]  ;;  %v1095_v57 = vrot.slane %v10473_v17, 2 }
  0xd5   : > { %8962 = vmatprep.subr.bf16.mxu0 %v8961_v49 }
  0xd7   : > { %7568 = vmatmul.mubr.f32.gmra.mrb[4].mxu0 %v10470_v16 }
  0xd8   : > { %7570 = vmatprep.mubr.f32.mxu0 %v10510_v1  ;;  %8964 = vmatpush3.bf16.msra.mxu0 %v8961_v49  ;;  %v8977_v49 = vpack.c.bf16 %v1214_v59, %v1213_v41  ;;  %v1098_v41 = vrot.slane %v10484_v40, 2  ;;  %v1103_v40 = vrot.slane %v10498_v52, 2  ;;  %v8993_v52 = vpack.c.bf16 %v1480_v19, %v1479_v58  ;;  %v1484_v19 = vld [vmem:[#allocation5 + $0x1c8] sm:$0xff] }
  0xd9   : > { %8966 = vmatprep.subr.bf16.mxu0 %v8965_v3 }
  0xdb   : > { %7571 = vmatmul.mubr.f32.gmra.mrb[6].mxu0 %v10513_v4 }
  0xdc   : > { %7573 = vmatprep.mubr.f32.mxu0 %v10528_v14  ;;  %8968 = vmatpush3.bf16.msra.mxu0 %v8965_v3  ;;  %v8981_v3 = vpack.c.bf16 %v1216_v28, %v1215_v56  ;;  %v1101_v56 = vrot.slane %v10490_v45, 2  ;;  %v1477_v28 = vld [vmem:[#allocation5 + $0x190] sm:$0xff] }
  0xdd   : > { %8970 = vmatprep.subr.bf16.mxu0 %v8969_v31 }
  0xde   : > { %v10854_v22 = vsel %vm1094_vm2, %v1101_v56, %v1103_v40 }
  0xdf   : > { %7574 = vmatmul.mubr.f32.gmra.mrb[8].mxu0 %v10533_v21  ;;  %12928 = vst [vmem:[#allocation45_spill] sm:$0xff] %v10854_v22 }
  0xe0   : > { %7576 = vmatprep.mubr.f32.mxu0 %v10550_v39  ;;  %8972 = vmatpush3.bf16.msra.mxu0 %v8969_v31  ;;  %v8985_v31 = vpack.c.bf16 %v1476_v30, %v1475_v55 }
  0xe1   : > { %8974 = vmatprep.subr.bf16.mxu0 %v8973_v11 }
  0xe3   : > { %7577 = vmatmul.mubr.f32.gmra.mrb[10].mxu0 %v10547_v38 }
  0xe4   : > { %7579 = vmatprep.mubr.f32.mxu0 %v10567_v53  ;;  %8976 = vmatpush3.bf16.msra.mxu0 %v8973_v11  ;;  %v1096_v11 = vrot.slane %v10470_v16, 2 }
  0xe5   : > { %8978 = vmatprep.subr.bf16.mxu0 %v8977_v49 }
  0xe6   : > { %v10838_v59 = vsel %vm1094_vm2, %v1095_v57, %v1096_v11  ;;  %v10845_v55 = vsel %vm1094_vm2, %v1096_v11, %v1098_v41  ;;  %v1105_v11 = vrot.slane %v10510_v1, 2  ;;  %v1106_v41 = vrot.slane %v10513_v4, 2 }
  0xe7   : > { %7580 = vmatmul.mubr.f32.gmra.mrb[12].mxu0 %v10564_v51  ;;  %12926 = vst [vmem:[#allocation43_spill] sm:$0xff] %v10838_v59 }
  0xe8   : > { %7582 = vmatprep.mubr.f32.mxu0 %v10596_v26  ;;  %8980 = vmatpush3.bf16.msra.mxu0 %v8977_v49  ;;  %v1100_v49 = vrot.slane %v10487_v43, 2 }
  0xe9   : > { %8982 = vmatprep.subr.bf16.mxu0 %v8981_v3 }
  0xea   : > { %v10849_v30 = vsel %vm1094_vm2, %v1100_v49, %v1101_v56  ;;  %v1482_v49 = vld [vmem:[#allocation5 + $0x1b8] sm:$0xff]  ;;  %v1110_v56 = vrot.slane %v10528_v14, 2 }
  0xeb   : > { %7583 = vmatmul.mubr.f32.gmra.mrb[14].mxu0 %v10593_v25  ;;  %12927 = vst [vmem:[#allocation44_spill] sm:$0xff] %v10849_v30  ;;  %v8997_v40 = vpack.c.bf16 %v1482_v49, %v1481_v18  ;;  %v1485_v49 = vld [vmem:[#allocation5 + $0x1d0] sm:$0xff] }
  0xec   : > { %7585 = vmatprep.mubr.f32.mxu0 %v10614_v37  ;;  %8984 = vmatpush3.bf16.msra.mxu0 %v8981_v3  ;;  %v1478_v3 = vld [vmem:[#allocation5 + $0x198] sm:$0xff] }
  0xed   : > { %8986 = vmatprep.subr.bf16.mxu0 %v8985_v31  ;;  %v8989_v57 = vpack.c.bf16 %v1478_v3, %v1477_v28  ;;  %v10862_v28 = vsel %vm1094_vm2, %v1105_v11, %v1106_v41  ;;  %v1111_v3 = vrot.slane %v10533_v21, 2  ;;  %v1115_v11 = vrot.slane %v10550_v39, 2 }
  0xee   : > { %12929 = vst [vmem:[#allocation46_spill] sm:$0xff] %v10862_v28 }
  0xef   : > { %7586 = vmatmul.mubr.f32.gmra.mrb[16].mxu0 %v10611_v35 }
  0xf0   : > { %7588 = vmatprep.mubr.f32.mxu0 %v10632_v5 }
  0xf3   : > { %7589 = vmatmul.mubr.f32.gmra.mrb[18].mxu0 %v10638_v15 }
  0xf4   : > { %7591 = vmatprep.mubr.f32.mxu0 %v10660_v50 }
  0xf7   : > { %7592 = vmatmul.mubr.f32.gmra.mrb[20].mxu0 %v10657_v47 }
  0xf8   : > { %7594 = vmatprep.mubr.f32.mxu0 %v10684_v29 }
  0xfb   : > { %7595 = vmatmul.mubr.f32.gmra.mrb[22].mxu0 %v10681_v63 }
  0xfc   : > { %7597 = vmatprep.mubr.f32.mxu0 %v10707_v46 }
  0xff   : > { %7598 = vmatmul.mubr.f32.gmra.mrb[24].mxu0 %v10704_v13 }
 0x100   : > { %7600 = vmatprep.mubr.f32.mxu0 %v10726_v9 }
 0x103   : > { %7601 = vmatmul.mubr.f32.gmra.mrb[26].mxu0 %v10729_v54 }
 0x104   : > { %7603 = vmatprep.mubr.f32.mxu0 %v10748_v6 }
 0x107   : > { %7604 = vmatmul.mubr.f32.gmra.mrb[28].mxu0 %v10751_v20 }
 0x108   : > { %7606 = vmatprep.mubr.f32.mxu0 %v10771_v24 }
 0x10b   : > { %7607 = vmatmul.mubr.f32.gmra.mrb[30].mxu0 %v10768_v34 }
 0x10c   : > { %7641 = vmatprep.mubr.f32.mxu0 %v10838_v59 }
 0x10f   : > { %7642 = vmatmul.mubr.f32.vlgmr.msra.gmra.mrb[0].mxu0 %v10845_v55 }
 0x110   : > { %8988 = vmatpush3.bf16.msra.mxu0 %v8985_v31  ;;  %7644 = vmatprep.mubr.f32.mxu0 %v10849_v30  ;;  %v1108_v31 = vrot.slane %v10524_v12, 2  ;;  %v1483_v30 = vld [vmem:[#allocation5 + $0x1c0] sm:$0xff]  ;;  %v1113_v12 = vrot.slane %v10544_v36, 2  ;;  %v1118_v36 = vrot.slane %v10554_v44, 2  ;;  %v1123_v44 = vrot.slane %v10581_v8, 2 }
 0x111   : > { %8990 = vmatprep.subr.bf16.mxu0 %v8989_v57  ;;  %v9001_v18 = vpack.c.bf16 %v1484_v19, %v1483_v30  ;;  %v1487_v19 = vld [vmem:[#allocation5 + $0x1e0] sm:$0xff]  ;;  %v1128_v8 = vrot.slane %v10607_v32, 2  ;;  %v1133_v32 = vrot.slane %v10628_v2, 2 }
 0x112   : > { %v10869_v58 = vsel %vm1094_vm2, %v1106_v41, %v1108_v31  ;;  %v10880_v41 = vsel %vm1094_vm2, %v1111_v3, %v1113_v12  ;;  %v1120_v31 = vrot.slane %v10567_v53, 2  ;;  %v1125_v12 = vrot.slane %v10596_v26, 2 }
 0x113   : > { %7645 = vmatmul.mubr.f32.gmra.mrb[2].mxu0 %v10854_v22  ;;  %v1486_v22 = vld [vmem:[#allocation5 + $0x1d8] sm:$0xff] }
 0x114   : > { %7647 = vmatprep.mubr.f32.mxu0 %v10838_v59  ;;  %8992 = vmatpush3.bf16.msra.mxu0 %v8989_v57  ;;  %v10873_v57 = vsel %vm1094_vm2, %v1110_v56, %v1111_v3  ;;  %v1116_v59 = vrot.slane %v10547_v38, 2  ;;  %v1121_v56 = vrot.slane %v10564_v51, 2  ;;  %v9005_v30 = vpack.c.bf16 %v1486_v22, %v1485_v49  ;;  %v1489_v49 = vld [vmem:[#allocation5 + $0x1f0] sm:$0xff] }
 0x115   : > { %8994 = vmatprep.subr.bf16.mxu0 %v8993_v52  ;;  %12930 = vst [vmem:[#allocation47_spill] sm:$0xff] %v10873_v57 }
 0x116   : > { %v10891_v3 = vsel %vm1094_vm2, %v1116_v59, %v1118_v36  ;;  %v1130_v36 = vrot.slane %v10614_v37, 2 }
 0x117   : > { %7648 = vmatmul.mubr.f32.gmra.mrb[4].mxu0 %v10845_v55 }
 0x118   : > { %7650 = vmatprep.mubr.f32.mxu0 %v10862_v28  ;;  %8996 = vmatpush3.bf16.msra.mxu0 %v8993_v52  ;;  %v10884_v52 = vsel %vm1094_vm2, %v1115_v11, %v1116_v59  ;;  %v1488_v28 = vld [vmem:[#allocation5 + $0x1e8] sm:$0xff]  ;;  %v1126_v11 = vrot.slane %v10593_v25, 2  ;;  %v10902_v59 = vsel %vm1094_vm2, %v1121_v56, %v1123_v44  ;;  %v1135_v44 = vrot.slane %v10632_v5, 2 }
 0x119   : > { %8998 = vmatprep.subr.bf16.mxu0 %v8997_v40  ;;  %12931 = vst [vmem:[#allocation48_spill] sm:$0xff] %v10884_v52  ;;  %v9009_v22 = vpack.c.bf16 %v1488_v28, %v1487_v19  ;;  %v1758_v19 = vld [vmem:[#allocation5 + $0x200] sm:$0xff] }
 0x11b   : > { %7651 = vmatmul.mubr.f32.gmra.mrb[6].mxu0 %v10869_v58 }
 0x11c   : > { %7653 = vmatprep.mubr.f32.mxu0 %v10873_v57  ;;  %9000 = vmatpush3.bf16.msra.mxu0 %v8997_v40  ;;  %v10895_v40 = vsel %vm1094_vm2, %v1120_v31, %v1121_v56  ;;  %v1490_v57 = vld [vmem:[#allocation5 + $0x1f8] sm:$0xff]  ;;  %v1131_v31 = vrot.slane %v10611_v35, 2  ;;  %v10913_v56 = vsel %vm1094_vm2, %v1126_v11, %v1128_v8  ;;  %v1141_v8 = vrot.slane %v10657_v47, 2 }
 0x11d   : > { %9002 = vmatprep.subr.bf16.mxu0 %v9001_v18  ;;  %v9013_v28 = vpack.c.bf16 %v1490_v57, %v1489_v49 }
 0x11e   : > { %v10924_v49 = vsel %vm1094_vm2, %v1131_v31, %v1133_v32  ;;  %v1148_v32 = vrot.slane %v10701_v61, 2  ;;  %v1155_v61 = vrot.slane %v10726_v9, 2 }
 0x11f   : > { %7654 = vmatmul.mubr.f32.gmra.mrb[8].mxu0 %v10880_v41 }
 0x120   : > { %7656 = vmatprep.mubr.f32.mxu0 %v10884_v52  ;;  %9004 = vmatpush3.bf16.msra.mxu0 %v9001_v18  ;;  %v10906_v18 = vsel %vm1094_vm2, %v1125_v12, %v1126_v11  ;;  %v1759_v52 = vld [vmem:[#allocation5 + $0x208] sm:$0xff]  ;;  %v1136_v12 = vrot.slane %v10638_v15, 2  ;;  %v1138_v11 = vrot.slane %v10652_v42, 2 }
 0x121   : > { %9006 = vmatprep.subr.bf16.mxu0 %v9005_v30  ;;  %v9017_v57 = vpack.c.bf16 %v1759_v52, %v1758_v19 }
 0x122   : > { %v10928_v2 = vsel %vm1094_vm2, %v1135_v44, %v1136_v12  ;;  %v10935_v52 = vsel %vm1094_vm2, %v1136_v12, %v1138_v11  ;;  %v1151_v12 = vrot.slane %v10704_v13, 2 }
 0x123   : > { %7657 = vmatmul.mubr.f32.gmra.mrb[10].mxu0 %v10891_v3 }
 0x124   : > { %7659 = vmatprep.mubr.f32.mxu0 %v10895_v40  ;;  %9008 = vmatpush3.bf16.msra.mxu0 %v9005_v30  ;;  %v10917_v30 = vsel %vm1094_vm2, %v1130_v36, %v1131_v31  ;;  %v1143_v36 = vrot.slane %v10678_v7, 2  ;;  %v1145_v31 = vrot.slane %v10684_v29, 2  ;;  %v1150_v7 = vrot.slane %v10707_v46, 2 }
 0x125   : > { %9010 = vmatprep.subr.bf16.mxu0 %v9009_v22 }
 0x126   : > { %v10946_v19 = vsel %vm1094_vm2, %v1141_v8, %v1143_v36  ;;  %v1156_v36 = vrot.slane %v10729_v54, 2 }
 0x127   : > { %7660 = vmatmul.mubr.f32.gmra.mrb[12].mxu0 %v10902_v59 }
 0x128   : > { %7662 = vmatprep.mubr.f32.mxu0 %v10906_v18  ;;  %9012 = vmatpush3.bf16.msra.mxu0 %v9009_v22  ;;  %v1140_v22 = vrot.slane %v10660_v50, 2 }
 0x129   : > { %9014 = vmatprep.subr.bf16.mxu0 %v9013_v28 }
 0x12a   : > { %v10939_v42 = vsel %vm1094_vm2, %v1140_v22, %v1141_v8  ;;  %v1153_v22 = vrot.slane %v10723_v33, 2  ;;  %v10961_v8 = vsel %vm1094_vm2, %v1150_v7, %v1151_v12  ;;  %v1160_v33 = vrot.slane %v10748_v6, 2 }
 0x12b   : > { %7663 = vmatmul.mubr.f32.gmra.mrb[14].mxu0 %v10913_v56  ;;  %12933 = vst [vmem:[#allocation50_spill] sm:$0xff] %v10961_v8 }
 0x12c   : > { %7665 = vmatprep.mubr.f32.mxu0 %v10917_v30  ;;  %9016 = vmatpush3.bf16.msra.mxu0 %v9013_v28  ;;  %v1146_v28 = vrot.slane %v10681_v63, 2 }
 0x12d   : > { %9018 = vmatprep.subr.bf16.mxu0 %v9017_v57 }
 0x12e   : > { %v10950_v44 = vsel %vm1094_vm2, %v1145_v31, %v1146_v28  ;;  %v10957_v11 = vsel %vm1094_vm2, %v1146_v28, %v1148_v32  ;;  %v10968_v31 = vsel %vm1094_vm2, %v1151_v12, %v1153_v22  ;;  %v10972_v28 = vsel %vm1094_vm2, %v1155_v61, %v1156_v36 }
 0x12f   : > { %7666 = vmatmul.mubr.f32.gmra.mrb[16].mxu0 %v10924_v49  ;;  %12932 = vst [vmem:[#allocation49_spill] sm:$0xff] %v10950_v44  ;;  %12934 = vst [vmem:[#allocation51_spill] sm:$0xff] %v10972_v28  ;;  %v1161_v32 = vrot.slane %v10751_v20, 2  ;;  %v1166_v22 = vrot.slane %v10768_v34, 2 }
 0x130   : > { %7668 = vmatprep.mubr.f32.mxu0 %v10928_v2 }
 0x131   : > { %v10983_v12 = vsel %vm1094_vm2, %v1160_v33, %v1161_v32  ;;  %v1761_v33 = vld [vmem:[#allocation5 + $0x218] sm:$0xff] }
 0x132   : > { %12936 = vst [vmem:[#allocation53_spill] sm:$0xff] %v10983_v12 }
 0x133   : > { %7669 = vmatmul.mubr.f32.gmra.mrb[18].mxu0 %v10935_v52 }
 0x134   : > { %7671 = vmatprep.mubr.f32.mxu0 %v10939_v42 }
 0x137   : > { %7672 = vmatmul.mubr.f32.gmra.mrb[20].mxu0 %v10946_v19 }
 0x138   : > { %7674 = vmatprep.mubr.f32.mxu0 %v10950_v44  ;;  %v1158_v44 = vrot.slane %v10745_v62, 2  ;;  %v1165_v62 = vrot.slane %v10771_v24, 2 }
 0x13a   : > { %v10979_v7 = vsel %vm1094_vm2, %v1156_v36, %v1158_v44  ;;  %v10994_v44 = vsel %vm1094_vm2, %v1165_v62, %v1166_v22  ;;  %v1760_v36 = vld [vmem:[#allocation5 + $0x210] sm:$0xff] }
 0x13b   : > { %7675 = vmatmul.mubr.f32.gmra.mrb[22].mxu0 %v10957_v11  ;;  %12935 = vst [vmem:[#allocation52_spill] sm:$0xff] %v10979_v7  ;;  %12938 = vst [vmem:[#allocation55_spill] sm:$0xff] %v10994_v44  ;;  %v1764_v62 = vld [vmem:[#allocation5 + $0x230] sm:$0xff] }
 0x13c   : > { %7677 = vmatprep.mubr.f32.mxu0 %v10961_v8  ;;  %v1163_v8 = vrot.slane %v10765_v48, 2 }
 0x13e   : > { %v10990_v61 = vsel %vm1094_vm2, %v1161_v32, %v1163_v8  ;;  %v9021_v8 = vpack.c.bf16 %v1761_v33, %v1760_v36  ;;  %v1762_v32 = vld [vmem:[#allocation5 + $0x220] sm:$0xff] }
 0x13f   : > { %7678 = vmatmul.mubr.f32.gmra.mrb[24].mxu0 %v10968_v31  ;;  %12937 = vst [vmem:[#allocation54_spill] sm:$0xff] %v10990_v61  ;;  %v1770_v33 = vld [vmem:[#allocation5 + $0x260] sm:$0xff] }
 0x140   : > { %7680 = vmatprep.mubr.f32.mxu0 %v10972_v28  ;;  %v1168_v28 = vrot.slane %v10785_v27, 2 }
 0x142   : > { %v10999_v48 = vsel %vm1094_vm2, %v1166_v22, %v1168_v28  ;;  %v1767_v22 = vld [vmem:[#allocation5 + $0x248] sm:$0xff] }
 0x143   : > { %7681 = vmatmul.mubr.f32.gmra.mrb[26].mxu0 %v10979_v7 }
 0x144   : > { %7683 = vmatprep.mubr.f32.mxu0 %v10983_v12  ;;  %v1763_v12 = vld [vmem:[#allocation5 + $0x228] sm:$0xff] }
 0x145   : > { %v9025_v27 = vpack.c.bf16 %v1763_v12, %v1762_v32  ;;  %v1769_v12 = vld [vmem:[#allocation5 + $0x258] sm:$0xff]  ;;  %v1772_v32 = vld [vmem:[#allocation5 + $0x270] sm:$0xff] }
 0x147   : > { %7684 = vmatmul.mubr.f32.gmra.mrb[28].mxu0 %v10990_v61 }
 0x148   : > { %7686 = vmatprep.mubr.f32.mxu0 %v10994_v44  ;;  %v1765_v44 = vld [vmem:[#allocation5 + $0x238] sm:$0xff] }
 0x149   : > { %v9029_v28 = vpack.c.bf16 %v1765_v44, %v1764_v62  ;;  %v1771_v44 = vld [vmem:[#allocation5 + $0x268] sm:$0xff] }
 0x14b   : > { %7687 = vmatmul.mubr.f32.gmra.mrb[30].mxu0 %v10999_v48 }
 0x14c   : > { %7721 = vmatprep.mubr.f32.mxu0 %v10487_v43  ;;  %v1766_v43 = vld [vmem:[#allocation5 + $0x240] sm:$0xff] }
 0x14f   : > { %7722 = vmatmul.mubr.f32.vlgmr.msra.gmra.mrb[0].mxu0 %v10490_v45  ;;  %v9033_v45 = vpack.c.bf16 %v1767_v22, %v1766_v43  ;;  %v2040_v43 = vld [vmem:[#allocation5 + $0x288] sm:$0xff] }
 0x150   : > { %9020 = vmatpush3.bf16.msra.mxu0 %v9017_v57  ;;  %7724 = vmatprep.mubr.f32.mxu0 %v10473_v17  ;;  %v1768_v57 = vld [vmem:[#allocation5 + $0x250] sm:$0xff] }
 0x151   : > { %9022 = vmatprep.subr.bf16.mxu0 %v9021_v8  ;;  %v9037_v36 = vpack.c.bf16 %v1769_v12, %v1768_v57 }
 0x153   : > { %7725 = vmatmul.mubr.f32.gmra.mrb[2].mxu0 %v10470_v16 }
 0x154   : > { %7727 = vmatprep.mubr.f32.mxu0 %v10510_v1  ;;  %9024 = vmatpush3.bf16.msra.mxu0 %v9021_v8  ;;  %v9041_v8 = vpack.c.bf16 %v1771_v44, %v1770_v33 }
 0x155   : > { %9026 = vmatprep.subr.bf16.mxu0 %v9025_v27 }
 0x157   : > { %7728 = vmatmul.mubr.f32.gmra.mrb[4].mxu0 %v10513_v4 }
 0x158   : > { %7730 = vmatprep.mubr.f32.mxu0 %v10528_v14  ;;  %9028 = vmatpush3.bf16.msra.mxu0 %v9025_v27  ;;  %v1773_v27 = vld [vmem:[#allocation5 + $0x278] sm:$0xff] }
 0x159   : > { %9030 = vmatprep.subr.bf16.mxu0 %v9029_v28  ;;  %v9045_v62 = vpack.c.bf16 %v1773_v27, %v1772_v32  ;;  %v2041_v32 = vld [vmem:[#allocation5 + $0x290] sm:$0xff]  ;;  %v2042_v27 = vld [vmem:[#allocation5 + $0x298] sm:$0xff] }
 0x15b   : > { %7731 = vmatmul.mubr.f32.gmra.mrb[6].mxu0 %v10533_v21 }
 0x15c   : > { %7733 = vmatprep.mubr.f32.mxu0 %v10550_v39  ;;  %9032 = vmatpush3.bf16.msra.mxu0 %v9029_v28  ;;  %v2039_v28 = vld [vmem:[#allocation5 + $0x280] sm:$0xff] }
 0x15d   : > { %9034 = vmatprep.subr.bf16.mxu0 %v9033_v45  ;;  %v9049_v22 = vpack.c.bf16 %v2040_v43, %v2039_v28  ;;  %v2043_v28 = vld [vmem:[#allocation5 + $0x2a0] sm:$0xff]  ;;  %v2044_v43 = vld [vmem:[#allocation5 + $0x2a8] sm:$0xff] }
 0x15f   : > { %7734 = vmatmul.mubr.f32.gmra.mrb[8].mxu0 %v10547_v38 }
 0x160   : > { %7736 = vmatprep.mubr.f32.mxu0 %v10567_v53  ;;  %9036 = vmatpush3.bf16.msra.mxu0 %v9033_v45  ;;  %v248_v45 = vld [vmem:[%s10457_s28 + $0xf0] sm:$0xff] }
 0x161   : > { %9038 = vmatprep.subr.bf16.mxu0 %v9037_v36  ;;  %v281_v57 = vrot.slane %v248_v45, 1  ;;  %v360_v12 = vrot.slane %v248_v45, 7  ;;  %v9057_v45 = vpack.c.bf16 %v2044_v43, %v2043_v28  ;;  %v2050_v28 = vld [vmem:[#allocation5 + $0x2d8] sm:$0xff]  ;;  %v12943_v43 = vld [vmem:[#allocation17_spill] sm:$0xff] }
 0x163   : > { %7737 = vmatmul.mubr.f32.gmra.mrb[10].mxu0 %v10564_v51  ;;  %v11037_v44 = vsel %vm314_vm0, %v281_v57, %v360_v12  ;;  %v2045_v57 = vld [vmem:[#allocation5 + $0x2b0] sm:$0xff] }
 0x164   : > { %7739 = vmatprep.mubr.f32.mxu0 %v10596_v26  ;;  %9040 = vmatpush3.bf16.msra.mxu0 %v9037_v36  ;;  %v11031_v36 = vld [vmem:[%s10457_s28 + $0xf8] sm:$0xff] }
 0x165   : > { %9042 = vmatprep.subr.bf16.mxu0 %v9041_v8  ;;  %v12783_v33 = vrot.slane %v11031_v36, 7 }
 0x167   : > { %7740 = vmatmul.mubr.f32.gmra.mrb[12].mxu0 %v10593_v25 }
 0x168   : > { %7742 = vmatprep.mubr.f32.mxu0 %v10614_v37  ;;  %9044 = vmatpush3.bf16.msra.mxu0 %v9041_v8  ;;  %v11044_v8 = vsel %vm314_vm0, %v360_v12, %v12783_v33  ;;  %v12939_v12 = vld [vmem:[#allocation13_spill] sm:$0xff]  ;;  %v12940_v33 = vld [vmem:[#allocation14_spill] sm:$0xff] }
 0x169   : > { %9046 = vmatprep.subr.bf16.mxu0 %v9045_v62 }
 0x16b   : > { %7743 = vmatmul.mubr.f32.gmra.mrb[14].mxu0 %v10611_v35 }
 0x16c   : > { %7745 = vmatprep.mubr.f32.mxu0 %v10632_v5  ;;  %9048 = vmatpush3.bf16.msra.mxu0 %v9045_v62  ;;  %v9053_v62 = vpack.c.bf16 %v2042_v27, %v2041_v32  ;;  %v2048_v32 = vld [vmem:[#allocation5 + $0x2c8] sm:$0xff]  ;;  %v12941_v27 = vld [vmem:[#allocation15_spill] sm:$0xff] }
 0x16d   : > { %9050 = vmatprep.subr.bf16.mxu0 %v9049_v22 }
 0x16f   : > { %7746 = vmatmul.mubr.f32.gmra.mrb[16].mxu0 %v10638_v15 }
 0x170   : > { %7748 = vmatprep.mubr.f32.mxu0 %v10660_v50 }
 0x173   : > { %7749 = vmatmul.mubr.f32.gmra.mrb[18].mxu0 %v10657_v47 }
 0x174   : > { %7751 = vmatprep.mubr.f32.mxu0 %v10684_v29 }
 0x177   : > { %7752 = vmatmul.mubr.f32.gmra.mrb[20].mxu0 %v10681_v63 }
 0x178   : > { %7754 = vmatprep.mubr.f32.mxu0 %v10707_v46 }
 0x17b   : > { %7755 = vmatmul.mubr.f32.gmra.mrb[22].mxu0 %v10704_v13 }
 0x17c   : > { %7757 = vmatprep.mubr.f32.mxu0 %v10726_v9 }
 0x17f   : > { %7758 = vmatmul.mubr.f32.gmra.mrb[24].mxu0 %v10729_v54 }
 0x180   : > { %7760 = vmatprep.mubr.f32.mxu0 %v10748_v6 }
 0x183   : > { %7761 = vmatmul.mubr.f32.gmra.mrb[26].mxu0 %v10751_v20  ;;  %v12942_v20 = vld [vmem:[#allocation16_spill] sm:$0xff] }
 0x184   : > { %7763 = vmatprep.mubr.f32.mxu0 %v10771_v24 }
 0x187   : > { %7764 = vmatmul.mubr.f32.gmra.mrb[28].mxu0 %v10768_v34  ;;  %v2046_v34 = vld [vmem:[#allocation5 + $0x2b8] sm:$0xff] }
 0x188   : > { %7766 = vmatprep.mubr.f32.mxu0 %v11037_v44  ;;  %v9061_v24 = vpack.c.bf16 %v2046_v34, %v2045_v57  ;;  %v2052_v34 = vld [vmem:[#allocation5 + $0x2e8] sm:$0xff]  ;;  %v12945_v57 = vld [vmem:[#allocation19_spill] sm:$0xff] }
 0x18b   : > { %7767 = vmatmul.mubr.f32.gmra.mrb[30].mxu0 %v11044_v8 }
 0x18c   : > { %7801 = vmatprep.mubr.f32.mxu0 %v10507_v0  ;;  %v2047_v0 = vld [vmem:[#allocation5 + $0x2c0] sm:$0xff] }
 0x18f   : > { %7802 = vmatmul.mubr.f32.vlgmr.msra.gmra.mrb[0].mxu0 %v10520_v10  ;;  %v9065_v10 = vpack.c.bf16 %v2048_v32, %v2047_v0  ;;  %v2054_v0 = vld [vmem:[#allocation5 + $0x2f8] sm:$0xff]  ;;  %v12947_v32 = vld [vmem:[#allocation21_spill] sm:$0xff] }
 0x190   : > { %9052 = vmatpush3.bf16.msra.mxu0 %v9049_v22  ;;  %7804 = vmatprep.mubr.f32.mxu0 %v10478_v23  ;;  %v2049_v22 = vld [vmem:[#allocation5 + $0x2d0] sm:$0xff] }
 0x191   : > { %9054 = vmatprep.subr.bf16.mxu0 %v9053_v62  ;;  %v12944_v23 = vld [vmem:[#allocation18_spill] sm:$0xff] }
 0x193   : > { %7805 = vmatmul.mubr.f32.gmra.mrb[2].mxu0 %v12939_v12  ;;  %v12946_v12 = vld [vmem:[#allocation20_spill] sm:$0xff] }
 0x194   : > { %7807 = vmatprep.mubr.f32.mxu0 %v12940_v33  ;;  %9056 = vmatpush3.bf16.msra.mxu0 %v9053_v62  ;;  %v9069_v62 = vpack.c.bf16 %v2050_v28, %v2049_v22  ;;  %v2051_v33 = vld [vmem:[#allocation5 + $0x2e0] sm:$0xff]  ;;  %v2314_v22 = vld [vmem:[#allocation5 + $0x308] sm:$0xff]  ;;  %v12949_v28 = vld [vmem:[#allocation23_spill] sm:$0xff] }
 0x195   : > { %9058 = vmatprep.subr.bf16.mxu0 %v9057_v45 }
 0x197   : > { %7808 = vmatmul.mubr.f32.gmra.mrb[4].mxu0 %v12941_v27  ;;  %v12948_v27 = vld [vmem:[#allocation22_spill] sm:$0xff] }
 0x198   : > { %7810 = vmatprep.mubr.f32.mxu0 %v12942_v20  ;;  %9060 = vmatpush3.bf16.msra.mxu0 %v9057_v45  ;;  %v9073_v45 = vpack.c.bf16 %v2052_v34, %v2051_v33  ;;  %v2053_v20 = vld [vmem:[#allocation5 + $0x2f0] sm:$0xff]  ;;  %v12953_v34 = vld [vmem:[#allocation27_spill] sm:$0xff] }
 0x199   : > { %9062 = vmatprep.subr.bf16.mxu0 %v9061_v24  ;;  %v12952_v33 = vld [vmem:[#allocation26_spill] sm:$0xff] }
 0x19b   : > { %7811 = vmatmul.mubr.f32.gmra.mrb[6].mxu0 %v12943_v43  ;;  %v12950_v43 = vld [vmem:[#allocation24_spill] sm:$0xff] }
 0x19c   : > { %7813 = vmatprep.mubr.f32.mxu0 %v12944_v23  ;;  %9064 = vmatpush3.bf16.msra.mxu0 %v9061_v24  ;;  %v9077_v24 = vpack.c.bf16 %v2054_v0, %v2053_v20  ;;  %v2313_v23 = vld [vmem:[#allocation5 + $0x300] sm:$0xff]  ;;  %v12955_v20 = vld [vmem:[#allocation29_spill] sm:$0xff]  ;;  %v12956_v0 = vld [vmem:[#allocation30_spill] sm:$0xff] }
 0x19d   : > { %9066 = vmatprep.subr.bf16.mxu0 %v9065_v10 }
 0x19f   : > { %7814 = vmatmul.mubr.f32.gmra.mrb[8].mxu0 %v12945_v57 }
 0x1a0   : > { %7816 = vmatprep.mubr.f32.mxu0 %v12946_v12  ;;  %9068 = vmatpush3.bf16.msra.mxu0 %v9065_v10  ;;  %v9081_v10 = vpack.c.bf16 %v2314_v22, %v2313_v23  ;;  %v12951_v12 = vld [vmem:[#allocation25_spill] sm:$0xff]  ;;  %v12959_v23 = vld [vmem:[#allocation35_spill] sm:$0xff] }
 0x1a1   : > { %9070 = vmatprep.subr.bf16.mxu0 %v9069_v62  ;;  %v12961_v22 = vld [vmem:[#allocation39_spill] sm:$0xff] }
 0x1a3   : > { %7817 = vmatmul.mubr.f32.gmra.mrb[10].mxu0 %v12947_v32 }
 0x1a4   : > { %7819 = vmatprep.mubr.f32.mxu0 %v12948_v27  ;;  %9072 = vmatpush3.bf16.msra.mxu0 %v9069_v62  ;;  %v12954_v62 = vld [vmem:[#allocation28_spill] sm:$0xff]  ;;  %v2320_v27 = vld [vmem:[#allocation5 + $0x338] sm:$0xff] }
 0x1a5   : > { %9074 = vmatprep.subr.bf16.mxu0 %v9073_v45 }
 0x1a7   : > { %7820 = vmatmul.mubr.f32.gmra.mrb[12].mxu0 %v12949_v28  ;;  %v12957_v28 = vld [vmem:[#allocation31_spill] sm:$0xff] }
 0x1a8   : > { %7822 = vmatprep.mubr.f32.mxu0 %v12950_v43  ;;  %9076 = vmatpush3.bf16.msra.mxu0 %v9073_v45  ;;  %v12958_v43 = vld [vmem:[#allocation32_spill] sm:$0xff]  ;;  %v426_v45 = vrot.slane %v11031_v36, 5 }
 0x1a9   : > { %9078 = vmatprep.subr.bf16.mxu0 %v9077_v24 }
 0x1ab   : > { %7823 = vmatmul.mubr.f32.gmra.mrb[14].mxu0 %v12951_v12  ;;  %v12968_v12 = vld [vmem:[#allocation45_spill] sm:$0xff] }
 0x1ac   : > { %7825 = vmatprep.mubr.f32.mxu0 %v12952_v33  ;;  %9080 = vmatpush3.bf16.msra.mxu0 %v9077_v24  ;;  %v12960_v24 = vld [vmem:[#allocation38_spill] sm:$0xff]  ;;  %v2316_v33 = vld [vmem:[#allocation5 + $0x318] sm:$0xff] }
 0x1ad   : > { %9082 = vmatprep.subr.bf16.mxu0 %v9081_v10 }
 0x1af   : > { %7826 = vmatmul.mubr.f32.gmra.mrb[16].mxu0 %v12953_v34 }
 0x1b0   : > { %7828 = vmatprep.mubr.f32.mxu0 %v12954_v62  ;;  %v1750_v62 = vrot.slane %v11037_v44, 1 }
 0x1b3   : > { %7829 = vmatmul.mubr.f32.gmra.mrb[18].mxu0 %v12955_v20  ;;  %v1751_v20 = vrot.slane %v11044_v8, 1 }
 0x1b4   : > { %7831 = vmatprep.mubr.f32.mxu0 %v12956_v0  ;;  %v12962_v0 = vrot.slane %v11031_v36, 7  ;;  %v2315_v36 = vld [vmem:[#allocation5 + $0x310] sm:$0xff] }
 0x1b5   : > { %v11086_v34 = vsel %vm521_vm1, %v1750_v62, %v1751_v20  ;;  %v12969_v62 = vld [vmem:[#allocation43_spill] sm:$0xff] }
 0x1b6   : > { %12965 = vst [vmem:[#allocation19_spill] sm:$0xff] %v11086_v34 }
 0x1b7   : > { %7832 = vmatmul.mubr.f32.gmra.mrb[20].mxu0 %v12957_v28  ;;  %v11080_v28 = vsel %vm314_vm0, %v12962_v0, %v426_v45  ;;  %v12967_v0 = vld [vmem:[#allocation44_spill] sm:$0xff]  ;;  %v9085_v45 = vpack.c.bf16 %v2316_v33, %v2315_v36  ;;  %v2322_v33 = vld [vmem:[#allocation5 + $0x348] sm:$0xff]  ;;  %v12971_v36 = vld [vmem:[#allocation47_spill] sm:$0xff] }
 0x1b8   : > { %7834 = vmatprep.mubr.f32.mxu0 %v12958_v43  ;;  %v12963_v43 = vld [vmem:[#allocation40_spill] sm:$0xff] }
 0x1bb   : > { %7835 = vmatmul.mubr.f32.gmra.mrb[22].mxu0 %v10756_v60  ;;  %v12964_v60 = vld [vmem:[#allocation41_spill] sm:$0xff] }
 0x1bc   : > { %7837 = vmatprep.mubr.f32.mxu0 %v12959_v23  ;;  %v1753_v23 = vrot.slane %v11080_v28, 1 }
 0x1bf   : > { %7838 = vmatmul.mubr.f32.gmra.mrb[24].mxu0 %v12960_v24  ;;  %v12966_v24 = vld [vmem:[#allocation42_spill] sm:$0xff] }
 0x1c0   : > { %7840 = vmatprep.mubr.f32.mxu0 %v12961_v22  ;;  %v11091_v22 = vsel %vm521_vm1, %v1751_v20, %v1753_v23  ;;  %v12970_v20 = vld [vmem:[#allocation46_spill] sm:$0xff] }
 0x1c3   : > { %7841 = vmatmul.mubr.f32.gmra.mrb[26].mxu0 %v12963_v43  ;;  %v2318_v43 = vld [vmem:[#allocation5 + $0x328] sm:$0xff] }
 0x1c4   : > { %7843 = vmatprep.mubr.f32.mxu0 %v12964_v60  ;;  %v2317_v60 = vld [vmem:[#allocation5 + $0x320] sm:$0xff] }
 0x1c7   : > { %7844 = vmatmul.mubr.f32.gmra.mrb[28].mxu0 %v12966_v24  ;;  %v9089_v24 = vpack.c.bf16 %v2318_v43, %v2317_v60  ;;  %v2324_v60 = vld [vmem:[#allocation5 + $0x358] sm:$0xff]  ;;  %v12972_v43 = vld [vmem:[#allocation48_spill] sm:$0xff] }
 0x1c8   : > { %7846 = vmatprep.mubr.f32.mxu0 %v11086_v34  ;;  %v2319_v34 = vld [vmem:[#allocation5 + $0x330] sm:$0xff] }
 0x1c9   : > { %v9093_v23 = vpack.c.bf16 %v2320_v27, %v2319_v34  ;;  %v2326_v27 = vld [vmem:[#allocation5 + $0x368] sm:$0xff] }
 0x1cb   : > { %7847 = vmatmul.mubr.f32.gmra.mrb[30].mxu0 %v11091_v22 }
 0x1cc   : > { %7881 = vmatprep.mubr.f32.mxu0 %v12967_v0  ;;  %v2321_v0 = vld [vmem:[#allocation5 + $0x340] sm:$0xff] }
 0x1cf   : > { %7882 = vmatmul.mubr.f32.vlgmr.msra.gmra.mrb[0].mxu0 %v12968_v12  ;;  %v9097_v12 = vpack.c.bf16 %v2322_v33, %v2321_v0  ;;  %v2328_v0 = vld [vmem:[#allocation5 + $0x378] sm:$0xff]  ;;  %v2587_v33 = vld [vmem:[#allocation5 + $0x380] sm:$0xff] }
 0x1d0   : > { %9084 = vmatpush3.bf16.msra.mxu0 %v9081_v10  ;;  %7884 = vmatprep.mubr.f32.mxu0 %v12969_v62  ;;  %v2323_v10 = vld [vmem:[#allocation5 + $0x350] sm:$0xff] }
 0x1d1   : > { %9086 = vmatprep.subr.bf16.mxu0 %v9085_v45 }
 0x1d3   : > { %7885 = vmatmul.mubr.f32.gmra.mrb[2].mxu0 %v10845_v55 }
 0x1d4   : > { %7887 = vmatprep.mubr.f32.mxu0 %v12970_v20  ;;  %9088 = vmatpush3.bf16.msra.mxu0 %v9085_v45  ;;  %v9101_v45 = vpack.c.bf16 %v2324_v60, %v2323_v10  ;;  %v2325_v20 = vld [vmem:[#allocation5 + $0x360] sm:$0xff]  ;;  %v2588_v10 = vld [vmem:[#allocation5 + $0x388] sm:$0xff]  ;;  %v12974_v60 = vld [vmem:[#allocation50_spill] sm:$0xff] }
 0x1d5   : > { %9090 = vmatprep.subr.bf16.mxu0 %v9089_v24  ;;  %v9105_v34 = vpack.c.bf16 %v2326_v27, %v2325_v20  ;;  %v12973_v20 = vld [vmem:[#allocation49_spill] sm:$0xff] }
 0x1d6   : > { %v12976_v27 = vld [vmem:[#allocation53_spill] sm:$0xff] }
 0x1d7   : > { %7888 = vmatmul.mubr.f32.gmra.mrb[4].mxu0 %v10869_v58 }
 0x1d8   : > { %7890 = vmatprep.mubr.f32.mxu0 %v12971_v36  ;;  %9092 = vmatpush3.bf16.msra.mxu0 %v9089_v24  ;;  %v2327_v24 = vld [vmem:[#allocation5 + $0x370] sm:$0xff] }
 0x1d9   : > { %9094 = vmatprep.subr.bf16.mxu0 %v9093_v23 }
 0x1db   : > { %7891 = vmatmul.mubr.f32.gmra.mrb[6].mxu0 %v10880_v41 }
 0x1dc   : > { %7893 = vmatprep.mubr.f32.mxu0 %v12972_v43  ;;  %9096 = vmatpush3.bf16.msra.mxu0 %v9093_v23  ;;  %v9109_v23 = vpack.c.bf16 %v2328_v0, %v2327_v24  ;;  %v2032_v24 = vrot.slane %v11044_v8, 2  ;;  %v12977_v0 = vld [vmem:[#allocation55_spill] sm:$0xff] }
 0x1dd   : > { %9098 = vmatprep.subr.bf16.mxu0 %v9097_v12 }
 0x1df   : > { %7894 = vmatmul.mubr.f32.gmra.mrb[8].mxu0 %v10891_v3 }
 0x1e0   : > { %7896 = vmatprep.mubr.f32.mxu0 %v10895_v40  ;;  %9100 = vmatpush3.bf16.msra.mxu0 %v9097_v12  ;;  %v9113_v12 = vpack.c.bf16 %v2588_v10, %v2587_v33 }
 0x1e1   : > { %9102 = vmatprep.subr.bf16.mxu0 %v9101_v45 }
 0x1e3   : > { %7897 = vmatmul.mubr.f32.gmra.mrb[10].mxu0 %v10902_v59 }
 0x1e4   : > { %7899 = vmatprep.mubr.f32.mxu0 %v10906_v18  ;;  %9104 = vmatpush3.bf16.msra.mxu0 %v9101_v45  ;;  %v12975_v45 = vld [vmem:[#allocation51_spill] sm:$0xff] }
 0x1e5   : > { %9106 = vmatprep.subr.bf16.mxu0 %v9105_v34 }
 0x1e7   : > { %7900 = vmatmul.mubr.f32.gmra.mrb[12].mxu0 %v10913_v56 }
 0x1e8   : > { %7902 = vmatprep.mubr.f32.mxu0 %v10917_v30  ;;  %9108 = vmatpush3.bf16.msra.mxu0 %v9105_v34  ;;  %v2031_v34 = vrot.slane %v11037_v44, 2 }
 0x1e9   : > { %9110 = vmatprep.subr.bf16.mxu0 %v9109_v23 }
 0x1ea   : > { %v11127_v33 = vsel %vm1094_vm2, %v2031_v34, %v2032_v24  ;;  %v2593_v34 = vld [vmem:[#allocation5 + $0x3b0] sm:$0xff] }
 0x1eb   : > { %7903 = vmatmul.mubr.f32.gmra.mrb[14].mxu0 %v10924_v49  ;;  %12978 = vst [vmem:[#allocation21_spill] sm:$0xff] %v11127_v33 }
 0x1ec   : > { %7905 = vmatprep.mubr.f32.mxu0 %v10928_v2  ;;  %9112 = vmatpush3.bf16.msra.mxu0 %v9109_v23  ;;  %v2034_v23 = vrot.slane %v11080_v28, 2 }
 0x1ed   : > { %9114 = vmatprep.subr.bf16.mxu0 %v9113_v12 }
 0x1ee   : > { %v11132_v10 = vsel %vm1094_vm2, %v2032_v24, %v2034_v23  ;;  %v2870_v23 = vld [vmem:[#allocation5 + $0x448] sm:$0xff] }
 0x1ef   : > { %7906 = vmatmul.mubr.f32.gmra.mrb[16].mxu0 %v10935_v52 }
 0x1f0   : > { %7908 = vmatprep.mubr.f32.mxu0 %v10939_v42 }
 0x1f3   : > { %7909 = vmatmul.mubr.f32.gmra.mrb[18].mxu0 %v10946_v19 }
 0x1f4   : > { %7911 = vmatprep.mubr.f32.mxu0 %v12973_v20 }
 0x1f7   : > { %7912 = vmatmul.mubr.f32.gmra.mrb[20].mxu0 %v10957_v11 }
 0x1f8   : > { %7914 = vmatprep.mubr.f32.mxu0 %v12974_v60 }
 0x1fb   : > { %7915 = vmatmul.mubr.f32.gmra.mrb[22].mxu0 %v10968_v31 }
 0x1fc   : > { %7917 = vmatprep.mubr.f32.mxu0 %v12975_v45  ;;  %v2592_v45 = vld [vmem:[#allocation5 + $0x3a8] sm:$0xff] }
 0x1ff   : > { %7918 = vmatmul.mubr.f32.gmra.mrb[24].mxu0 %v10979_v7  ;;  %v2590_v7 = vld [vmem:[#allocation5 + $0x398] sm:$0xff] }
 0x200   : > { %7920 = vmatprep.mubr.f32.mxu0 %v12976_v27  ;;  %v2589_v27 = vld [vmem:[#allocation5 + $0x390] sm:$0xff] }
 0x203   : > { %7921 = vmatmul.mubr.f32.gmra.mrb[26].mxu0 %v10990_v61  ;;  %v9117_v61 = vpack.c.bf16 %v2590_v7, %v2589_v27  ;;  %v2596_v7 = vld [vmem:[#allocation5 + $0x3c8] sm:$0xff] }
 0x204   : > { %7923 = vmatprep.mubr.f32.mxu0 %v12977_v0  ;;  %v2591_v0 = vld [vmem:[#allocation5 + $0x3a0] sm:$0xff]  ;;  %v2862_v27 = vld [vmem:[#allocation5 + $0x408] sm:$0xff] }
 0x205   : > { %v9121_v28 = vpack.c.bf16 %v2592_v45, %v2591_v0  ;;  %v2602_v45 = vld [vmem:[#allocation5 + $0x3f8] sm:$0xff]  ;;  %v2869_v0 = vld [vmem:[#allocation5 + $0x440] sm:$0xff] }
 0x207   : > { %7924 = vmatmul.mubr.f32.gmra.mrb[28].mxu0 %v10999_v48 }
 0x208   : > { %7926 = vmatprep.mubr.f32.mxu0 %v11127_v33  ;;  %v2594_v33 = vld [vmem:[#allocation5 + $0x3b8] sm:$0xff] }
 0x209   : > { %v9125_v24 = vpack.c.bf16 %v2594_v33, %v2593_v34  ;;  %v12987_v33 = vld [vmem:[#allocation17_spill] sm:$0xff]  ;;  %v9161_v34 = vpack.c.bf16 %v2870_v23, %v2869_v0 }
 0x20b   : > { %7927 = vmatmul.mubr.f32.gmra.mrb[30].mxu0 %v11132_v10 }
 0x20c   : > { %7961 = vmatprep.mubr.f32.mxu0 %v10473_v17  ;;  %v2595_v17 = vld [vmem:[#allocation5 + $0x3c0] sm:$0xff] }
 0x20f   : > { %7962 = vmatmul.mubr.f32.vlgmr.msra.gmra.mrb[0].mxu0 %v10470_v16  ;;  %v9129_v16 = vpack.c.bf16 %v2596_v7, %v2595_v17  ;;  %v2872_v17 = vld [vmem:[#allocation5 + $0x458] sm:$0xff]  ;;  %v12989_v7 = vld [vmem:[#allocation20_spill] sm:$0xff] }
 0x210   : > { %9116 = vmatpush3.bf16.msra.mxu0 %v9113_v12  ;;  %7964 = vmatprep.mubr.f32.mxu0 %v10510_v1  ;;  %v2597_v1 = vld [vmem:[#allocation5 + $0x3d0] sm:$0xff]  ;;  %v2598_v12 = vld [vmem:[#allocation5 + $0x3d8] sm:$0xff] }
 0x211   : > { %9118 = vmatprep.subr.bf16.mxu0 %v9117_v61 }
 0x213   : > { %7965 = vmatmul.mubr.f32.gmra.mrb[2].mxu0 %v10513_v4  ;;  %v9133_v4 = vpack.c.bf16 %v2598_v12, %v2597_v1  ;;  %v2873_v1 = vld [vmem:[#allocation5 + $0x460] sm:$0xff]  ;;  %v2874_v12 = vld [vmem:[#allocation5 + $0x468] sm:$0xff] }
 0x214   : > { %7967 = vmatprep.mubr.f32.mxu0 %v10528_v14  ;;  %9120 = vmatpush3.bf16.msra.mxu0 %v9117_v61  ;;  %v2599_v14 = vld [vmem:[#allocation5 + $0x3e0] sm:$0xff]  ;;  %v2600_v61 = vld [vmem:[#allocation5 + $0x3e8] sm:$0xff] }
 0x215   : > { %9122 = vmatprep.subr.bf16.mxu0 %v9121_v28 }
 0x217   : > { %7968 = vmatmul.mubr.f32.gmra.mrb[4].mxu0 %v10533_v21  ;;  %v9137_v21 = vpack.c.bf16 %v2600_v61, %v2599_v14  ;;  %v9169_v14 = vpack.c.bf16 %v2874_v12, %v2873_v1  ;;  %v2875_v61 = vld [vmem:[#allocation5 + $0x470] sm:$0xff] }
 0x218   : > { %7970 = vmatprep.mubr.f32.mxu0 %v10550_v39  ;;  %9124 = vmatpush3.bf16.msra.mxu0 %v9121_v28  ;;  %v2601_v39 = vld [vmem:[#allocation5 + $0x3f0] sm:$0xff] }
 0x219   : > { %9126 = vmatprep.subr.bf16.mxu0 %v9125_v24  ;;  %v12988_v28 = vld [vmem:[#allocation18_spill] sm:$0xff] }
 0x21b   : > { %7971 = vmatmul.mubr.f32.gmra.mrb[6].mxu0 %v10547_v38  ;;  %v9141_v38 = vpack.c.bf16 %v2602_v45, %v2601_v39  ;;  %v12991_v39 = vld [vmem:[#allocation23_spill] sm:$0xff]  ;;  %v12992_v45 = vld [vmem:[#allocation24_spill] sm:$0xff] }
 0x21c   : > { %7973 = vmatprep.mubr.f32.mxu0 %v10567_v53  ;;  %9128 = vmatpush3.bf16.msra.mxu0 %v9125_v24  ;;  %v2861_v53 = vld [vmem:[#allocation5 + $0x400] sm:$0xff]  ;;  %v2871_v24 = vld [vmem:[#allocation5 + $0x450] sm:$0xff] }
 0x21d   : > { %9130 = vmatprep.subr.bf16.mxu0 %v9129_v16 }
 0x21f   : > { %7974 = vmatmul.mubr.f32.gmra.mrb[8].mxu0 %v10564_v51  ;;  %v9145_v51 = vpack.c.bf16 %v2862_v27, %v2861_v53  ;;  %v12994_v53 = vld [vmem:[#allocation26_spill] sm:$0xff]  ;;  %v12996_v27 = vld [vmem:[#allocation28_spill] sm:$0xff] }
 0x220   : > { %7976 = vmatprep.mubr.f32.mxu0 %v10596_v26  ;;  %9132 = vmatpush3.bf16.msra.mxu0 %v9129_v16  ;;  %v12980_v26 = vld [vmem:[#allocation37_spill] sm:$0xff]  ;;  %v9165_v16 = vpack.c.bf16 %v2872_v17, %v2871_v24 }
 0x221   : > { %9134 = vmatprep.subr.bf16.mxu0 %v9133_v4 }
 0x223   : > { %7977 = vmatmul.mubr.f32.gmra.mrb[10].mxu0 %v10593_v25  ;;  %v12979_v25 = vld [vmem:[#allocation33_spill] sm:$0xff] }
 0x224   : > { %7979 = vmatprep.mubr.f32.mxu0 %v10614_v37  ;;  %9136 = vmatpush3.bf16.msra.mxu0 %v9133_v4  ;;  %v2863_v37 = vld [vmem:[#allocation5 + $0x410] sm:$0xff] }
 0x225   : > { %9138 = vmatprep.subr.bf16.mxu0 %v9137_v21  ;;  %v12990_v4 = vld [vmem:[#allocation22_spill] sm:$0xff] }
 0x227   : > { %7980 = vmatmul.mubr.f32.gmra.mrb[12].mxu0 %v10611_v35  ;;  %v12981_v35 = vld [vmem:[#allocation36_spill] sm:$0xff] }
 0x228   : > { %7982 = vmatprep.mubr.f32.mxu0 %v10632_v5  ;;  %9140 = vmatpush3.bf16.msra.mxu0 %v9137_v21  ;;  %v2864_v5 = vld [vmem:[#allocation5 + $0x418] sm:$0xff] }
 0x229   : > { %9142 = vmatprep.subr.bf16.mxu0 %v9141_v38  ;;  %v2876_v21 = vld [vmem:[#allocation5 + $0x478] sm:$0xff] }
 0x22b   : > { %7983 = vmatmul.mubr.f32.gmra.mrb[14].mxu0 %v10638_v15  ;;  %v12982_v15 = vld [vmem:[#allocation12_spill] sm:$0xff] }
 0x22c   : > { %7985 = vmatprep.mubr.f32.mxu0 %v10660_v50  ;;  %9144 = vmatpush3.bf16.msra.mxu0 %v9141_v38  ;;  %v2866_v50 = vld [vmem:[#allocation5 + $0x428] sm:$0xff] }
 0x22d   : > { %9146 = vmatprep.subr.bf16.mxu0 %v9145_v51  ;;  %v12993_v38 = vld [vmem:[#allocation25_spill] sm:$0xff] }
 0x22f   : > { %7986 = vmatmul.mubr.f32.gmra.mrb[16].mxu0 %v10657_v47  ;;  %v2865_v47 = vld [vmem:[#allocation5 + $0x420] sm:$0xff] }
 0x230   : > { %7988 = vmatprep.mubr.f32.mxu0 %v10684_v29  ;;  %v12984_v29 = vld [vmem:[#allocation14_spill] sm:$0xff] }
 0x233   : > { %7989 = vmatmul.mubr.f32.gmra.mrb[18].mxu0 %v10681_v63  ;;  %v12983_v63 = vld [vmem:[#allocation13_spill] sm:$0xff] }
 0x234   : > { %7991 = vmatprep.mubr.f32.mxu0 %v10707_v46  ;;  %v2868_v46 = vld [vmem:[#allocation5 + $0x438] sm:$0xff] }
 0x237   : > { %7992 = vmatmul.mubr.f32.gmra.mrb[20].mxu0 %v10704_v13  ;;  %v2867_v13 = vld [vmem:[#allocation5 + $0x430] sm:$0xff] }
 0x238   : > { %7994 = vmatprep.mubr.f32.mxu0 %v10726_v9  ;;  %v9153_v9 = vpack.c.bf16 %v2866_v50, %v2865_v47  ;;  %v13005_v47 = vld [vmem:[#allocation40_spill] sm:$0xff]  ;;  %v13006_v50 = vld [vmem:[#allocation41_spill] sm:$0xff] }
 0x23b   : > { %7995 = vmatmul.mubr.f32.gmra.mrb[22].mxu0 %v10729_v54  ;;  %v9149_v54 = vpack.c.bf16 %v2864_v5, %v2863_v37  ;;  %v13001_v37 = vld [vmem:[#allocation34_spill] sm:$0xff]  ;;  %v13002_v5 = vld [vmem:[#allocation35_spill] sm:$0xff] }
 0x23c   : > { %7997 = vmatprep.mubr.f32.mxu0 %v10748_v6  ;;  %v12985_v6 = vld [vmem:[#allocation15_spill] sm:$0xff] }
 0x23f   : > { %7998 = vmatmul.mubr.f32.gmra.mrb[24].mxu0 %v12979_v25  ;;  %v12998_v25 = vld [vmem:[#allocation30_spill] sm:$0xff] }
 0x240   : > { %8000 = vmatprep.mubr.f32.mxu0 %v12980_v26 }
 0x243   : > { %8001 = vmatmul.mubr.f32.gmra.mrb[26].mxu0 %v12981_v35 }
 0x244   : > { %8003 = vmatprep.mubr.f32.mxu0 %v11037_v44  ;;  %v12986_v44 = vld [vmem:[#allocation16_spill] sm:$0xff] }
 0x247   : > { %8004 = vmatmul.mubr.f32.gmra.mrb[28].mxu0 %v11044_v8  ;;  %v9157_v8 = vpack.c.bf16 %v2868_v46, %v2867_v13 }
 0x248   : > { %8006 = vmatprep.mubr.f32.mxu0 %v12980_v26  ;;  %v12999_v26 = vld [vmem:[#allocation31_spill] sm:$0xff] }
 0x24b   : > { %8007 = vmatmul.mubr.f32.gmra.mrb[30].mxu0 %v12981_v35  ;;  %v13000_v35 = vld [vmem:[#allocation32_spill] sm:$0xff] }
 0x24c   : > { %8041 = vmatprep.mubr.f32.mxu0 %v12982_v15  ;;  %v13003_v15 = vld [vmem:[#allocation38_spill] sm:$0xff] }
 0x24f   : > { %8042 = vmatmul.mubr.f32.vlgmr.msra.gmra.mrb[0].mxu0 %v12983_v63  ;;  %v13007_v63 = vld [vmem:[#allocation42_spill] sm:$0xff] }
 0x250   : > { %9148 = vmatpush3.bf16.msra.mxu0 %v9145_v51  ;;  %8044 = vmatprep.mubr.f32.mxu0 %v12984_v29  ;;  %v12997_v51 = vld [vmem:[#allocation29_spill] sm:$0xff]  ;;  %v13008_v29 = vld [vmem:[#allocation19_spill] sm:$0xff] }
 0x251   : > { %9150 = vmatprep.subr.bf16.mxu0 %v9149_v54 }
 0x253   : > { %8045 = vmatmul.mubr.f32.gmra.mrb[2].mxu0 %v12985_v6 }
 0x254   : > { %8047 = vmatprep.mubr.f32.mxu0 %v12986_v44  ;;  %9152 = vmatpush3.bf16.msra.mxu0 %v9149_v54  ;;  %v13004_v54 = vld [vmem:[#allocation39_spill] sm:$0xff] }
 0x255   : > { %9154 = vmatprep.subr.bf16.mxu0 %v9153_v9 }
 0x257   : > { %8048 = vmatmul.mubr.f32.gmra.mrb[4].mxu0 %v12987_v33 }
 0x258   : > { %8050 = vmatprep.mubr.f32.mxu0 %v12988_v28  ;;  %9156 = vmatpush3.bf16.msra.mxu0 %v9153_v9  ;;  %v13009_v9 = vld [vmem:[#allocation46_spill] sm:$0xff] }
 0x259   : > { %9158 = vmatprep.subr.bf16.mxu0 %v9157_v8 }
 0x25b   : > { %8051 = vmatmul.mubr.f32.gmra.mrb[6].mxu0 %v12945_v57  ;;  %v9173_v57 = vpack.c.bf16 %v2876_v21, %v2875_v61 }
 0x25c   : > { %8053 = vmatprep.mubr.f32.mxu0 %v12989_v7  ;;  %9160 = vmatpush3.bf16.msra.mxu0 %v9157_v8 }
 0x25d   : > { %9162 = vmatprep.subr.bf16.mxu0 %v9161_v34 }
 0x25f   : > { %8054 = vmatmul.mubr.f32.gmra.mrb[8].mxu0 %v12947_v32  ;;  %v12995_v32 = vld [vmem:[#allocation27_spill] sm:$0xff] }
 0x260   : > { %8056 = vmatprep.mubr.f32.mxu0 %v12990_v4  ;;  %9164 = vmatpush3.bf16.msra.mxu0 %v9161_v34 }
 0x261   : > { %9166 = vmatprep.subr.bf16.mxu0 %v9165_v16 }
 0x263   : > { %8057 = vmatmul.mubr.f32.gmra.mrb[10].mxu0 %v12991_v39 }
 0x264   : > { %8059 = vmatprep.mubr.f32.mxu0 %v12992_v45  ;;  %9168 = vmatpush3.bf16.msra.mxu0 %v9165_v16 }
 0x265   : > { %9170 = vmatprep.subr.bf16.mxu0 %v9169_v14 }
 0x267   : > { %8060 = vmatmul.mubr.f32.gmra.mrb[12].mxu0 %v12993_v38 }
 0x268   : > { %8062 = vmatprep.mubr.f32.mxu0 %v12994_v53  ;;  %9172 = vmatpush3.bf16.msra.mxu0 %v9169_v14 }
 0x269   : > { %9174 = vmatprep.subr.bf16.mxu0 %v9173_v57 }
 0x26b   : > { %8063 = vmatmul.mubr.f32.gmra.mrb[14].mxu0 %v12995_v32 }
 0x26c   : > { %8065 = vmatprep.mubr.f32.mxu0 %v12996_v27  ;;  %9176 = vmatpush3.bf16.msra.mxu0 %v9173_v57 }
 0x26f   : > { %8066 = vmatmul.mubr.f32.gmra.mrb[16].mxu0 %v12997_v51 }
 0x270   : > { %8068 = vmatprep.mubr.f32.mxu0 %v12998_v25 }
 0x273   : > { %8069 = vmatmul.mubr.f32.gmra.mrb[18].mxu0 %v12999_v26 }
 0x274   : > { %8071 = vmatprep.mubr.f32.mxu0 %v13000_v35 }
 0x277   : > { %8072 = vmatmul.mubr.f32.gmra.mrb[20].mxu0 %v13001_v37 }
 0x278   : > { %8074 = vmatprep.mubr.f32.mxu0 %v13002_v5 }
 0x27b   : > { %8075 = vmatmul.mubr.f32.gmra.mrb[22].mxu0 %v13003_v15 }
 0x27c   : > { %8077 = vmatprep.mubr.f32.mxu0 %v13004_v54 }
 0x27f   : > { %8078 = vmatmul.mubr.f32.gmra.mrb[24].mxu0 %v13005_v47 }
 0x280   : > { %8080 = vmatprep.mubr.f32.mxu0 %v13006_v50 }
 0x283   : > { %8081 = vmatmul.mubr.f32.gmra.mrb[26].mxu0 %v13007_v63 }
 0x284   : > { %8083 = vmatprep.mubr.f32.mxu0 %v13008_v29 }
 0x287   : > { %8084 = vmatmul.mubr.f32.gmra.mrb[28].mxu0 %v11091_v22 }
 0x288   : > { %8086 = vmatprep.mubr.f32.mxu0 %v13006_v50 }
 0x28b   : > { %8087 = vmatmul.mubr.f32.gmra.mrb[30].mxu0 %v13007_v63 }
 0x28c   : > { %8121 = vmatprep.mubr.f32.mxu0 %v12969_v62 }
 0x28f   : > { %8122 = vmatmul.mubr.f32.vlgmr.msra.gmra.mrb[0].mxu0 %v10845_v55  ;;  %v13010_v55 = vld [vmem:[#allocation51_spill] sm:$0xff] }
 0x290   : > { %8124 = vmatprep.mubr.f32.mxu0 %v13009_v9 }
 0x293   : > { %8125 = vmatmul.mubr.f32.gmra.mrb[2].mxu0 %v10869_v58  ;;  %v13011_v58 = vld [vmem:[#allocation52_spill] sm:$0xff] }
 0x294   : > { %8127 = vmatprep.mubr.f32.mxu0 %v12971_v36 }
 0x297   : > { %8128 = vmatmul.mubr.f32.gmra.mrb[4].mxu0 %v10880_v41  ;;  %v13012_v41 = vld [vmem:[#allocation53_spill] sm:$0xff] }
 0x298   : > { %8130 = vmatprep.mubr.f32.mxu0 %v12972_v43 }
 0x29b   : > { %8131 = vmatmul.mubr.f32.gmra.mrb[6].mxu0 %v10891_v3  ;;  %v13013_v3 = vld [vmem:[#allocation54_spill] sm:$0xff] }
 0x29c   : > { %8133 = vmatprep.mubr.f32.mxu0 %v10895_v40  ;;  %v13014_v40 = vld [vmem:[#allocation55_spill] sm:$0xff] }
 0x29f   : > { %8134 = vmatmul.mubr.f32.gmra.mrb[8].mxu0 %v10902_v59  ;;  %v13015_v59 = vld [vmem:[#allocation21_spill] sm:$0xff] }
 0x2a0   : > { %8136 = vmatprep.mubr.f32.mxu0 %v10906_v18 }
 0x2a3   : > { %8137 = vmatmul.mubr.f32.gmra.mrb[10].mxu0 %v10913_v56 }
 0x2a4   : > { %8139 = vmatprep.mubr.f32.mxu0 %v10917_v30 }
 0x2a7   : > { %8140 = vmatmul.mubr.f32.gmra.mrb[12].mxu0 %v10924_v49 }
 0x2a8   : > { %8142 = vmatprep.mubr.f32.mxu0 %v10928_v2 }
 0x2ab   : > { %8143 = vmatmul.mubr.f32.gmra.mrb[14].mxu0 %v10935_v52 }
 0x2ac   : > { %8145 = vmatprep.mubr.f32.mxu0 %v10939_v42 }
 0x2af   : > { %8146 = vmatmul.mubr.f32.gmra.mrb[16].mxu0 %v10946_v19 }
 0x2b0   : > { %8148 = vmatprep.mubr.f32.mxu0 %v12973_v20 }
 0x2b3   : > { %8149 = vmatmul.mubr.f32.gmra.mrb[18].mxu0 %v10957_v11 }
 0x2b4   : > { %8151 = vmatprep.mubr.f32.mxu0 %v12974_v60 }
 0x2b7   : > { %8152 = vmatmul.mubr.f32.gmra.mrb[20].mxu0 %v10968_v31 }
 0x2b8   : > { %8154 = vmatprep.mubr.f32.mxu0 %v13010_v55 }
 0x2bb   : > { %8155 = vmatmul.mubr.f32.gmra.mrb[22].mxu0 %v13011_v58 }
 0x2bc   : > { %8157 = vmatprep.mubr.f32.mxu0 %v13012_v41 }
 0x2bf   : > { %8158 = vmatmul.mubr.f32.gmra.mrb[24].mxu0 %v13013_v3 }
 0x2c0   : > { %8160 = vmatprep.mubr.f32.mxu0 %v13014_v40 }
 0x2c3   : > { %8161 = vmatmul.mubr.f32.gmra.mrb[26].mxu0 %v10999_v48 }
 0x2c4   : > { %8163 = vmatprep.mubr.f32.mxu0 %v13015_v59  ;;  %v3716_v59 = vld [vmem:[#allocation7 + $0x80] sm:$0xff] }
 0x2c7   : > { %8164 = vmatmul.mubr.f32.gmra.mrb[28].mxu0 %v11132_v10 }
 0x2c8   : > { %8166 = vmatprep.mubr.f32.mxu0 %v13014_v40 }
 0x2cb   : > { %8167 = vmatmul.mubr.f32.gmra.mrb[30].mxu0 %v10999_v48 }
 0x362   : > { %v11231_v18 = vpop.f32.mrb[0].mxu0 }
 0x363   : > { %v11233_v56 = vpop.f32.mrb[1].mxu0 }
 0x364   : > { %v3134_v30 = vadd.f32 %v11231_v18, %v11233_v56 }
 0x366   : > { %v11237_v49 = vpop.f32.mrb[2].mxu0 }
 0x367   : > { %v11239_v2 = vpop.f32.mrb[3].mxu0 }
 0x368   : > { %v3135_v52 = vadd.f32 %v3134_v30, %v11239_v2  ;;  %v3717_v30 = vld [vmem:[#allocation7 + $0x88] sm:$0xff] }
 0x36a   : > { %v11242_v42 = vpop.f32.mrb[4].mxu0  ;;  %v3136_v19 = vadd.f32 %v11237_v49, %v3135_v52 }
 0x36b   : > { %v11245_v11 = vpop.f32.mrb[5].mxu0 }
 0x36c   : > { %v3137_v31 = vadd.f32 %v3136_v19, %v11245_v11  ;;  %v9177_v19 = vpack.c.bf16 %v3717_v30, %v3716_v59 }
 0x36e   : > { %v11248_v48 = vpop.f32.mrb[6].mxu0  ;;  %v3138_v22 = vadd.f32 %v11242_v42, %v3137_v31  ;;  %9178 = vmatprep.subr.bf16.mxu1 %v9177_v19 }
 0x36f   : > { %v11251_v62 = vpop.f32.mrb[7].mxu0  ;;  %9180 = vmatpush3.bf16.msra.mxu1 %v9177_v19 }
 0x370   : > { %v3139_v36 = vadd.f32 %v3138_v22, %v11251_v62  ;;  %v3718_v22 = vld [vmem:[#allocation7 + $0x90] sm:$0xff] }
 0x372   : > { %v11254_v43 = vpop.f32.mrb[8].mxu0  ;;  %v3140_v20 = vadd.f32 %v11248_v48, %v3139_v36  ;;  %v3719_v36 = vld [vmem:[#allocation7 + $0x98] sm:$0xff] }
 0x373   : > { %v11257_v60 = vpop.f32.mrb[9].mxu0 }
 0x374   : > { %v3141_v10 = vadd.f32 %v3140_v20, %v11257_v60 }
 0x376   : > { %v11260_v13 = vpop.f32.mrb[10].mxu0  ;;  %v3142_v46 = vadd.f32 %v11254_v43, %v3141_v10  ;;  %v9181_v10 = vpack.c.bf16 %v3719_v36, %v3718_v22  ;;  %v3731_v22 = vld [vmem:[#allocation7 + $0xf8] sm:$0xff] }
 0x377   : > { %v11263_v6 = vpop.f32.mrb[11].mxu0 }
 0x378   : > { %v3143_v44 = vadd.f32 %v3142_v46, %v11263_v6  ;;  %9182 = vmatprep.subr.bf16.mxu1 %v9181_v10 }
 0x379   : > { %9184 = vmatpush3.bf16.msra.mxu1 %v9181_v10 }
 0x37a   : > { %v11266_v8 = vpop.f32.mrb[12].mxu0  ;;  %v3144_v0 = vadd.f32 %v11260_v13, %v3143_v44  ;;  %v3720_v44 = vld [vmem:[#allocation7 + $0xa0] sm:$0xff] }
 0x37b   : > { %v11269_v23 = vpop.f32.mrb[13].mxu0 }
 0x37c   : > { %v3145_v33 = vadd.f32 %v3144_v0, %v11269_v23  ;;  %v3721_v0 = vld [vmem:[#allocation7 + $0xa8] sm:$0xff] }
 0x37e   : > { %v11272_v28 = vpop.f32.mrb[14].mxu0  ;;  %v3146_v34 = vadd.f32 %v11266_v8, %v3145_v33 }
 0x37f   : > { %v11275_v24 = vpop.f32.mrb[15].mxu0 }
 0x380   : > { %v3147_v17 = vadd.f32 %v3146_v34, %v11275_v24  ;;  %v9185_v34 = vpack.c.bf16 %v3721_v0, %v3720_v44  ;;  %v3564_v0 = vld [vmem:[#allocation7] sm:$0xff] }
 0x382   : > { %v11278_v7 = vpop.f32.mrb[16].mxu0  ;;  %v3148_v16 = vadd.f32 %v11272_v28, %v3147_v17  ;;  %9186 = vmatprep.subr.bf16.mxu1 %v9185_v34 }
 0x383   : > { %v11281_v1 = vpop.f32.mrb[17].mxu0  ;;  %9188 = vmatpush3.bf16.msra.mxu1 %v9185_v34 }
 0x384   : > { %v3149_v12 = vadd.f32 %v3148_v16, %v11281_v1  ;;  %v3722_v16 = vld [vmem:[#allocation7 + $0xb0] sm:$0xff] }
 0x386   : > { %v11284_v4 = vpop.f32.mrb[18].mxu0  ;;  %v3150_v14 = vadd.f32 %v11278_v7, %v3149_v12  ;;  %v3723_v12 = vld [vmem:[#allocation7 + $0xb8] sm:$0xff] }
 0x387   : > { %v11287_v61 = vpop.f32.mrb[19].mxu0 }
 0x388   : > { %v3151_v21 = vadd.f32 %v3150_v14, %v11287_v61 }
 0x38a   : > { %v11290_v39 = vpop.f32.mrb[20].mxu0  ;;  %v3152_v45 = vadd.f32 %v11284_v4, %v3151_v21  ;;  %v9189_v21 = vpack.c.bf16 %v3723_v12, %v3722_v16 }
 0x38b   : > { %v11293_v57 = vpop.f32.mrb[21].mxu0 }
 0x38c   : > { %v3153_v38 = vadd.f32 %v3152_v45, %v11293_v57  ;;  %9190 = vmatprep.subr.bf16.mxu1 %v9189_v21 }
 0x38d   : > { %9192 = vmatpush3.bf16.msra.mxu1 %v9189_v21 }
 0x38e   : > { %v11296_v53 = vpop.f32.mrb[22].mxu0  ;;  %v3154_v32 = vadd.f32 %v11290_v39, %v3153_v38 }
 0x38f   : > { %v11299_v27 = vpop.f32.mrb[23].mxu0 }
 0x390   : > { %v3155_v51 = vadd.f32 %v3154_v32, %v11299_v27 }
 0x392   : > { %v11302_v25 = vpop.f32.mrb[24].mxu0  ;;  %v3156_v26 = vadd.f32 %v11296_v53, %v3155_v51 }
 0x393   : > { %v11305_v35 = vpop.f32.mrb[25].mxu0 }
 0x394   : > { %v3157_v37 = vadd.f32 %v3156_v26, %v11305_v35 }
 0x396   : > { %v11308_v5 = vpop.f32.mrb[26].mxu0  ;;  %v3158_v15 = vadd.f32 %v11302_v25, %v3157_v37 }
 0x397   : > { %v11311_v54 = vpop.f32.mrb[27].mxu0 }
 0x398   : > { %v3159_v47 = vadd.f32 %v3158_v15, %v11311_v54 }
 0x39a   : > { %v11314_v50 = vpop.f32.mrb[28].mxu0  ;;  %v3160_v63 = vadd.f32 %v11308_v5, %v3159_v47 }
 0x39b   : > { %v3083_v29 = vpop.f32.mrb[29].mxu0 }
 0x39c   : > { %v3161_v9 = vadd.f32 %v3160_v63, %v3083_v29  ;;  %v3725_v63 = vld [vmem:[#allocation7 + $0xc8] sm:$0xff] }
 0x39e   : > { %v11317_v55 = vpop.f32.mrb[30].mxu0  ;;  %v3162_v58 = vadd.f32 %v11314_v50, %v3161_v9  ;;  %v3727_v9 = vld [vmem:[#allocation7 + $0xd8] sm:$0xff] }
 0x39f   : > { %v3093_v41 = vpop.f32.mrb[31].mxu0 }
 0x3a0   : > { %v3163_v3 = vadd.f32 %v3162_v58, %v3093_v41 }
 0x3a2   : > { %v3164_v40 = vadd.f32 %v11317_v55, %v3163_v3  ;;  %v3728_v3 = vld [vmem:[#allocation7 + $0xe0] sm:$0xff] }
 0x3a4   : > { %v3165_v52 = vrot.slane %v3164_v40, 4 }
 0x3a6   : > { %v3166_v31 = vadd.f32 %v3165_v52, %v3164_v40  ;;  %v3729_v40 = vld [vmem:[#allocation7 + $0xe8] sm:$0xff] }
 0x3a7   : > { %v9201_v19 = vpack.c.bf16 %v3729_v40, %v3728_v3 }
 0x3a8   : > { %v3167_v20 = vrot.slane %v3166_v31, 2 }
 0x3aa   : > { %v3168_v46 = vadd.f32 %v3167_v20, %v3166_v31  ;;  %v3730_v31 = vld [vmem:[#allocation7 + $0xf0] sm:$0xff] }
 0x3ab   : > { %v9205_v44 = vpack.c.bf16 %v3731_v22, %v3730_v31 }
 0x3ac   : > { %v3169_v33 = vrot.slane %v3168_v46, 1 }
 0x3ae   : > { %v3170_v17 = vadd.f32 %v3169_v33, %v3168_v46  ;;  %v3565_v33 = vld [vmem:[#allocation7 + $0x8] sm:$0xff] }
 0x3b0   : > { %v3171_v14 = vmul.f32 0.00390625, %v3170_v17 }
 0x3b2   : > { %v11322_v45 = vsub.f32 %v11233_v56, %v3171_v14  ;;  %v11325_v38 = vsub.f32 %v11231_v18, %v3171_v14  ;;  %v11328_v32 = vsub.f32 %v11239_v2, %v3171_v14  ;;  %v11331_v51 = vsub.f32 %v11237_v49, %v3171_v14 }
 0x3b3   : > { %v11334_v26 = vsub.f32 %v11245_v11, %v3171_v14  ;;  %v11337_v37 = vsub.f32 %v11242_v42, %v3171_v14  ;;  %v11340_v15 = vsub.f32 %v11251_v62, %v3171_v14  ;;  %v11343_v56 = vsub.f32 %v11248_v48, %v3171_v14 }
 0x3b4   : > { %v11346_v18 = vsub.f32 %v11257_v60, %v3171_v14  ;;  %v11349_v49 = vsub.f32 %v11254_v43, %v3171_v14  ;;  %v11352_v2 = vsub.f32 %v11263_v6, %v3171_v14  ;;  %v11355_v11 = vsub.f32 %v11260_v13, %v3171_v14 }
 0x3b5   : > { %v11358_v42 = vsub.f32 %v11269_v23, %v3171_v14  ;;  %v11361_v62 = vsub.f32 %v11266_v8, %v3171_v14  ;;  %v11364_v48 = vsub.f32 %v11275_v24, %v3171_v14  ;;  %v11367_v60 = vsub.f32 %v11272_v28, %v3171_v14 }
 0x3b6   : > { %v11370_v43 = vsub.f32 %v11281_v1, %v3171_v14  ;;  %v11373_v6 = vsub.f32 %v11278_v7, %v3171_v14  ;;  %v11376_v13 = vsub.f32 %v11287_v61, %v3171_v14  ;;  %v11379_v23 = vsub.f32 %v11284_v4, %v3171_v14 }
 0x3b7   : > { %v11382_v8 = vsub.f32 %v11293_v57, %v3171_v14  ;;  %v11385_v24 = vsub.f32 %v11290_v39, %v3171_v14  ;;  %v11388_v28 = vsub.f32 %v11299_v27, %v3171_v14  ;;  %v11391_v1 = vsub.f32 %v11296_v53, %v3171_v14 }
 0x3b8   : > { %v11394_v7 = vsub.f32 %v11305_v35, %v3171_v14  ;;  %v11397_v61 = vsub.f32 %v11302_v25, %v3171_v14  ;;  %v11400_v4 = vsub.f32 %v11311_v54, %v3171_v14  ;;  %v11403_v57 = vsub.f32 %v11308_v5, %v3171_v14  ;;  %v3724_v54 = vld [vmem:[#allocation7 + $0xc0] sm:$0xff]  ;;  %v3726_v5 = vld [vmem:[#allocation7 + $0xd0] sm:$0xff] }
 0x3b9   : > { %v11405_v39 = vsub.f32 %v3083_v29, %v3171_v14  ;;  %v11408_v27 = vsub.f32 %v11314_v50, %v3171_v14  ;;  %v11410_v47 = vsub.f32 %v3093_v41, %v3171_v14  ;;  %v11413_v53 = vsub.f32 %v11317_v55, %v3171_v14 }
 0x3ba   : > { %v3204_v25 = vmul.f32 %v11322_v45, %v11322_v45  ;;  %v3205_v35 = vmul.f32 %v11325_v38, %v11325_v38  ;;  %v3206_v29 = vmul.f32 %v11328_v32, %v11328_v32  ;;  %v9193_v58 = vpack.c.bf16 %v3725_v63, %v3724_v54 }
 0x3bb   : > { %v9197_v41 = vpack.c.bf16 %v3727_v9, %v3726_v5  ;;  %v3207_v55 = vmul.f32 %v11331_v51, %v11331_v51  ;;  %v3208_v30 = vmul.f32 %v11334_v26, %v11334_v26  ;;  %v3209_v36 = vmul.f32 %v11337_v37, %v11337_v37 }
 0x3bc   : > { %v3236_v50 = vadd.f32 %v3205_v35, %v3204_v25  ;;  %9194 = vmatprep.subr.bf16.mxu1 %v9193_v58  ;;  %v3210_v10 = vmul.f32 %v11340_v15, %v11340_v15  ;;  %v3211_v34 = vmul.f32 %v11343_v56, %v11343_v56  ;;  %v3212_v16 = vmul.f32 %v11346_v18, %v11346_v18 }
 0x3bd   : > { %9196 = vmatpush3.bf16.msra.mxu1 %v9193_v58  ;;  %v11433_v14 = vpack.c.bf16 %v3565_v33, %v3564_v0  ;;  %v3213_v21 = vmul.f32 %v11349_v49, %v11349_v49  ;;  %v3214_v35 = vmul.f32 %v11352_v2, %v11352_v2  ;;  %v3215_v63 = vmul.f32 %v11355_v11, %v11355_v11 }
 0x3be   : > { %v3237_v59 = vadd.f32 %v3236_v50, %v3206_v29  ;;  %9198 = vmatprep.subr.bf16.mxu1 %v9197_v41  ;;  %v3216_v9 = vmul.f32 %v11358_v42, %v11358_v42  ;;  %v3217_v50 = vmul.f32 %v11361_v62, %v11361_v62  ;;  %v3219_v40 = vmul.f32 %v11367_v60, %v11367_v60 }
 0x3bf   : > { %v3222_v31 = vmul.f32 %v11376_v13, %v11376_v13  ;;  %v3226_v33 = vmul.f32 %v11388_v28, %v11388_v28 }
 0x3c0   : > { %v3238_v52 = vadd.f32 %v3237_v59, %v3207_v55  ;;  %v3220_v59 = vmul.f32 %v11370_v43, %v11370_v43 }
 0x3c1   : > { %9200 = vmatpush3.bf16.msra.mxu1 %v9197_v41  ;;  %v3218_v41 = vmul.f32 %v11364_v48, %v11364_v48 }
 0x3c2   : > { %v3239_v20 = vadd.f32 %v3238_v52, %v3208_v30  ;;  %9202 = vmatprep.subr.bf16.mxu1 %v9201_v19  ;;  %v3221_v52 = vmul.f32 %v11373_v6, %v11373_v6 }
 0x3c4   : > { %v3240_v46 = vadd.f32 %v3239_v20, %v3209_v36  ;;  %v3223_v36 = vmul.f32 %v11379_v23, %v11379_v23 }
 0x3c5   : > { %9204 = vmatpush3.bf16.msra.mxu1 %v9201_v19 }
 0x3c6   : > { %v3241_v17 = vadd.f32 %v3240_v46, %v3210_v10  ;;  %9206 = vmatprep.subr.bf16.mxu1 %v9205_v44  ;;  %v3224_v10 = vmul.f32 %v11382_v8, %v11382_v8 }
 0x3c8   : > { %v3242_v12 = vadd.f32 %v3241_v17, %v3211_v34  ;;  %v3227_v17 = vmul.f32 %v11391_v1, %v11391_v1 }
 0x3c9   : > { %9208 = vmatpush3.bf16.msra.mxu1 %v9205_v44  ;;  %v3225_v44 = vmul.f32 %v11385_v24, %v11385_v24 }
 0x3ca   : > { %v3243_v25 = vadd.f32 %v3242_v12, %v3212_v16  ;;  %9210 = vmatprep.subr.bf16.mxu1 %v11433_v14  ;;  %v3228_v12 = vmul.f32 %v11394_v7, %v11394_v7 }
 0x3cc   : > { %v3244_v54 = vadd.f32 %v3243_v25, %v3213_v21  ;;  %v3229_v25 = vmul.f32 %v11397_v61, %v11397_v61 }
 0x3ce   : > { %v3245_v5 = vadd.f32 %v3244_v54, %v3214_v35  ;;  %v3230_v54 = vmul.f32 %v11400_v4, %v11400_v4 }
 0x3d0   : > { %v3246_v29 = vadd.f32 %v3245_v5, %v3215_v63  ;;  %v3231_v5 = vmul.f32 %v11403_v57, %v11403_v57 }
 0x3d2   : > { %v3247_v58 = vadd.f32 %v3246_v29, %v3216_v9  ;;  %v3232_v29 = vmul.f32 %v11405_v39, %v11405_v39 }
 0x3d4   : > { %v3248_v3 = vadd.f32 %v3247_v58, %v3217_v50  ;;  %v3233_v58 = vmul.f32 %v11408_v27, %v11408_v27 }
 0x3d6   : > { %v3249_v55 = vadd.f32 %v3248_v3, %v3218_v41 }
 0x3d8   : > { %v3250_v30 = vadd.f32 %v3249_v55, %v3219_v40  ;;  %v3234_v40 = vmul.f32 %v11410_v47, %v11410_v47 }
 0x3da   : > { %v3251_v19 = vadd.f32 %v3250_v30, %v3220_v59  ;;  %v3235_v59 = vmul.f32 %v11413_v53, %v11413_v53 }
 0x3dc   : > { %v3252_v22 = vadd.f32 %v3251_v19, %v3221_v52 }
 0x3de   : > { %v3253_v20 = vadd.f32 %v3252_v22, %v3222_v31 }
 0x3e0   : > { %v3254_v46 = vadd.f32 %v3253_v20, %v3223_v36 }
 0x3e2   : > { %v3255_v0 = vadd.f32 %v3254_v46, %v3224_v10 }
 0x3e4   : > { %v3256_v34 = vadd.f32 %v3255_v0, %v3225_v44 }
 0x3e6   : > { %v3257_v16 = vadd.f32 %v3256_v34, %v3226_v33 }
 0x3e8   : > { %v3258_v21 = vadd.f32 %v3257_v16, %v3227_v17 }
 0x3ea   : > { %v3259_v35 = vadd.f32 %v3258_v21, %v3228_v12  ;;  %v3566_v21 = vld [vmem:[#allocation7 + $0x10] sm:$0xff] }
 0x3ec   : > { %v3260_v63 = vadd.f32 %v3259_v35, %v3229_v25  ;;  %v3567_v35 = vld [vmem:[#allocation7 + $0x18] sm:$0xff] }
 0x3ee   : > { %v3261_v9 = vadd.f32 %v3260_v63, %v3230_v54  ;;  %v3568_v54 = vld [vmem:[#allocation7 + $0x20] sm:$0xff]  ;;  %v3569_v63 = vld [vmem:[#allocation7 + $0x28] sm:$0xff] }
 0x3f0   : > { %v3262_v50 = vadd.f32 %v3261_v9, %v3231_v5  ;;  %v3570_v9 = vld [vmem:[#allocation7 + $0x30] sm:$0xff] }
 0x3f2   : > { %v3263_v41 = vadd.f32 %v3262_v50, %v3232_v29  ;;  %v3571_v29 = vld [vmem:[#allocation7 + $0x38] sm:$0xff] }
 0x3f4   : > { %v3264_v3 = vadd.f32 %v3263_v41, %v3233_v58  ;;  %v3573_v41 = vld [vmem:[#allocation7 + $0x48] sm:$0xff] }
 0x3f6   : > { %v3265_v55 = vadd.f32 %v3264_v3, %v3234_v40  ;;  %v11496_v3 = vpack.c.bf16 %v3567_v35, %v3566_v21  ;;  %v11498_v40 = vpack.c.bf16 %v3569_v63, %v3568_v54 }
 0x3f8   : > { %v3266_v30 = vadd.f32 %v3265_v55, %v3235_v59 }
 0x3fa   : > { %v3267_v52 = vrot.slane %v3266_v30, 4 }
 0x3fc   : > { %v3268_v19 = vadd.f32 %v3267_v52, %v3266_v30  ;;  %v11506_v30 = vpack.c.bf16 %v3571_v29, %v3570_v9  ;;  %v3575_v52 = vld [vmem:[#allocation7 + $0x58] sm:$0xff] }
 0x3fe   : > { %v3269_v31 = vrot.slane %v3268_v19, 2 }
 0x400   : > { %v3270_v22 = vadd.f32 %v3269_v31, %v3268_v19 }
 0x402   : > { %v3271_v36 = vrot.slane %v3270_v22, 1 }
 0x404   : > { %v3272_v20 = vadd.f32 %v3271_v36, %v3270_v22 }
 0x406   : > { %v3273_v10 = vmul.f32 0.00390625, %v3272_v20 }
 0x408   : > { %v3274_v46 = vadd.f32 1e-05, %v3273_v10 }
 0x40a   : > { %10048 = vrsqrt.f32 %v3274_v46 }
 0x414   : > { %v11482_v44 = vpop.eup %10048 }
 0x415   : > { %v3278_v0 = vmul.f32 %v11482_v44, %v11328_v32  ;;  %v3279_v33 = vmul.f32 %v11482_v44, %v11331_v51  ;;  %v3276_v34 = vmul.f32 %v11482_v44, %v11322_v45  ;;  %v3277_v17 = vmul.f32 %v11482_v44, %v11325_v38  ;;  %v3572_v38 = vld [vmem:[#allocation7 + $0x40] sm:$0xff] }
 0x416   : > { %v3280_v25 = vmul.f32 %v11482_v44, %v11334_v26  ;;  %v3281_v51 = vmul.f32 %v11482_v44, %v11337_v37  ;;  %v3282_v26 = vmul.f32 %v11482_v44, %v11340_v15  ;;  %v11504_v55 = vmul.f32 %v11482_v44, %v11343_v56  ;;  %v3574_v37 = vld [vmem:[#allocation7 + $0x50] sm:$0xff] }
 0x417   : > { %v3310_v16 = vmax.f32 %v3278_v0, 0.0  ;;  %v3311_v12 = vmax.f32 %v3279_v33, 0.0  ;;  %v3308_v5 = vmax.f32 %v3276_v34, 0.0  ;;  %v3309_v32 = vmax.f32 %v3277_v17, 0.0 }
 0x418   : > { %v3312_v59 = vmax.f32 %v3280_v25, 0.0  ;;  %v11508_v36 = vpack.c.bf16 %v3573_v41, %v3572_v38  ;;  %v3313_v20 = vmax.f32 %v3281_v51, 0.0  ;;  %v3284_v56 = vmul.f32 %v11482_v44, %v11346_v18 }
 0x419   : > { %v3356_v45 = vrot.slane %v3310_v16, 1  ;;  %v3404_v50 = vrot.slane %v3310_v16, 7  ;;  %v3405_v58 = vrot.slane %v3311_v12, 7  ;;  %v3407_v19 = vrot.slane %v3308_v5, 7 }
 0x41a   : > { %v3408_v31 = vrot.slane %v3309_v32, 7  ;;  %v3500_v22 = vrot.slane %v3311_v12, 5  ;;  %v3357_v10 = vrot.slane %v3308_v5, 1  ;;  %v11520_v0 = vmul.f32 %v11482_v44, %v11349_v49 }
 0x41b   : > { %v11511_v46 = vsel %vm314_vm0, %v3404_v50, %v3405_v58  ;;  %v11514_v15 = vsel %vm314_vm0, %v3356_v45, %v3404_v50  ;;  %v3501_v33 = vrot.slane %v3309_v32, 5  ;;  %v11522_v34 = vpack.c.bf16 %v3575_v52, %v3574_v37  ;;  %v3576_v50 = vld [vmem:[#allocation7 + $0x60] sm:$0xff] }
 0x41c   : > { %v3314_v17 = vmax.f32 %v3282_v26, 0.0  ;;  %v3315_v16 = vmax.f32 %v11504_v55, 0.0  ;;  %v3358_v12 = vrot.slane %v3312_v59, 1  ;;  %v3410_v21 = vrot.slane %v3312_v59, 7  ;;  %v3577_v26 = vld [vmem:[#allocation7 + $0x68] sm:$0xff]  ;;  %v3578_v55 = vld [vmem:[#allocation7 + $0x70] sm:$0xff] }
 0x41d   : > { %v3610_v25 = vrot.slane %v11514_v15, 1  ;;  %v3611_v35 = vrot.slane %v11511_v46, 1  ;;  %v11528_v54 = vsel %vm314_vm0, %v3405_v58, %v3500_v22  ;;  %v11531_v18 = vsel %vm314_vm0, %v3407_v19, %v3408_v31  ;;  %v3579_v59 = vld [vmem:[#allocation7 + $0x78] sm:$0xff] }
 0x41e   : > { %v3411_v49 = vrot.slane %v3313_v20, 7  ;;  %v3613_v63 = vrot.slane %v11528_v54, 1  ;;  %v11535_v5 = vsel %vm314_vm0, %v3357_v10, %v3407_v19  ;;  %v3616_v32 = vrot.slane %v11531_v18, 1 }
 0x41f   : > { %v3286_v9 = vmul.f32 %v11482_v44, %v11352_v2  ;;  %v11541_v29 = vsel %vm521_vm1, %v3610_v25, %v3611_v35  ;;  %v3615_v51 = vrot.slane %v11535_v5, 1  ;;  %v11545_v45 = vsel %vm314_vm0, %v3408_v31, %v3501_v33 }
 0x420   : > { %13016 = vst [vmem:[#allocation44_spill] sm:$0xff] %v11541_v29  ;;  %v11549_v58 = vmul.f32 %v11482_v44, %v11355_v11  ;;  %v3316_v38 = vmax.f32 %v3284_v56, 0.0  ;;  %8201 = vmatprep.mubr.f32.mxu1 %v11541_v29  ;;  %v11553_v41 = vsel %vm521_vm1, %v3611_v35, %v3613_v63  ;;  %v3618_v2 = vrot.slane %v11545_v45, 1  ;;  %v4289_v63 = vld [vmem:[#allocation7 + $0x108] sm:$0xff] }
 0x421   : > { %13017 = vst [vmem:[#allocation45_spill] sm:$0xff] %v11553_v41  ;;  %v3317_v37 = vmax.f32 %v11520_v0, 0.0  ;;  %v3359_v52 = vrot.slane %v3314_v17, 1  ;;  %v3502_v19 = vrot.slane %v3313_v20, 5  ;;  %8202 = vmatmul.mubr.f32.vlgmr.msra.gmra.mrb[0].mxu1 %v11553_v41  ;;  %v11559_v11 = vsel %vm521_vm1, %v3615_v51, %v3616_v32 }
 0x422   : > { %13018 = vst [vmem:[#allocation43_spill] sm:$0xff] %v11559_v11  ;;  %v11562_v31 = vsel %vm314_vm0, %v3410_v21, %v3411_v49  ;;  %v3413_v22 = vrot.slane %v3314_v17, 7  ;;  %v3414_v10 = vrot.slane %v3315_v16, 7  ;;  %v11565_v56 = vsel %vm314_vm0, %v3358_v12, %v3410_v21  ;;  %8204 = vmatprep.mubr.f32.mxu1 %v11559_v11  ;;  %9212 = vmatpush3.bf16.msra.mxu1 %v11433_v14  ;;  %v4288_v14 = vld [vmem:[#allocation7 + $0x100] sm:$0xff] }
 0x423   : > { %v3288_v20 = vmul.f32 %v11482_v44, %v11358_v42  ;;  %v11573_v0 = vmul.f32 %v11482_v44, %v11361_v62  ;;  %9214 = vmatprep.subr.bf16.mxu1 %v11496_v3  ;;  %v11576_v33 = vpack.c.bf16 %v3577_v26, %v3576_v50  ;;  %v11578_v17 = vpack.c.bf16 %v3579_v59, %v3578_v55 }
 0x424   : > { %v3318_v25 = vmax.f32 %v3286_v9, 0.0  ;;  %v3319_v12 = vmax.f32 %v11549_v58, 0.0  ;;  %v3360_v21 = vrot.slane %v3316_v38, 1  ;;  %v11582_v35 = vsel %vm521_vm1, %v3616_v32, %v3618_v2 }
 0x425   : > { %13019 = vst [vmem:[#allocation47_spill] sm:$0xff] %v11582_v35  ;;  %v3503_v42 = vrot.slane %v3315_v16, 5  ;;  %8205 = vmatmul.mubr.f32.gmra.mrb[2].mxu1 %v11582_v35  ;;  %v3620_v62 = vrot.slane %v11565_v56, 1  ;;  %v3621_v51 = vrot.slane %v11562_v31, 1  ;;  %v11588_v50 = vsel %vm314_vm0, %v3411_v49, %v3502_v19 }
 0x426   : > { %v11591_v9 = vsel %vm314_vm0, %v3413_v22, %v3414_v10  ;;  %v3416_v58 = vrot.slane %v3316_v38, 7  ;;  %v3417_v26 = vrot.slane %v3317_v37, 7  ;;  %v11594_v32 = vsel %vm314_vm0, %v3359_v52, %v3413_v22  ;;  %8207 = vmatprep.mubr.f32.mxu1 %v11541_v29  ;;  %9216 = vmatpush3.bf16.msra.mxu1 %v11496_v3 }
 0x427   : > { %v3290_v16 = vmul.f32 %v11482_v44, %v11364_v48  ;;  %v11602_v2 = vmul.f32 %v11482_v44, %v11367_v60  ;;  %v3320_v49 = vmax.f32 %v3288_v20, 0.0  ;;  %9218 = vmatprep.subr.bf16.mxu1 %v11498_v40  ;;  %v11605_v55 = vpack.c.bf16 %v4289_v63, %v4288_v14 }
 0x428   : > { %v3321_v38 = vmax.f32 %v11573_v0, 0.0  ;;  %v3361_v59 = vrot.slane %v3318_v25, 1  ;;  %v3504_v52 = vrot.slane %v3317_v37, 5  ;;  %v3623_v19 = vrot.slane %v11588_v50, 1 }
 0x429   : > { %8208 = vmatmul.mubr.f32.gmra.mrb[4].mxu1 %v11553_v41  ;;  %v11611_v3 = vsel %vm521_vm1, %v3620_v62, %v3621_v51  ;;  %v3625_v48 = vrot.slane %v11594_v32, 1  ;;  %v3626_v60 = vrot.slane %v11591_v9, 1  ;;  %v11616_v22 = vsel %vm314_vm0, %v3414_v10, %v3503_v42 }
 0x42a   : > { %13020 = vst [vmem:[#allocation48_spill] sm:$0xff] %v11611_v3  ;;  %v11619_v20 = vsel %vm314_vm0, %v3416_v58, %v3417_v26  ;;  %v3419_v0 = vrot.slane %v3318_v25, 7  ;;  %v3420_v14 = vrot.slane %v3319_v12, 7  ;;  %v11622_v37 = vsel %vm314_vm0, %v3360_v21, %v3416_v58  ;;  %8210 = vmatprep.mubr.f32.mxu1 %v11611_v3  ;;  %9220 = vmatpush3.bf16.msra.mxu1 %v11498_v40 }
 0x42b   : > { %v3292_v63 = vmul.f32 %v11482_v44, %v11370_v43  ;;  %v11630_v62 = vmul.f32 %v11482_v44, %v11373_v6  ;;  %v3322_v10 = vmax.f32 %v3290_v16, 0.0  ;;  %v3323_v42 = vmax.f32 %v11602_v2, 0.0  ;;  %9222 = vmatprep.subr.bf16.mxu1 %v11506_v30 }
 0x42c   : > { %v3362_v25 = vrot.slane %v3320_v49, 1  ;;  %v3505_v41 = vrot.slane %v3319_v12, 5  ;;  %v11635_v21 = vsel %vm521_vm1, %v3621_v51, %v3623_v19  ;;  %v3628_v58 = vrot.slane %v11616_v22, 1 }
 0x42d   : > { %13021 = vst [vmem:[#allocation49_spill] sm:$0xff] %v11635_v21  ;;  %8211 = vmatmul.mubr.f32.gmra.mrb[6].mxu1 %v11635_v21  ;;  %v11640_v43 = vsel %vm521_vm1, %v3625_v48, %v3626_v60  ;;  %v3630_v6 = vrot.slane %v11622_v37, 1  ;;  %v3631_v40 = vrot.slane %v11619_v20, 1  ;;  %v11645_v16 = vsel %vm314_vm0, %v3417_v26, %v3504_v52 }
 0x42e   : > { %13022 = vst [vmem:[#allocation50_spill] sm:$0xff] %v11640_v43  ;;  %v11648_v2 = vsel %vm314_vm0, %v3419_v0, %v3420_v14  ;;  %v3422_v12 = vrot.slane %v3320_v49, 7  ;;  %v3423_v51 = vrot.slane %v3321_v38, 7  ;;  %v11651_v19 = vsel %vm314_vm0, %v3361_v59, %v3419_v0  ;;  %8213 = vmatprep.mubr.f32.mxu1 %v11640_v43  ;;  %9224 = vmatpush3.bf16.msra.mxu1 %v11506_v30 }
 0x42f   : > { %v3294_v48 = vmul.f32 %v11482_v44, %v11376_v13  ;;  %v11659_v21 = vmul.f32 %v11482_v44, %v11379_v23  ;;  %v3324_v26 = vmax.f32 %v3292_v63, 0.0  ;;  %v3325_v52 = vmax.f32 %v11630_v62, 0.0  ;;  %9226 = vmatprep.subr.bf16.mxu1 %v11508_v36 }
 0x430   : > { %v3363_v49 = vrot.slane %v3322_v10, 1  ;;  %v3506_v3 = vrot.slane %v3321_v38, 5  ;;  %v11664_v59 = vsel %vm521_vm1, %v3626_v60, %v3628_v58  ;;  %v3633_v0 = vrot.slane %v11645_v16, 1 }
 0x431   : > { %13023 = vst [vmem:[#allocation33_spill] sm:$0xff] %v11664_v59  ;;  %8214 = vmatmul.mubr.f32.gmra.mrb[8].mxu1 %v11664_v59  ;;  %v11669_v13 = vsel %vm521_vm1, %v3630_v6, %v3631_v40  ;;  %v3635_v23 = vrot.slane %v11651_v19, 1  ;;  %v3636_v30 = vrot.slane %v11648_v2, 1  ;;  %v11674_v63 = vsel %vm314_vm0, %v3420_v14, %v3505_v41 }
 0x432   : > { %13024 = vst [vmem:[#allocation37_spill] sm:$0xff] %v11669_v13  ;;  %v11677_v62 = vsel %vm314_vm0, %v3422_v12, %v3423_v51  ;;  %v3425_v38 = vrot.slane %v3322_v10, 7  ;;  %v3426_v60 = vrot.slane %v3323_v42, 7  ;;  %v11680_v58 = vsel %vm314_vm0, %v3362_v25, %v3422_v12  ;;  %8216 = vmatprep.mubr.f32.mxu1 %v11669_v13  ;;  %9228 = vmatpush3.bf16.msra.mxu1 %v11508_v36 }
 0x433   : > { %v3296_v6 = vmul.f32 %v11482_v44, %v11382_v8  ;;  %v11688_v59 = vmul.f32 %v11482_v44, %v11385_v24  ;;  %v3326_v41 = vmax.f32 %v3294_v48, 0.0  ;;  %v3327_v14 = vmax.f32 %v11659_v21, 0.0  ;;  %9230 = vmatprep.subr.bf16.mxu1 %v11522_v34 }
 0x434   : > { %v3364_v10 = vrot.slane %v3324_v26, 1  ;;  %v3507_v43 = vrot.slane %v3323_v42, 5  ;;  %v11693_v25 = vsel %vm521_vm1, %v3631_v40, %v3633_v0  ;;  %v3638_v12 = vrot.slane %v11674_v63, 1 }
 0x435   : > { %13025 = vst [vmem:[#allocation36_spill] sm:$0xff] %v11693_v25  ;;  %8217 = vmatmul.mubr.f32.gmra.mrb[10].mxu1 %v11693_v25  ;;  %v11698_v8 = vsel %vm521_vm1, %v3635_v23, %v3636_v30  ;;  %v3640_v24 = vrot.slane %v11680_v58, 1  ;;  %v3641_v36 = vrot.slane %v11677_v62, 1  ;;  %v11703_v21 = vsel %vm314_vm0, %v3423_v51, %v3506_v3 }
 0x436   : > { %13026 = vst [vmem:[#allocation12_spill] sm:$0xff] %v11698_v8  ;;  %v11706_v48 = vsel %vm314_vm0, %v3425_v38, %v3426_v60  ;;  %v3428_v42 = vrot.slane %v3324_v26, 7  ;;  %v3429_v40 = vrot.slane %v3325_v52, 7  ;;  %v11709_v0 = vsel %vm314_vm0, %v3363_v49, %v3425_v38  ;;  %8219 = vmatprep.mubr.f32.mxu1 %v11698_v8  ;;  %9232 = vmatpush3.bf16.msra.mxu1 %v11522_v34 }
 0x437   : > { %v3298_v23 = vmul.f32 %v11482_v44, %v11388_v28  ;;  %v11717_v25 = vmul.f32 %v11482_v44, %v11391_v1  ;;  %v3328_v3 = vmax.f32 %v3296_v6, 0.0  ;;  %v3329_v51 = vmax.f32 %v11688_v59, 0.0  ;;  %9234 = vmatprep.subr.bf16.mxu1 %v11576_v33 }
 0x438   : > { %v3365_v26 = vrot.slane %v3326_v41, 1  ;;  %v3508_v13 = vrot.slane %v3325_v52, 5  ;;  %v11722_v49 = vsel %vm521_vm1, %v3636_v30, %v3638_v12  ;;  %v3643_v38 = vrot.slane %v11703_v21, 1 }
 0x439   : > { %13027 = vst [vmem:[#allocation13_spill] sm:$0xff] %v11722_v49  ;;  %8220 = vmatmul.mubr.f32.gmra.mrb[12].mxu1 %v11722_v49  ;;  %v11727_v28 = vsel %vm521_vm1, %v3640_v24, %v3641_v36  ;;  %v3645_v1 = vrot.slane %v11709_v0, 1  ;;  %v3646_v34 = vrot.slane %v11706_v48, 1  ;;  %v11732_v59 = vsel %vm314_vm0, %v3426_v60, %v3507_v43 }
 0x43a   : > { %13028 = vst [vmem:[#allocation14_spill] sm:$0xff] %v11727_v28  ;;  %v11735_v6 = vsel %vm314_vm0, %v3428_v42, %v3429_v40  ;;  %v3431_v52 = vrot.slane %v3326_v41, 7  ;;  %v3432_v30 = vrot.slane %v3327_v14, 7  ;;  %v11738_v12 = vsel %vm314_vm0, %v3364_v10, %v3428_v42  ;;  %8222 = vmatprep.mubr.f32.mxu1 %v11727_v28  ;;  %9236 = vmatpush3.bf16.msra.mxu1 %v11576_v33 }
 0x43b   : > { %v3300_v24 = vmul.f32 %v11482_v44, %v11394_v7  ;;  %v3301_v49 = vmul.f32 %v11482_v44, %v11397_v61  ;;  %v3330_v43 = vmax.f32 %v3298_v23, 0.0  ;;  %v3331_v60 = vmax.f32 %v11717_v25, 0.0  ;;  %9238 = vmatprep.subr.bf16.mxu1 %v11578_v17 }
 0x43c   : > { %v3366_v41 = vrot.slane %v3328_v3, 1  ;;  %v3509_v8 = vrot.slane %v3327_v14, 5  ;;  %v11749_v10 = vsel %vm521_vm1, %v3641_v36, %v3643_v38  ;;  %v3648_v42 = vrot.slane %v11732_v59, 1 }
 0x43d   : > { %13029 = vst [vmem:[#allocation15_spill] sm:$0xff] %v11749_v10  ;;  %8223 = vmatmul.mubr.f32.gmra.mrb[14].mxu1 %v11749_v10  ;;  %v11754_v33 = vsel %vm521_vm1, %v3645_v1, %v3646_v34  ;;  %v3650_v7 = vrot.slane %v11738_v12, 1  ;;  %v3651_v61 = vrot.slane %v11735_v6, 1  ;;  %v11759_v25 = vsel %vm314_vm0, %v3429_v40, %v3508_v13 }
 0x43e   : > { %13030 = vst [vmem:[#allocation16_spill] sm:$0xff] %v11754_v33  ;;  %v11762_v23 = vsel %vm314_vm0, %v3431_v52, %v3432_v30  ;;  %v3434_v14 = vrot.slane %v3328_v3, 7  ;;  %v3435_v36 = vrot.slane %v3329_v51, 7  ;;  %v11765_v38 = vsel %vm314_vm0, %v3365_v26, %v3431_v52  ;;  %8225 = vmatprep.mubr.f32.mxu1 %v11754_v33  ;;  %9240 = vmatpush3.bf16.msra.mxu1 %v11578_v17 }
 0x43f   : > { %v3302_v1 = vmul.f32 %v11482_v44, %v11400_v4  ;;  %v3303_v10 = vmul.f32 %v11482_v44, %v11403_v57  ;;  %v3332_v13 = vmax.f32 %v3300_v24, 0.0  ;;  %v3333_v40 = vmax.f32 %v3301_v49, 0.0  ;;  %9242 = vmatprep.subr.bf16.mxu1 %v11605_v55 }
 0x440   : > { %v3367_v28 = vrot.slane %v3330_v43, 1  ;;  %v3510_v3 = vrot.slane %v3329_v51, 5  ;;  %v11775_v29 = vsel %vm521_vm1, %v3646_v34, %v3648_v42  ;;  %v3653_v26 = vrot.slane %v11759_v25, 1 }
 0x441   : > { %13031 = vst [vmem:[#allocation17_spill] sm:$0xff] %v11775_v29  ;;  %8226 = vmatmul.mubr.f32.gmra.mrb[16].mxu1 %v11775_v29  ;;  %v11780_v17 = vsel %vm521_vm1, %v3650_v7, %v3651_v61  ;;  %v3655_v4 = vrot.slane %v11765_v38, 1  ;;  %v3656_v57 = vrot.slane %v11762_v23, 1  ;;  %v11785_v49 = vsel %vm314_vm0, %v3432_v30, %v3509_v8 }
 0x442   : > { %13032 = vst [vmem:[#allocation18_spill] sm:$0xff] %v11780_v17  ;;  %v11788_v52 = vsel %vm314_vm0, %v3434_v14, %v3435_v36  ;;  %v3437_v51 = vrot.slane %v3330_v43, 7  ;;  %v3438_v34 = vrot.slane %v3331_v60, 7  ;;  %v11791_v24 = vsel %vm314_vm0, %v3366_v41, %v3434_v14  ;;  %8228 = vmatprep.mubr.f32.mxu1 %v11780_v17 }
 0x443   : > { %v3304_v42 = vmul.f32 %v11482_v44, %v11405_v39  ;;  %v3305_v7 = vmul.f32 %v11482_v44, %v11408_v27  ;;  %v3334_v29 = vmax.f32 %v3302_v1, 0.0  ;;  %v3335_v33 = vmax.f32 %v3303_v10, 0.0 }
 0x444   : > { %v3368_v8 = vrot.slane %v3332_v13, 1  ;;  %v3511_v30 = vrot.slane %v3331_v60, 5  ;;  %v11799_v35 = vsel %vm521_vm1, %v3651_v61, %v3653_v26  ;;  %v3658_v43 = vrot.slane %v11785_v49, 1 }
 0x445   : > { %13033 = vst [vmem:[#allocation20_spill] sm:$0xff] %v11799_v35  ;;  %8229 = vmatmul.mubr.f32.gmra.mrb[18].mxu1 %v11799_v35  ;;  %v11804_v41 = vsel %vm521_vm1, %v3655_v4, %v3656_v57  ;;  %v3660_v14 = vrot.slane %v11791_v24, 1  ;;  %v3661_v39 = vrot.slane %v11788_v52, 1  ;;  %v11809_v27 = vsel %vm314_vm0, %v3435_v36, %v3510_v3 }
 0x446   : > { %13034 = vst [vmem:[#allocation22_spill] sm:$0xff] %v11804_v41  ;;  %v11812_v10 = vsel %vm314_vm0, %v3437_v51, %v3438_v34  ;;  %v3440_v60 = vrot.slane %v3332_v13, 7  ;;  %v3441_v61 = vrot.slane %v3333_v40, 7  ;;  %v11815_v1 = vsel %vm314_vm0, %v3367_v28, %v3437_v51  ;;  %8231 = vmatprep.mubr.f32.mxu1 %v11804_v41 }
 0x447   : > { %v3336_v26 = vmax.f32 %v3304_v42, 0.0  ;;  %v3337_v4 = vmax.f32 %v3305_v7, 0.0  ;;  %v3369_v35 = vrot.slane %v3334_v29, 1  ;;  %v3512_v17 = vrot.slane %v3333_v40, 5 }
 0x448   : > { %v11819_v11 = vsel %vm521_vm1, %v3656_v57, %v3658_v43  ;;  %v3663_v36 = vrot.slane %v11809_v27, 1  ;;  %v11824_v3 = vsel %vm521_vm1, %v3660_v14, %v3661_v39  ;;  %v3665_v13 = vrot.slane %v11815_v1, 1 }
 0x449   : > { %13035 = vst [vmem:[#allocation23_spill] sm:$0xff] %v11819_v11  ;;  %8232 = vmatmul.mubr.f32.gmra.mrb[20].mxu1 %v11819_v11  ;;  %13036 = vst [vmem:[#allocation24_spill] sm:$0xff] %v11824_v3  ;;  %v3666_v28 = vrot.slane %v11812_v10, 1  ;;  %v11829_v51 = vsel %vm314_vm0, %v3438_v34, %v3511_v30  ;;  %v11832_v42 = vsel %vm314_vm0, %v3440_v60, %v3441_v61  ;;  %v3443_v40 = vrot.slane %v3334_v29, 7 }
 0x44a   : > { %13037 = vst [vmem:[#allocation25_spill] sm:$0xff] %v11832_v42  ;;  %v3444_v57 = vrot.slane %v3335_v33, 7  ;;  %v11835_v7 = vsel %vm314_vm0, %v3368_v8, %v3440_v60  ;;  %8234 = vmatprep.mubr.f32.mxu1 %v11824_v3  ;;  %v3370_v43 = vrot.slane %v3336_v26, 1  ;;  %v3513_v14 = vrot.slane %v3335_v33, 5 }
 0x44b   : > { %v11839_v11 = vsel %vm521_vm1, %v3661_v39, %v3663_v36  ;;  %v3668_v41 = vrot.slane %v11829_v51, 1  ;;  %v11844_v34 = vsel %vm521_vm1, %v3665_v13, %v3666_v28  ;;  %v3670_v29 = vrot.slane %v11835_v7, 1 }
 0x44c   : > { %13038 = vst [vmem:[#allocation26_spill] sm:$0xff] %v11839_v11  ;;  %13039 = vst [vmem:[#allocation27_spill] sm:$0xff] %v11844_v34  ;;  %v3671_v30 = vrot.slane %v11832_v42, 1  ;;  %v11849_v8 = vsel %vm314_vm0, %v3441_v61, %v3512_v17  ;;  %v11852_v60 = vsel %vm314_vm0, %v3443_v40, %v3444_v57  ;;  %v3446_v33 = vrot.slane %v3336_v26, 7 }
 0x44d   : > { %8235 = vmatmul.mubr.f32.gmra.mrb[22].mxu1 %v11839_v11  ;;  %13040 = vst [vmem:[#allocation28_spill] sm:$0xff] %v11852_v60  ;;  %v3447_v39 = vrot.slane %v3337_v4, 7  ;;  %v11855_v36 = vsel %vm314_vm0, %v3369_v35, %v3443_v40  ;;  %v3514_v11 = vrot.slane %v3337_v4, 5  ;;  %v11859_v13 = vsel %vm521_vm1, %v3666_v28, %v3668_v41 }
 0x44e   : > { %13041 = vst [vmem:[#allocation29_spill] sm:$0xff] %v11855_v36  ;;  %8237 = vmatprep.mubr.f32.mxu1 %v11844_v34  ;;  %13042 = vst [vmem:[#allocation30_spill] sm:$0xff] %v11859_v13  ;;  %v3673_v3 = vrot.slane %v11849_v8, 1  ;;  %v11864_v17 = vsel %vm521_vm1, %v3670_v29, %v3671_v30  ;;  %v3675_v61 = vrot.slane %v11855_v36, 1  ;;  %v3676_v26 = vrot.slane %v11852_v60, 1 }
 0x44f   : > { %13043 = vst [vmem:[#allocation31_spill] sm:$0xff] %v11864_v17  ;;  %v11869_v35 = vsel %vm314_vm0, %v3444_v57, %v3513_v14  ;;  %v11872_v40 = vsel %vm314_vm0, %v3446_v33, %v3447_v39  ;;  %v11875_v41 = vsel %vm314_vm0, %v3370_v43, %v3446_v33 }
 0x450   : > { %13044 = vst [vmem:[#allocation32_spill] sm:$0xff] %v11872_v40  ;;  %13045 = vst [vmem:[#allocation34_spill] sm:$0xff] %v11875_v41  ;;  %v11879_v4 = vsel %vm521_vm1, %v3671_v30, %v3673_v3  ;;  %v3678_v28 = vrot.slane %v11869_v35, 1  ;;  %v11884_v29 = vsel %vm521_vm1, %v3675_v61, %v3676_v26  ;;  %v3680_v57 = vrot.slane %v11875_v41, 1  ;;  %v4290_v61 = vld [vmem:[#allocation7 + $0x110] sm:$0xff] }
 0x451   : > { %8238 = vmatmul.mubr.f32.gmra.mrb[24].mxu1 %v11859_v13  ;;  %13046 = vst [vmem:[#allocation35_spill] sm:$0xff] %v11879_v4  ;;  %13047 = vst [vmem:[#allocation38_spill] sm:$0xff] %v11884_v29  ;;  %v3681_v14 = vrot.slane %v11872_v40, 1  ;;  %v11889_v13 = vsel %vm314_vm0, %v3447_v39, %v3514_v11  ;;  %v4291_v11 = vld [vmem:[#allocation7 + $0x118] sm:$0xff] }
 0x452   : > { %8240 = vmatprep.mubr.f32.mxu1 %v11864_v17  ;;  %v11893_v43 = vsel %vm521_vm1, %v3676_v26, %v3678_v28  ;;  %v3683_v3 = vrot.slane %v11889_v13, 1  ;;  %v9245_v39 = vpack.c.bf16 %v4291_v11, %v4290_v61  ;;  %v4292_v26 = vld [vmem:[#allocation7 + $0x120] sm:$0xff]  ;;  %v4293_v28 = vld [vmem:[#allocation7 + $0x128] sm:$0xff] }
 0x453   : > { %13048 = vst [vmem:[#allocation39_spill] sm:$0xff] %v11893_v43  ;;  %v11898_v30 = vsel %vm521_vm1, %v3680_v57, %v3681_v14  ;;  %v9249_v57 = vpack.c.bf16 %v4293_v28, %v4292_v26  ;;  %v4296_v61 = vld [vmem:[#allocation7 + $0x140] sm:$0xff]  ;;  %v4297_v11 = vld [vmem:[#allocation7 + $0x148] sm:$0xff]  ;;  %v4299_v26 = vld [vmem:[#allocation7 + $0x158] sm:$0xff] }
 0x454   : > { %13049 = vst [vmem:[#allocation40_spill] sm:$0xff] %v11898_v30  ;;  %v11902_v33 = vsel %vm521_vm1, %v3681_v14, %v3683_v3  ;;  %v4295_v14 = vld [vmem:[#allocation7 + $0x138] sm:$0xff]  ;;  %v4300_v28 = vld [vmem:[#allocation7 + $0x160] sm:$0xff] }
 0x455   : > { %8241 = vmatmul.mubr.f32.gmra.mrb[26].mxu1 %v11879_v4  ;;  %13050 = vst [vmem:[#allocation41_spill] sm:$0xff] %v11902_v33 }
 0x456   : > { %8243 = vmatprep.mubr.f32.mxu1 %v11884_v29  ;;  %v4567_v29 = vld [vmem:[#allocation7 + $0x1a8] sm:$0xff] }
 0x459   : > { %8244 = vmatmul.mubr.f32.gmra.mrb[28].mxu1 %v11893_v43  ;;  %v4190_v43 = vrot.slane %v11545_v45, 2  ;;  %v4192_v45 = vrot.slane %v11565_v56, 2 }
 0x45a   : > { %8246 = vmatprep.mubr.f32.mxu1 %v11898_v30  ;;  %v4294_v30 = vld [vmem:[#allocation7 + $0x130] sm:$0xff] }
 0x45b   : > { %v9253_v3 = vpack.c.bf16 %v4295_v14, %v4294_v30  ;;  %v4301_v30 = vld [vmem:[#allocation7 + $0x168] sm:$0xff]  ;;  %v4302_v14 = vld [vmem:[#allocation7 + $0x170] sm:$0xff] }
 0x45d   : > { %8247 = vmatmul.mubr.f32.gmra.mrb[30].mxu1 %v11902_v33  ;;  %v4298_v33 = vld [vmem:[#allocation7 + $0x150] sm:$0xff] }
 0x45e   : > { %8281 = vmatprep.mubr.f32.mxu1 %v11514_v15 }
 0x461   : > { %8282 = vmatmul.mubr.f32.vlgmr.msra.gmra.mrb[0].mxu1 %v11511_v46 }
 0x462   : > { %8284 = vmatprep.mubr.f32.mxu1 %v11535_v5  ;;  %9244 = vmatpush3.bf16.msra.mxu1 %v11605_v55  ;;  %v9257_v55 = vpack.c.bf16 %v4297_v11, %v4296_v61  ;;  %v4303_v61 = vld [vmem:[#allocation7 + $0x178] sm:$0xff]  ;;  %v4562_v11 = vld [vmem:[#allocation7 + $0x180] sm:$0xff] }
 0x463   : > { %9246 = vmatprep.subr.bf16.mxu1 %v9245_v39 }
 0x465   : > { %8285 = vmatmul.mubr.f32.gmra.mrb[2].mxu1 %v11531_v18 }
 0x466   : > { %8287 = vmatprep.mubr.f32.mxu1 %v11514_v15  ;;  %9248 = vmatpush3.bf16.msra.mxu1 %v9245_v39  ;;  %v9261_v39 = vpack.c.bf16 %v4299_v26, %v4298_v33  ;;  %v4563_v33 = vld [vmem:[#allocation7 + $0x188] sm:$0xff]  ;;  %v4182_v26 = vrot.slane %v11514_v15, 2 }
 0x467   : > { %9250 = vmatprep.subr.bf16.mxu1 %v9249_v57 }
 0x469   : > { %8288 = vmatmul.mubr.f32.gmra.mrb[4].mxu1 %v11511_v46 }
 0x46a   : > { %8290 = vmatprep.mubr.f32.mxu1 %v11565_v56  ;;  %9252 = vmatpush3.bf16.msra.mxu1 %v9249_v57  ;;  %v9265_v57 = vpack.c.bf16 %v4301_v30, %v4300_v28  ;;  %v4185_v28 = vrot.slane %v11528_v54, 2  ;;  %v4564_v30 = vld [vmem:[#allocation7 + $0x190] sm:$0xff]  ;;  %v4566_v54 = vld [vmem:[#allocation7 + $0x1a0] sm:$0xff] }
 0x46b   : > { %9254 = vmatprep.subr.bf16.mxu1 %v9253_v3 }
 0x46d   : > { %8291 = vmatmul.mubr.f32.gmra.mrb[6].mxu1 %v11562_v31 }
 0x46e   : > { %8293 = vmatprep.mubr.f32.mxu1 %v11594_v32  ;;  %9256 = vmatpush3.bf16.msra.mxu1 %v9253_v3  ;;  %v9269_v3 = vpack.c.bf16 %v4303_v61, %v4302_v14  ;;  %v4187_v61 = vrot.slane %v11535_v5, 2 }
 0x46f   : > { %9258 = vmatprep.subr.bf16.mxu1 %v9257_v55 }
 0x471   : > { %8294 = vmatmul.mubr.f32.gmra.mrb[8].mxu1 %v11591_v9 }
 0x472   : > { %8296 = vmatprep.mubr.f32.mxu1 %v11622_v37  ;;  %9260 = vmatpush3.bf16.msra.mxu1 %v9257_v55  ;;  %v9273_v55 = vpack.c.bf16 %v4563_v33, %v4562_v11 }
 0x473   : > { %9262 = vmatprep.subr.bf16.mxu1 %v9261_v39 }
 0x475   : > { %8297 = vmatmul.mubr.f32.gmra.mrb[10].mxu1 %v11619_v20 }
 0x476   : > { %8299 = vmatprep.mubr.f32.mxu1 %v11651_v19  ;;  %9264 = vmatpush3.bf16.msra.mxu1 %v9261_v39  ;;  %v4183_v39 = vrot.slane %v11511_v46, 2 }
 0x477   : > { %9266 = vmatprep.subr.bf16.mxu1 %v9265_v57 }
 0x478   : > { %v11942_v14 = vsel %vm1094_vm2, %v4182_v26, %v4183_v39  ;;  %v11948_v33 = vsel %vm1094_vm2, %v4183_v39, %v4185_v28  ;;  %v9281_v26 = vpack.c.bf16 %v4567_v29, %v4566_v54  ;;  %v4569_v39 = vld [vmem:[#allocation7 + $0x1b8] sm:$0xff]  ;;  %v4193_v28 = vrot.slane %v11562_v31, 2  ;;  %v4571_v29 = vld [vmem:[#allocation7 + $0x1c8] sm:$0xff] }
 0x479   : > { %8300 = vmatmul.mubr.f32.gmra.mrb[12].mxu1 %v11648_v2  ;;  %13051 = vst [vmem:[#allocation42_spill] sm:$0xff] %v11942_v14  ;;  %13052 = vst [vmem:[#allocation19_spill] sm:$0xff] %v11948_v33  ;;  %v4198_v54 = vrot.slane %v11591_v9, 2 }
 0x47a   : > { %8302 = vmatprep.mubr.f32.mxu1 %v11680_v58  ;;  %9268 = vmatpush3.bf16.msra.mxu1 %v9265_v57  ;;  %v4565_v57 = vld [vmem:[#allocation7 + $0x198] sm:$0xff] }
 0x47b   : > { %9270 = vmatprep.subr.bf16.mxu1 %v9269_v3  ;;  %v9277_v11 = vpack.c.bf16 %v4565_v57, %v4564_v30  ;;  %v4568_v30 = vld [vmem:[#allocation7 + $0x1b0] sm:$0xff] }
 0x47c   : > { %v9285_v57 = vpack.c.bf16 %v4569_v39, %v4568_v30  ;;  %v4572_v39 = vld [vmem:[#allocation7 + $0x1d0] sm:$0xff] }
 0x47d   : > { %8303 = vmatmul.mubr.f32.gmra.mrb[14].mxu1 %v11677_v62 }
 0x47e   : > { %8305 = vmatprep.mubr.f32.mxu1 %v11709_v0  ;;  %9272 = vmatpush3.bf16.msra.mxu1 %v9269_v3  ;;  %v4188_v3 = vrot.slane %v11531_v18, 2 }
 0x47f   : > { %9274 = vmatprep.subr.bf16.mxu1 %v9273_v55 }
 0x480   : > { %v11953_v4 = vsel %vm1094_vm2, %v4187_v61, %v4188_v3  ;;  %v11957_v17 = vsel %vm1094_vm2, %v4188_v3, %v4190_v43  ;;  %v4570_v61 = vld [vmem:[#allocation7 + $0x1c0] sm:$0xff]  ;;  %v11966_v43 = vsel %vm1094_vm2, %v4192_v45, %v4193_v28  ;;  %v4197_v3 = vrot.slane %v11594_v32, 2 }
 0x481   : > { %8306 = vmatmul.mubr.f32.gmra.mrb[16].mxu1 %v11706_v48  ;;  %13053 = vst [vmem:[#allocation46_spill] sm:$0xff] %v11957_v17  ;;  %13054 = vst [vmem:[#allocation51_spill] sm:$0xff] %v11966_v43 }
 0x482   : > { %8308 = vmatprep.mubr.f32.mxu1 %v11738_v12  ;;  %v11977_v45 = vsel %vm1094_vm2, %v4197_v3, %v4198_v54  ;;  %v4207_v3 = vrot.slane %v11651_v19, 2 }
 0x483   : > { %13056 = vst [vmem:[#allocation53_spill] sm:$0xff] %v11977_v45 }
 0x485   : > { %8309 = vmatmul.mubr.f32.gmra.mrb[18].mxu1 %v11735_v6 }
 0x486   : > { %8311 = vmatprep.mubr.f32.mxu1 %v11765_v38 }
 0x489   : > { %8312 = vmatmul.mubr.f32.gmra.mrb[20].mxu1 %v11762_v23 }
 0x48a   : > { %8314 = vmatprep.mubr.f32.mxu1 %v11791_v24 }
 0x48d   : > { %8315 = vmatmul.mubr.f32.gmra.mrb[22].mxu1 %v11788_v52 }
 0x48e   : > { %8317 = vmatprep.mubr.f32.mxu1 %v11815_v1 }
 0x491   : > { %8318 = vmatmul.mubr.f32.gmra.mrb[24].mxu1 %v11812_v10 }
 0x492   : > { %8320 = vmatprep.mubr.f32.mxu1 %v11835_v7 }
 0x495   : > { %8321 = vmatmul.mubr.f32.gmra.mrb[26].mxu1 %v11832_v42 }
 0x496   : > { %8323 = vmatprep.mubr.f32.mxu1 %v11855_v36 }
 0x499   : > { %8324 = vmatmul.mubr.f32.gmra.mrb[28].mxu1 %v11852_v60 }
 0x49a   : > { %8326 = vmatprep.mubr.f32.mxu1 %v11875_v41 }
 0x49d   : > { %8327 = vmatmul.mubr.f32.gmra.mrb[30].mxu1 %v11872_v40 }
 0x49e   : > { %8361 = vmatprep.mubr.f32.mxu1 %v11942_v14 }
 0x4a1   : > { %8362 = vmatmul.mubr.f32.vlgmr.msra.gmra.mrb[0].mxu1 %v11948_v33 }
 0x4a2   : > { %8364 = vmatprep.mubr.f32.mxu1 %v11953_v4  ;;  %9276 = vmatpush3.bf16.msra.mxu1 %v9273_v55  ;;  %v4195_v55 = vrot.slane %v11588_v50, 2  ;;  %v4200_v50 = vrot.slane %v11616_v22, 2  ;;  %v4205_v22 = vrot.slane %v11645_v16, 2  ;;  %v4210_v16 = vrot.slane %v11674_v63, 2 }
 0x4a3   : > { %9278 = vmatprep.subr.bf16.mxu1 %v9277_v11  ;;  %v4215_v63 = vrot.slane %v11703_v21, 2  ;;  %v4220_v21 = vrot.slane %v11732_v59, 2 }
 0x4a4   : > { %v11972_v30 = vsel %vm1094_vm2, %v4193_v28, %v4195_v55  ;;  %v11983_v28 = vsel %vm1094_vm2, %v4198_v54, %v4200_v50  ;;  %v4574_v55 = vld [vmem:[#allocation7 + $0x1e0] sm:$0xff]  ;;  %v4576_v54 = vld [vmem:[#allocation7 + $0x1f0] sm:$0xff]  ;;  %v4577_v50 = vld [vmem:[#allocation7 + $0x1f8] sm:$0xff] }
 0x4a5   : > { %8365 = vmatmul.mubr.f32.gmra.mrb[2].mxu1 %v11957_v17  ;;  %13055 = vst [vmem:[#allocation52_spill] sm:$0xff] %v11972_v30  ;;  %v4203_v17 = vrot.slane %v11619_v20, 2  ;;  %13057 = vst [vmem:[#allocation54_spill] sm:$0xff] %v11983_v28 }
 0x4a6   : > { %8367 = vmatprep.mubr.f32.mxu1 %v11942_v14  ;;  %9280 = vmatpush3.bf16.msra.mxu1 %v9277_v11  ;;  %v9289_v11 = vpack.c.bf16 %v4571_v29, %v4570_v61  ;;  %v4573_v14 = vld [vmem:[#allocation7 + $0x1d8] sm:$0xff]  ;;  %v4575_v61 = vld [vmem:[#allocation7 + $0x1e8] sm:$0xff] }
 0x4a7   : > { %9282 = vmatprep.subr.bf16.mxu1 %v9281_v26 }
 0x4a9   : > { %8368 = vmatmul.mubr.f32.gmra.mrb[4].mxu1 %v11948_v33  ;;  %v4202_v33 = vrot.slane %v11622_v37, 2 }
 0x4aa   : > { %8370 = vmatprep.mubr.f32.mxu1 %v11966_v43  ;;  %9284 = vmatpush3.bf16.msra.mxu1 %v9281_v26  ;;  %v9293_v26 = vpack.c.bf16 %v4573_v14, %v4572_v39  ;;  %v9297_v14 = vpack.c.bf16 %v4575_v61, %v4574_v55  ;;  %v4212_v39 = vrot.slane %v11680_v58, 2  ;;  %v4846_v55 = vld [vmem:[#allocation7 + $0x208] sm:$0xff] }
 0x4ab   : > { %9286 = vmatprep.subr.bf16.mxu1 %v9285_v57  ;;  %v11988_v29 = vsel %vm1094_vm2, %v4202_v33, %v4203_v17 }
 0x4ad   : > { %8371 = vmatmul.mubr.f32.gmra.mrb[6].mxu1 %v11972_v30  ;;  %v4208_v30 = vrot.slane %v11648_v2, 2 }
 0x4ae   : > { %8373 = vmatprep.mubr.f32.mxu1 %v11977_v45  ;;  %9288 = vmatpush3.bf16.msra.mxu1 %v9285_v57  ;;  %v11994_v57 = vsel %vm1094_vm2, %v4203_v17, %v4205_v22  ;;  %v4845_v22 = vld [vmem:[#allocation7 + $0x200] sm:$0xff] }
 0x4af   : > { %9290 = vmatprep.subr.bf16.mxu1 %v9289_v11  ;;  %13058 = vst [vmem:[#allocation55_spill] sm:$0xff] %v11994_v57  ;;  %v11999_v33 = vsel %vm1094_vm2, %v4207_v3, %v4208_v30  ;;  %v12005_v17 = vsel %vm1094_vm2, %v4208_v30, %v4210_v16  ;;  %v4217_v3 = vrot.slane %v11709_v0, 2 }
 0x4b1   : > { %8374 = vmatmul.mubr.f32.gmra.mrb[8].mxu1 %v11983_v28  ;;  %v4213_v28 = vrot.slane %v11677_v62, 2 }
 0x4b2   : > { %8376 = vmatprep.mubr.f32.mxu1 %v11988_v29  ;;  %9292 = vmatpush3.bf16.msra.mxu1 %v9289_v11  ;;  %v9301_v11 = vpack.c.bf16 %v4577_v50, %v4576_v54  ;;  %v4222_v54 = vrot.slane %v11738_v12, 2  ;;  %v4223_v50 = vrot.slane %v11735_v6, 2 }
 0x4b3   : > { %9294 = vmatprep.subr.bf16.mxu1 %v9293_v26  ;;  %v12010_v61 = vsel %vm1094_vm2, %v4212_v39, %v4213_v28  ;;  %v12018_v30 = vsel %vm1094_vm2, %v4213_v28, %v4215_v63  ;;  %v4225_v28 = vrot.slane %v11759_v25, 2  ;;  %v4227_v39 = vrot.slane %v11765_v38, 2 }
 0x4b4   : > { %v12035_v59 = vsel %vm1094_vm2, %v4222_v54, %v4223_v50  ;;  %v4228_v63 = vrot.slane %v11762_v23, 2  ;;  %v4237_v54 = vrot.slane %v11815_v1, 2 }
 0x4b5   : > { %8377 = vmatmul.mubr.f32.gmra.mrb[10].mxu1 %v11994_v57  ;;  %v4218_v57 = vrot.slane %v11706_v48, 2 }
 0x4b6   : > { %8379 = vmatprep.mubr.f32.mxu1 %v11999_v33  ;;  %9296 = vmatpush3.bf16.msra.mxu1 %v9293_v26  ;;  %v12015_v26 = vpack.c.bf16 %v4846_v55, %v4845_v22  ;;  %v4230_v22 = vrot.slane %v11785_v49, 2  ;;  %v12046_v25 = vsel %vm1094_vm2, %v4227_v39, %v4228_v63  ;;  %v4233_v55 = vrot.slane %v11788_v52, 2 }
 0x4b7   : > { %9298 = vmatprep.subr.bf16.mxu1 %v9297_v14  ;;  %v12023_v16 = vsel %vm1094_vm2, %v4217_v3, %v4218_v57  ;;  %v4240_v39 = vrot.slane %v11829_v51, 2 }
 0x4b8   : > { %v12052_v3 = vsel %vm1094_vm2, %v4228_v63, %v4230_v22  ;;  %v4242_v63 = vrot.slane %v11835_v7, 2  ;;  %v4243_v22 = vrot.slane %v11832_v42, 2 }
 0x4b9   : > { %8380 = vmatmul.mubr.f32.gmra.mrb[12].mxu1 %v12005_v17 }
 0x4ba   : > { %8382 = vmatprep.mubr.f32.mxu1 %v12010_v61  ;;  %9300 = vmatpush3.bf16.msra.mxu1 %v9297_v14  ;;  %v12030_v14 = vsel %vm1094_vm2, %v4218_v57, %v4220_v21  ;;  %v4232_v57 = vrot.slane %v11791_v24, 2  ;;  %v4235_v21 = vrot.slane %v11809_v27, 2  ;;  %v12079_v51 = vsel %vm1094_vm2, %v4242_v63, %v4243_v22 }
 0x4bb   : > { %9302 = vmatprep.subr.bf16.mxu1 %v9301_v11  ;;  %13061 = vst [vmem:[#allocation57_spill] sm:$0xff] %v12079_v51 }
 0x4bc   : > { %v12057_v49 = vsel %vm1094_vm2, %v4232_v57, %v4233_v55 }
 0x4bd   : > { %8383 = vmatmul.mubr.f32.gmra.mrb[14].mxu1 %v12018_v30  ;;  %13059 = vst [vmem:[#allocation21_spill] sm:$0xff] %v12057_v49 }
 0x4be   : > { %8385 = vmatprep.mubr.f32.mxu1 %v12023_v16  ;;  %9304 = vmatpush3.bf16.msra.mxu1 %v9301_v11  ;;  %v12041_v11 = vsel %vm1094_vm2, %v4223_v50, %v4225_v28  ;;  %v4238_v50 = vrot.slane %v11812_v10, 2  ;;  %v12063_v28 = vsel %vm1094_vm2, %v4233_v55, %v4235_v21  ;;  %v4247_v55 = vrot.slane %v11855_v36, 2 }
 0x4bf   : > { %9306 = vmatprep.subr.bf16.mxu1 %v12015_v26  ;;  %v4248_v21 = vrot.slane %v11852_v60, 2 }
 0x4c0   : > { %v12068_v27 = vsel %vm1094_vm2, %v4237_v54, %v4238_v50  ;;  %v12074_v57 = vsel %vm1094_vm2, %v4238_v50, %v4240_v39  ;;  %v4252_v50 = vrot.slane %v11875_v41, 2  ;;  %v4253_v39 = vrot.slane %v11872_v40, 2 }
 0x4c1   : > { %8386 = vmatmul.mubr.f32.gmra.mrb[16].mxu1 %v12030_v14  ;;  %13060 = vst [vmem:[#allocation56_spill] sm:$0xff] %v12068_v27 }
 0x4c2   : > { %8388 = vmatprep.mubr.f32.mxu1 %v12035_v59 }
 0x4c5   : > { %8389 = vmatmul.mubr.f32.gmra.mrb[18].mxu1 %v12041_v11 }
 0x4c6   : > { %8391 = vmatprep.mubr.f32.mxu1 %v12046_v25 }
 0x4c9   : > { %8392 = vmatmul.mubr.f32.gmra.mrb[20].mxu1 %v12052_v3 }
 0x4ca   : > { %8394 = vmatprep.mubr.f32.mxu1 %v12057_v49  ;;  %v4245_v49 = vrot.slane %v11849_v8, 2  ;;  %v12090_v8 = vsel %vm1094_vm2, %v4247_v55, %v4248_v21  ;;  %v4848_v55 = vld [vmem:[#allocation7 + $0x218] sm:$0xff] }
 0x4cb   : > { %13063 = vst [vmem:[#allocation59_spill] sm:$0xff] %v12090_v8 }
 0x4cc   : > { %v12085_v54 = vsel %vm1094_vm2, %v4243_v22, %v4245_v49  ;;  %v4847_v22 = vld [vmem:[#allocation7 + $0x210] sm:$0xff] }
 0x4cd   : > { %8395 = vmatmul.mubr.f32.gmra.mrb[22].mxu1 %v12063_v28  ;;  %13062 = vst [vmem:[#allocation58_spill] sm:$0xff] %v12085_v54 }
 0x4ce   : > { %8397 = vmatprep.mubr.f32.mxu1 %v12068_v27  ;;  %v4250_v27 = vrot.slane %v11869_v35, 2  ;;  %v12101_v35 = vsel %vm1094_vm2, %v4252_v50, %v4253_v39  ;;  %v4851_v50 = vld [vmem:[#allocation7 + $0x230] sm:$0xff] }
 0x4cf   : > { %13065 = vst [vmem:[#allocation61_spill] sm:$0xff] %v12101_v35 }
 0x4d0   : > { %v12096_v63 = vsel %vm1094_vm2, %v4248_v21, %v4250_v27  ;;  %v9309_v27 = vpack.c.bf16 %v4848_v55, %v4847_v22  ;;  %v4849_v21 = vld [vmem:[#allocation7 + $0x220] sm:$0xff]  ;;  %v4854_v22 = vld [vmem:[#allocation7 + $0x248] sm:$0xff] }
 0x4d1   : > { %8398 = vmatmul.mubr.f32.gmra.mrb[24].mxu1 %v12074_v57  ;;  %13064 = vst [vmem:[#allocation60_spill] sm:$0xff] %v12096_v63 }
 0x4d2   : > { %8400 = vmatprep.mubr.f32.mxu1 %v12079_v51  ;;  %v4255_v51 = vrot.slane %v11889_v13, 2 }
 0x4d4   : > { %v12105_v49 = vsel %vm1094_vm2, %v4253_v39, %v4255_v51  ;;  %v4852_v51 = vld [vmem:[#allocation7 + $0x238] sm:$0xff]  ;;  %v4853_v39 = vld [vmem:[#allocation7 + $0x240] sm:$0xff] }
 0x4d5   : > { %8401 = vmatmul.mubr.f32.gmra.mrb[26].mxu1 %v12085_v54 }
 0x4d6   : > { %8403 = vmatprep.mubr.f32.mxu1 %v12090_v8  ;;  %v4850_v8 = vld [vmem:[#allocation7 + $0x228] sm:$0xff] }
 0x4d7   : > { %v9313_v13 = vpack.c.bf16 %v4850_v8, %v4849_v21  ;;  %v4856_v8 = vld [vmem:[#allocation7 + $0x258] sm:$0xff]  ;;  %v4858_v21 = vld [vmem:[#allocation7 + $0x268] sm:$0xff] }
 0x4d9   : > { %8404 = vmatmul.mubr.f32.gmra.mrb[28].mxu1 %v12096_v63 }
 0x4da   : > { %8406 = vmatprep.mubr.f32.mxu1 %v12101_v35 }
 0x4dd   : > { %8407 = vmatmul.mubr.f32.gmra.mrb[30].mxu1 %v12105_v49 }
 0x4de   : > { %8441 = vmatprep.mubr.f32.mxu1 %v11535_v5  ;;  %v9317_v5 = vpack.c.bf16 %v4852_v51, %v4851_v50  ;;  %v4859_v50 = vld [vmem:[#allocation7 + $0x270] sm:$0xff]  ;;  %v4860_v51 = vld [vmem:[#allocation7 + $0x278] sm:$0xff] }
 0x4e1   : > { %8442 = vmatmul.mubr.f32.vlgmr.msra.gmra.mrb[0].mxu1 %v11531_v18  ;;  %v9321_v18 = vpack.c.bf16 %v4854_v22, %v4853_v39  ;;  %v5126_v39 = vld [vmem:[#allocation7 + $0x280] sm:$0xff]  ;;  %v5127_v22 = vld [vmem:[#allocation7 + $0x288] sm:$0xff] }
 0x4e2   : > { %8444 = vmatprep.mubr.f32.mxu1 %v11514_v15  ;;  %9308 = vmatpush3.bf16.msra.mxu1 %v12015_v26  ;;  %v4855_v26 = vld [vmem:[#allocation7 + $0x250] sm:$0xff] }
 0x4e3   : > { %9310 = vmatprep.subr.bf16.mxu1 %v9309_v27  ;;  %v9325_v55 = vpack.c.bf16 %v4856_v8, %v4855_v26  ;;  %v3306_v26 = vmul.f32 %v11482_v44, %v11410_v47  ;;  %v12138_v8 = vmul.f32 %v11482_v44, %v11413_v53 }
 0x4e5   : > { %8445 = vmatmul.mubr.f32.gmra.mrb[2].mxu1 %v11511_v46 }
 0x4e6   : > { %8447 = vmatprep.mubr.f32.mxu1 %v11565_v56  ;;  %9312 = vmatpush3.bf16.msra.mxu1 %v9309_v27  ;;  %v4857_v27 = vld [vmem:[#allocation7 + $0x260] sm:$0xff] }
 0x4e7   : > { %9314 = vmatprep.subr.bf16.mxu1 %v9313_v13 }
 0x4e9   : > { %8448 = vmatmul.mubr.f32.gmra.mrb[4].mxu1 %v11562_v31 }
 0x4ea   : > { %8450 = vmatprep.mubr.f32.mxu1 %v11594_v32  ;;  %9316 = vmatpush3.bf16.msra.mxu1 %v9313_v13  ;;  %v9329_v13 = vpack.c.bf16 %v4858_v21, %v4857_v27  ;;  %v12868_v27 = vmax.f32 %v12138_v8, 0.0 }
 0x4eb   : > { %9318 = vmatprep.subr.bf16.mxu1 %v9317_v5 }
 0x4ec   : > { %v12147_v47 = vrot.slane %v12868_v27, 7  ;;  %v13068_v27 = vld [vmem:[#allocation44_spill] sm:$0xff] }
 0x4ed   : > { %8451 = vmatmul.mubr.f32.gmra.mrb[6].mxu1 %v11591_v9 }
 0x4ee   : > { %8453 = vmatprep.mubr.f32.mxu1 %v11622_v37  ;;  %9320 = vmatpush3.bf16.msra.mxu1 %v9317_v5  ;;  %v9333_v5 = vpack.c.bf16 %v4860_v51, %v4859_v50  ;;  %v5128_v50 = vld [vmem:[#allocation7 + $0x290] sm:$0xff]  ;;  %v5129_v51 = vld [vmem:[#allocation7 + $0x298] sm:$0xff] }
 0x4ef   : > { %9322 = vmatprep.subr.bf16.mxu1 %v9321_v18 }
 0x4f1   : > { %8454 = vmatmul.mubr.f32.gmra.mrb[8].mxu1 %v11619_v20 }
 0x4f2   : > { %8456 = vmatprep.mubr.f32.mxu1 %v11651_v19  ;;  %9324 = vmatpush3.bf16.msra.mxu1 %v9321_v18  ;;  %v9337_v18 = vpack.c.bf16 %v5127_v22, %v5126_v39  ;;  %v9341_v39 = vpack.c.bf16 %v5129_v51, %v5128_v50  ;;  %v5130_v22 = vld [vmem:[#allocation7 + $0x2a0] sm:$0xff]  ;;  %v5135_v50 = vld [vmem:[#allocation7 + $0x2c8] sm:$0xff] }
 0x4f3   : > { %9326 = vmatprep.subr.bf16.mxu1 %v9325_v55  ;;  %v13071_v51 = vld [vmem:[#allocation49_spill] sm:$0xff] }
 0x4f5   : > { %8457 = vmatmul.mubr.f32.gmra.mrb[10].mxu1 %v11648_v2 }
 0x4f6   : > { %8459 = vmatprep.mubr.f32.mxu1 %v11680_v58  ;;  %9328 = vmatpush3.bf16.msra.mxu1 %v9325_v55  ;;  %v3338_v55 = vmax.f32 %v3306_v26, 0.0  ;;  %v5131_v26 = vld [vmem:[#allocation7 + $0x2a8] sm:$0xff] }
 0x4f7   : > { %9330 = vmatprep.subr.bf16.mxu1 %v9329_v13 }
 0x4f8   : > { %v3371_v21 = vrot.slane %v3338_v55, 1 }
 0x4f9   : > { %8460 = vmatmul.mubr.f32.gmra.mrb[12].mxu1 %v11677_v62 }
 0x4fa   : > { %8462 = vmatprep.mubr.f32.mxu1 %v11709_v0  ;;  %9332 = vmatpush3.bf16.msra.mxu1 %v9329_v13  ;;  %v3449_v13 = vrot.slane %v3338_v55, 7  ;;  %v13067_v55 = vld [vmem:[#allocation47_spill] sm:$0xff] }
 0x4fb   : > { %9334 = vmatprep.subr.bf16.mxu1 %v9333_v5 }
 0x4fc   : > { %v12151_v53 = vsel %vm314_vm0, %v3371_v21, %v3449_v13  ;;  %v12156_v44 = vsel %vm314_vm0, %v3449_v13, %v12147_v47  ;;  %v9345_v21 = vpack.c.bf16 %v5131_v26, %v5130_v22  ;;  %v13069_v13 = vld [vmem:[#allocation45_spill] sm:$0xff]  ;;  %v5137_v22 = vld [vmem:[#allocation7 + $0x2d8] sm:$0xff] }
 0x4fd   : > { %8463 = vmatmul.mubr.f32.gmra.mrb[14].mxu1 %v11706_v48  ;;  %v13073_v26 = vld [vmem:[#allocation33_spill] sm:$0xff] }
 0x4fe   : > { %8465 = vmatprep.mubr.f32.mxu1 %v11738_v12  ;;  %9336 = vmatpush3.bf16.msra.mxu1 %v9333_v5  ;;  %v13066_v5 = vld [vmem:[#allocation43_spill] sm:$0xff] }
 0x4ff   : > { %9338 = vmatprep.subr.bf16.mxu1 %v9337_v18 }
 0x501   : > { %8466 = vmatmul.mubr.f32.gmra.mrb[16].mxu1 %v11735_v6 }
 0x502   : > { %8468 = vmatprep.mubr.f32.mxu1 %v11765_v38 }
 0x505   : > { %8469 = vmatmul.mubr.f32.gmra.mrb[18].mxu1 %v11762_v23 }
 0x506   : > { %8471 = vmatprep.mubr.f32.mxu1 %v11791_v24 }
 0x509   : > { %8472 = vmatmul.mubr.f32.gmra.mrb[20].mxu1 %v11788_v52 }
 0x50a   : > { %8474 = vmatprep.mubr.f32.mxu1 %v11815_v1 }
 0x50d   : > { %8475 = vmatmul.mubr.f32.gmra.mrb[22].mxu1 %v11812_v10 }
 0x50e   : > { %8477 = vmatprep.mubr.f32.mxu1 %v11835_v7 }
 0x511   : > { %8478 = vmatmul.mubr.f32.gmra.mrb[24].mxu1 %v11832_v42  ;;  %v13072_v42 = vld [vmem:[#allocation50_spill] sm:$0xff] }
 0x512   : > { %8480 = vmatprep.mubr.f32.mxu1 %v11855_v36 }
 0x515   : > { %8481 = vmatmul.mubr.f32.gmra.mrb[26].mxu1 %v11852_v60  ;;  %v13070_v60 = vld [vmem:[#allocation48_spill] sm:$0xff] }
 0x516   : > { %8483 = vmatprep.mubr.f32.mxu1 %v11875_v41  ;;  %v5133_v41 = vld [vmem:[#allocation7 + $0x2b8] sm:$0xff] }
 0x519   : > { %8484 = vmatmul.mubr.f32.gmra.mrb[28].mxu1 %v11872_v40  ;;  %v5132_v40 = vld [vmem:[#allocation7 + $0x2b0] sm:$0xff] }
 0x51a   : > { %8486 = vmatprep.mubr.f32.mxu1 %v12151_v53  ;;  %v9349_v36 = vpack.c.bf16 %v5133_v41, %v5132_v40  ;;  %v5139_v40 = vld [vmem:[#allocation7 + $0x2e8] sm:$0xff]  ;;  %v13075_v41 = vld [vmem:[#allocation36_spill] sm:$0xff] }
 0x51d   : > { %8487 = vmatmul.mubr.f32.gmra.mrb[30].mxu1 %v12156_v44 }
 0x51e   : > { %8521 = vmatprep.mubr.f32.mxu1 %v13066_v5  ;;  %v5134_v5 = vld [vmem:[#allocation7 + $0x2c0] sm:$0xff] }
 0x521   : > { %8522 = vmatmul.mubr.f32.vlgmr.msra.gmra.mrb[0].mxu1 %v13067_v55  ;;  %v5136_v55 = vld [vmem:[#allocation7 + $0x2d0] sm:$0xff] }
 0x522   : > { %8524 = vmatprep.mubr.f32.mxu1 %v13068_v27  ;;  %9340 = vmatpush3.bf16.msra.mxu1 %v9337_v18  ;;  %v9353_v18 = vpack.c.bf16 %v5135_v50, %v5134_v5  ;;  %v13074_v27 = vld [vmem:[#allocation37_spill] sm:$0xff]  ;;  %v5141_v5 = vld [vmem:[#allocation7 + $0x2f8] sm:$0xff] }
 0x523   : > { %9342 = vmatprep.subr.bf16.mxu1 %v9341_v39  ;;  %v13077_v50 = vld [vmem:[#allocation13_spill] sm:$0xff] }
 0x525   : > { %8525 = vmatmul.mubr.f32.gmra.mrb[2].mxu1 %v13069_v13  ;;  %v13076_v13 = vld [vmem:[#allocation12_spill] sm:$0xff] }
 0x526   : > { %8527 = vmatprep.mubr.f32.mxu1 %v13070_v60  ;;  %9344 = vmatpush3.bf16.msra.mxu1 %v9341_v39  ;;  %v9357_v39 = vpack.c.bf16 %v5137_v22, %v5136_v55  ;;  %v5138_v60 = vld [vmem:[#allocation7 + $0x2e0] sm:$0xff]  ;;  %v5401_v55 = vld [vmem:[#allocation7 + $0x308] sm:$0xff]  ;;  %v13079_v22 = vld [vmem:[#allocation15_spill] sm:$0xff] }
 0x527   : > { %9346 = vmatprep.subr.bf16.mxu1 %v9345_v21 }
 0x529   : > { %8528 = vmatmul.mubr.f32.gmra.mrb[4].mxu1 %v13071_v51  ;;  %v13078_v51 = vld [vmem:[#allocation14_spill] sm:$0xff] }
 0x52a   : > { %8530 = vmatprep.mubr.f32.mxu1 %v13072_v42  ;;  %9348 = vmatpush3.bf16.msra.mxu1 %v9345_v21  ;;  %v9361_v21 = vpack.c.bf16 %v5139_v40, %v5138_v60  ;;  %v5140_v42 = vld [vmem:[#allocation7 + $0x2f0] sm:$0xff]  ;;  %v13083_v40 = vld [vmem:[#allocation20_spill] sm:$0xff] }
 0x52b   : > { %9350 = vmatprep.subr.bf16.mxu1 %v9349_v36  ;;  %v13082_v60 = vld [vmem:[#allocation18_spill] sm:$0xff] }
 0x52d   : > { %8531 = vmatmul.mubr.f32.gmra.mrb[6].mxu1 %v13073_v26  ;;  %v13080_v26 = vld [vmem:[#allocation16_spill] sm:$0xff] }
 0x52e   : > { %8533 = vmatprep.mubr.f32.mxu1 %v13074_v27  ;;  %9352 = vmatpush3.bf16.msra.mxu1 %v9349_v36  ;;  %v9365_v36 = vpack.c.bf16 %v5141_v5, %v5140_v42  ;;  %v5400_v27 = vld [vmem:[#allocation7 + $0x300] sm:$0xff]  ;;  %v13085_v42 = vld [vmem:[#allocation23_spill] sm:$0xff] }
 0x52f   : > { %9354 = vmatprep.subr.bf16.mxu1 %v9353_v18  ;;  %v13086_v5 = vld [vmem:[#allocation24_spill] sm:$0xff] }
 0x531   : > { %8534 = vmatmul.mubr.f32.gmra.mrb[8].mxu1 %v13075_v41 }
 0x532   : > { %8536 = vmatprep.mubr.f32.mxu1 %v13076_v13  ;;  %9356 = vmatpush3.bf16.msra.mxu1 %v9353_v18  ;;  %v9369_v18 = vpack.c.bf16 %v5401_v55, %v5400_v27  ;;  %v13081_v13 = vld [vmem:[#allocation17_spill] sm:$0xff]  ;;  %v13089_v27 = vld [vmem:[#allocation31_spill] sm:$0xff]  ;;  %v13090_v55 = vmax.f32 %v12138_v8, 0.0 }
 0x533   : > { %9358 = vmatprep.subr.bf16.mxu1 %v9357_v39  ;;  %v13095_v8 = vld [vmem:[#allocation41_spill] sm:$0xff] }
 0x535   : > { %8537 = vmatmul.mubr.f32.gmra.mrb[10].mxu1 %v13077_v50 }
 0x536   : > { %8539 = vmatprep.mubr.f32.mxu1 %v13078_v51  ;;  %9360 = vmatpush3.bf16.msra.mxu1 %v9357_v39  ;;  %v13084_v39 = vld [vmem:[#allocation22_spill] sm:$0xff] }
 0x537   : > { %9362 = vmatprep.subr.bf16.mxu1 %v9361_v21 }
 0x539   : > { %8540 = vmatmul.mubr.f32.gmra.mrb[12].mxu1 %v13079_v22  ;;  %v13087_v22 = vld [vmem:[#allocation26_spill] sm:$0xff] }
 0x53a   : > { %8542 = vmatprep.mubr.f32.mxu1 %v13080_v26  ;;  %9364 = vmatpush3.bf16.msra.mxu1 %v9361_v21  ;;  %v13088_v21 = vld [vmem:[#allocation30_spill] sm:$0xff] }
 0x53b   : > { %9366 = vmatprep.subr.bf16.mxu1 %v9365_v36 }
 0x53d   : > { %8543 = vmatmul.mubr.f32.gmra.mrb[14].mxu1 %v13081_v13  ;;  %v5407_v13 = vld [vmem:[#allocation7 + $0x338] sm:$0xff] }
 0x53e   : > { %8545 = vmatprep.mubr.f32.mxu1 %v13082_v60  ;;  %9368 = vmatpush3.bf16.msra.mxu1 %v9365_v36  ;;  %v3515_v36 = vrot.slane %v13090_v55, 5  ;;  %v13091_v60 = vld [vmem:[#allocation35_spill] sm:$0xff] }
 0x53f   : > { %9370 = vmatprep.subr.bf16.mxu1 %v9369_v18 }
 0x541   : > { %8546 = vmatmul.mubr.f32.gmra.mrb[16].mxu1 %v13083_v40  ;;  %v13092_v40 = vld [vmem:[#allocation38_spill] sm:$0xff] }
 0x542   : > { %8548 = vmatprep.mubr.f32.mxu1 %v13084_v39  ;;  %v13093_v39 = vld [vmem:[#allocation39_spill] sm:$0xff] }
 0x545   : > { %8549 = vmatmul.mubr.f32.gmra.mrb[18].mxu1 %v13085_v42  ;;  %v4837_v42 = vrot.slane %v12151_v53, 1 }
 0x546   : > { %8551 = vmatprep.mubr.f32.mxu1 %v13086_v5  ;;  %v4838_v5 = vrot.slane %v12156_v44, 1 }
 0x548   : > { %v12199_v55 = vsel %vm521_vm1, %v4837_v42, %v4838_v5 }
 0x549   : > { %8552 = vmatmul.mubr.f32.gmra.mrb[20].mxu1 %v13087_v22  ;;  %13096 = vst [vmem:[#allocation43_spill] sm:$0xff] %v12199_v55  ;;  %v13097_v22 = vld [vmem:[#allocation46_spill] sm:$0xff] }
 0x54a   : > { %8554 = vmatprep.mubr.f32.mxu1 %v11844_v34  ;;  %v12193_v34 = vsel %vm314_vm0, %v12147_v47, %v3515_v36  ;;  %v5404_v36 = vld [vmem:[#allocation7 + $0x320] sm:$0xff] }
 0x54d   : > { %8555 = vmatmul.mubr.f32.gmra.mrb[22].mxu1 %v13088_v21  ;;  %v13094_v21 = vld [vmem:[#allocation40_spill] sm:$0xff] }
 0x54e   : > { %8557 = vmatprep.mubr.f32.mxu1 %v13089_v27  ;;  %v4840_v27 = vrot.slane %v12193_v34, 1 }
 0x551   : > { %8558 = vmatmul.mubr.f32.gmra.mrb[24].mxu1 %v13091_v60  ;;  %v5403_v60 = vld [vmem:[#allocation7 + $0x318] sm:$0xff] }
 0x552   : > { %8560 = vmatprep.mubr.f32.mxu1 %v13092_v40  ;;  %v5402_v40 = vld [vmem:[#allocation7 + $0x310] sm:$0xff] }
 0x553   : > { %v9373_v47 = vpack.c.bf16 %v5403_v60, %v5402_v40  ;;  %v5409_v60 = vld [vmem:[#allocation7 + $0x348] sm:$0xff]  ;;  %v13100_v40 = vld [vmem:[#allocation52_spill] sm:$0xff] }
 0x555   : > { %8561 = vmatmul.mubr.f32.gmra.mrb[26].mxu1 %v13093_v39  ;;  %v12203_v39 = vsel %vm521_vm1, %v4838_v5, %v4840_v27  ;;  %v13099_v5 = vld [vmem:[#allocation19_spill] sm:$0xff] }
 0x556   : > { %8563 = vmatprep.mubr.f32.mxu1 %v13094_v21  ;;  %v5405_v21 = vld [vmem:[#allocation7 + $0x328] sm:$0xff] }
 0x557   : > { %v9377_v42 = vpack.c.bf16 %v5405_v21, %v5404_v36  ;;  %v5411_v21 = vld [vmem:[#allocation7 + $0x358] sm:$0xff]  ;;  %v13101_v36 = vld [vmem:[#allocation54_spill] sm:$0xff] }
 0x559   : > { %8564 = vmatmul.mubr.f32.gmra.mrb[28].mxu1 %v13095_v8  ;;  %v13098_v8 = vld [vmem:[#allocation42_spill] sm:$0xff] }
 0x55a   : > { %8566 = vmatprep.mubr.f32.mxu1 %v12199_v55  ;;  %v5406_v55 = vld [vmem:[#allocation7 + $0x330] sm:$0xff] }
 0x55b   : > { %v9381_v27 = vpack.c.bf16 %v5407_v13, %v5406_v55  ;;  %v5413_v13 = vld [vmem:[#allocation7 + $0x368] sm:$0xff]  ;;  %v13102_v55 = vld [vmem:[#allocation55_spill] sm:$0xff] }
 0x55d   : > { %8567 = vmatmul.mubr.f32.gmra.mrb[30].mxu1 %v12203_v39 }
 0x55e   : > { %8601 = vmatprep.mubr.f32.mxu1 %v11953_v4  ;;  %v5408_v4 = vld [vmem:[#allocation7 + $0x340] sm:$0xff] }
 0x561   : > { %8602 = vmatmul.mubr.f32.vlgmr.msra.gmra.mrb[0].mxu1 %v13097_v22  ;;  %v9385_v22 = vpack.c.bf16 %v5409_v60, %v5408_v4  ;;  %v5415_v4 = vld [vmem:[#allocation7 + $0x378] sm:$0xff]  ;;  %v5674_v60 = vld [vmem:[#allocation7 + $0x380] sm:$0xff] }
 0x562   : > { %8604 = vmatprep.mubr.f32.mxu1 %v13098_v8  ;;  %9372 = vmatpush3.bf16.msra.mxu1 %v9369_v18  ;;  %v5410_v18 = vld [vmem:[#allocation7 + $0x350] sm:$0xff] }
 0x563   : > { %9374 = vmatprep.subr.bf16.mxu1 %v9373_v47 }
 0x565   : > { %8605 = vmatmul.mubr.f32.gmra.mrb[2].mxu1 %v13099_v5 }
 0x566   : > { %8607 = vmatprep.mubr.f32.mxu1 %v11966_v43  ;;  %9376 = vmatpush3.bf16.msra.mxu1 %v9373_v47  ;;  %v9389_v47 = vpack.c.bf16 %v5411_v21, %v5410_v18  ;;  %v5412_v43 = vld [vmem:[#allocation7 + $0x360] sm:$0xff]  ;;  %v5675_v18 = vld [vmem:[#allocation7 + $0x388] sm:$0xff] }
 0x567   : > { %9378 = vmatprep.subr.bf16.mxu1 %v9377_v42  ;;  %v13105_v21 = vld [vmem:[#allocation57_spill] sm:$0xff] }
 0x569   : > { %8608 = vmatmul.mubr.f32.gmra.mrb[4].mxu1 %v13100_v40 }
 0x56a   : > { %8610 = vmatprep.mubr.f32.mxu1 %v11977_v45  ;;  %9380 = vmatpush3.bf16.msra.mxu1 %v9377_v42  ;;  %v9393_v42 = vpack.c.bf16 %v5413_v13, %v5412_v43  ;;  %v5414_v45 = vld [vmem:[#allocation7 + $0x370] sm:$0xff]  ;;  %v13103_v43 = vld [vmem:[#allocation21_spill] sm:$0xff]  ;;  %v5118_v13 = vrot.slane %v12151_v53, 2 }
 0x56b   : > { %9382 = vmatprep.subr.bf16.mxu1 %v9381_v27 }
 0x56d   : > { %8611 = vmatmul.mubr.f32.gmra.mrb[6].mxu1 %v13101_v36 }
 0x56e   : > { %8613 = vmatprep.mubr.f32.mxu1 %v11988_v29  ;;  %9384 = vmatpush3.bf16.msra.mxu1 %v9381_v27  ;;  %v9397_v27 = vpack.c.bf16 %v5415_v4, %v5414_v45  ;;  %v13104_v45 = vld [vmem:[#allocation56_spill] sm:$0xff]  ;;  %v5121_v4 = vrot.slane %v12193_v34, 2 }
 0x56f   : > { %9386 = vmatprep.subr.bf16.mxu1 %v9385_v22 }
 0x571   : > { %8614 = vmatmul.mubr.f32.gmra.mrb[8].mxu1 %v13102_v55 }
 0x572   : > { %8616 = vmatprep.mubr.f32.mxu1 %v11999_v33  ;;  %9388 = vmatpush3.bf16.msra.mxu1 %v9385_v22  ;;  %v9401_v22 = vpack.c.bf16 %v5675_v18, %v5674_v60  ;;  %v5676_v18 = vld [vmem:[#allocation7 + $0x390] sm:$0xff] }
 0x573   : > { %9390 = vmatprep.subr.bf16.mxu1 %v9389_v47 }
 0x575   : > { %8617 = vmatmul.mubr.f32.gmra.mrb[10].mxu1 %v12005_v17 }
 0x576   : > { %8619 = vmatprep.mubr.f32.mxu1 %v12010_v61  ;;  %9392 = vmatpush3.bf16.msra.mxu1 %v9389_v47  ;;  %v13106_v47 = vld [vmem:[#allocation59_spill] sm:$0xff] }
 0x577   : > { %9394 = vmatprep.subr.bf16.mxu1 %v9393_v42 }
 0x579   : > { %8620 = vmatmul.mubr.f32.gmra.mrb[12].mxu1 %v12018_v30 }
 0x57a   : > { %8622 = vmatprep.mubr.f32.mxu1 %v12023_v16  ;;  %9396 = vmatpush3.bf16.msra.mxu1 %v9393_v42  ;;  %v5119_v42 = vrot.slane %v12156_v44, 2 }
 0x57b   : > { %9398 = vmatprep.subr.bf16.mxu1 %v9397_v27 }
 0x57c   : > { %v12244_v60 = vsel %vm1094_vm2, %v5119_v42, %v5121_v4  ;;  %v5954_v4 = vld [vmem:[#allocation7 + $0x430] sm:$0xff] }
 0x57d   : > { %8623 = vmatmul.mubr.f32.gmra.mrb[14].mxu1 %v12030_v14 }
 0x57e   : > { %8625 = vmatprep.mubr.f32.mxu1 %v12035_v59  ;;  %9400 = vmatpush3.bf16.msra.mxu1 %v9397_v27  ;;  %v12240_v27 = vsel %vm1094_vm2, %v5118_v13, %v5119_v42  ;;  %v5680_v13 = vld [vmem:[#allocation7 + $0x3b0] sm:$0xff] }
 0x57f   : > { %9402 = vmatprep.subr.bf16.mxu1 %v9401_v22  ;;  %13107 = vst [vmem:[#allocation47_spill] sm:$0xff] %v12240_v27 }
 0x581   : > { %8626 = vmatmul.mubr.f32.gmra.mrb[16].mxu1 %v12041_v11 }
 0x582   : > { %8628 = vmatprep.mubr.f32.mxu1 %v12046_v25 }
 0x585   : > { %8629 = vmatmul.mubr.f32.gmra.mrb[18].mxu1 %v12052_v3 }
 0x586   : > { %8631 = vmatprep.mubr.f32.mxu1 %v13103_v43 }
 0x589   : > { %8632 = vmatmul.mubr.f32.gmra.mrb[20].mxu1 %v12063_v28 }
 0x58a   : > { %8634 = vmatprep.mubr.f32.mxu1 %v13104_v45 }
 0x58d   : > { %8635 = vmatmul.mubr.f32.gmra.mrb[22].mxu1 %v12074_v57 }
 0x58e   : > { %8637 = vmatprep.mubr.f32.mxu1 %v13105_v21 }
 0x591   : > { %8638 = vmatmul.mubr.f32.gmra.mrb[24].mxu1 %v12085_v54  ;;  %v5679_v54 = vld [vmem:[#allocation7 + $0x3a8] sm:$0xff] }
 0x592   : > { %8640 = vmatprep.mubr.f32.mxu1 %v13106_v47 }
 0x595   : > { %8641 = vmatmul.mubr.f32.gmra.mrb[26].mxu1 %v12096_v63  ;;  %v5677_v63 = vld [vmem:[#allocation7 + $0x398] sm:$0xff] }
 0x596   : > { %8643 = vmatprep.mubr.f32.mxu1 %v12101_v35  ;;  %v9405_v47 = vpack.c.bf16 %v5677_v63, %v5676_v18  ;;  %v5678_v35 = vld [vmem:[#allocation7 + $0x3a0] sm:$0xff]  ;;  %v5683_v63 = vld [vmem:[#allocation7 + $0x3c8] sm:$0xff]  ;;  %v13117_v18 = vld [vmem:[#allocation50_spill] sm:$0xff] }
 0x597   : > { %v9409_v34 = vpack.c.bf16 %v5679_v54, %v5678_v35  ;;  %v5685_v54 = vld [vmem:[#allocation7 + $0x3d8] sm:$0xff]  ;;  %v5687_v35 = vld [vmem:[#allocation7 + $0x3e8] sm:$0xff] }
 0x599   : > { %8644 = vmatmul.mubr.f32.gmra.mrb[28].mxu1 %v12105_v49 }
 0x59a   : > { %8646 = vmatprep.mubr.f32.mxu1 %v12240_v27  ;;  %v5681_v27 = vld [vmem:[#allocation7 + $0x3b8] sm:$0xff] }
 0x59b   : > { %v9413_v42 = vpack.c.bf16 %v5681_v27, %v5680_v13  ;;  %v13116_v27 = vld [vmem:[#allocation49_spill] sm:$0xff]  ;;  %v5956_v13 = vld [vmem:[#allocation7 + $0x440] sm:$0xff] }
 0x59d   : > { %8647 = vmatmul.mubr.f32.gmra.mrb[30].mxu1 %v12244_v60 }
 0x59e   : > { %8681 = vmatprep.mubr.f32.mxu1 %v11514_v15  ;;  %v5682_v15 = vld [vmem:[#allocation7 + $0x3c0] sm:$0xff] }
 0x5a1   : > { %8682 = vmatmul.mubr.f32.vlgmr.msra.gmra.mrb[0].mxu1 %v11511_v46  ;;  %v9417_v46 = vpack.c.bf16 %v5683_v63, %v5682_v15  ;;  %v13118_v15 = vld [vmem:[#allocation33_spill] sm:$0xff] }
 0x5a2   : > { %8684 = vmatprep.mubr.f32.mxu1 %v11565_v56  ;;  %9404 = vmatpush3.bf16.msra.mxu1 %v9401_v22  ;;  %v5684_v56 = vld [vmem:[#allocation7 + $0x3d0] sm:$0xff]  ;;  %v5689_v22 = vld [vmem:[#allocation7 + $0x3f8] sm:$0xff]  ;;  %v13119_v63 = vld [vmem:[#allocation37_spill] sm:$0xff] }
 0x5a3   : > { %9406 = vmatprep.subr.bf16.mxu1 %v9405_v47 }
 0x5a5   : > { %8685 = vmatmul.mubr.f32.gmra.mrb[2].mxu1 %v11562_v31  ;;  %v9421_v31 = vpack.c.bf16 %v5685_v54, %v5684_v56  ;;  %v5958_v56 = vld [vmem:[#allocation7 + $0x450] sm:$0xff]  ;;  %v5959_v54 = vld [vmem:[#allocation7 + $0x458] sm:$0xff] }
 0x5a6   : > { %8687 = vmatprep.mubr.f32.mxu1 %v11594_v32  ;;  %9408 = vmatpush3.bf16.msra.mxu1 %v9405_v47  ;;  %v5686_v32 = vld [vmem:[#allocation7 + $0x3e0] sm:$0xff]  ;;  %v5949_v47 = vld [vmem:[#allocation7 + $0x408] sm:$0xff] }
 0x5a7   : > { %9410 = vmatprep.subr.bf16.mxu1 %v9409_v34 }
 0x5a9   : > { %8688 = vmatmul.mubr.f32.gmra.mrb[4].mxu1 %v11591_v9  ;;  %v9425_v9 = vpack.c.bf16 %v5687_v35, %v5686_v32  ;;  %v9453_v32 = vpack.c.bf16 %v5959_v54, %v5958_v56  ;;  %v5960_v35 = vld [vmem:[#allocation7 + $0x460] sm:$0xff] }
 0x5aa   : > { %8690 = vmatprep.mubr.f32.mxu1 %v11622_v37  ;;  %9412 = vmatpush3.bf16.msra.mxu1 %v9409_v34  ;;  %v5688_v37 = vld [vmem:[#allocation7 + $0x3f0] sm:$0xff] }
 0x5ab   : > { %9414 = vmatprep.subr.bf16.mxu1 %v9413_v42 }
 0x5ad   : > { %8691 = vmatmul.mubr.f32.gmra.mrb[6].mxu1 %v11619_v20  ;;  %v9429_v20 = vpack.c.bf16 %v5689_v22, %v5688_v37  ;;  %v5962_v22 = vld [vmem:[#allocation7 + $0x470] sm:$0xff] }
 0x5ae   : > { %8693 = vmatprep.mubr.f32.mxu1 %v11651_v19  ;;  %9416 = vmatpush3.bf16.msra.mxu1 %v9413_v42  ;;  %v5948_v19 = vld [vmem:[#allocation7 + $0x400] sm:$0xff]  ;;  %v5957_v42 = vld [vmem:[#allocation7 + $0x448] sm:$0xff] }
 0x5af   : > { %9418 = vmatprep.subr.bf16.mxu1 %v9417_v46 }
 0x5b1   : > { %8694 = vmatmul.mubr.f32.gmra.mrb[8].mxu1 %v11648_v2  ;;  %v9433_v2 = vpack.c.bf16 %v5949_v47, %v5948_v19  ;;  %v13121_v19 = vld [vmem:[#allocation15_spill] sm:$0xff]  ;;  %v13122_v47 = vld [vmem:[#allocation17_spill] sm:$0xff] }
 0x5b2   : > { %8696 = vmatprep.mubr.f32.mxu1 %v11680_v58  ;;  %9420 = vmatpush3.bf16.msra.mxu1 %v9417_v46  ;;  %v13109_v58 = vld [vmem:[#allocation29_spill] sm:$0xff]  ;;  %v9449_v46 = vpack.c.bf16 %v5957_v42, %v5956_v13 }
 0x5b3   : > { %9422 = vmatprep.subr.bf16.mxu1 %v9421_v31 }
 0x5b5   : > { %8697 = vmatmul.mubr.f32.gmra.mrb[10].mxu1 %v11677_v62  ;;  %v13108_v62 = vld [vmem:[#allocation25_spill] sm:$0xff] }
 0x5b6   : > { %8699 = vmatprep.mubr.f32.mxu1 %v11709_v0  ;;  %9424 = vmatpush3.bf16.msra.mxu1 %v9421_v31  ;;  %v13111_v0 = vld [vmem:[#allocation34_spill] sm:$0xff]  ;;  %v13120_v31 = vld [vmem:[#allocation12_spill] sm:$0xff] }
 0x5b7   : > { %9426 = vmatprep.subr.bf16.mxu1 %v9425_v9 }
 0x5b9   : > { %8700 = vmatmul.mubr.f32.gmra.mrb[12].mxu1 %v11706_v48  ;;  %v13110_v48 = vld [vmem:[#allocation28_spill] sm:$0xff] }
 0x5ba   : > { %8702 = vmatprep.mubr.f32.mxu1 %v11738_v12  ;;  %9428 = vmatpush3.bf16.msra.mxu1 %v9425_v9  ;;  %v5950_v12 = vld [vmem:[#allocation7 + $0x410] sm:$0xff]  ;;  %v5961_v9 = vld [vmem:[#allocation7 + $0x468] sm:$0xff] }
 0x5bb   : > { %9430 = vmatprep.subr.bf16.mxu1 %v9429_v20  ;;  %v9457_v37 = vpack.c.bf16 %v5961_v9, %v5960_v35 }
 0x5bd   : > { %8703 = vmatmul.mubr.f32.gmra.mrb[14].mxu1 %v11735_v6  ;;  %v13112_v6 = vld [vmem:[#allocation32_spill] sm:$0xff] }
 0x5be   : > { %8705 = vmatprep.mubr.f32.mxu1 %v11765_v38  ;;  %9432 = vmatpush3.bf16.msra.mxu1 %v9429_v20  ;;  %v13113_v38 = vld [vmem:[#allocation44_spill] sm:$0xff]  ;;  %v5963_v20 = vld [vmem:[#allocation7 + $0x478] sm:$0xff] }
 0x5bf   : > { %9434 = vmatprep.subr.bf16.mxu1 %v9433_v2 }
 0x5c1   : > { %8706 = vmatmul.mubr.f32.gmra.mrb[16].mxu1 %v11762_v23  ;;  %v5951_v23 = vld [vmem:[#allocation7 + $0x418] sm:$0xff] }
 0x5c2   : > { %8708 = vmatprep.mubr.f32.mxu1 %v11791_v24  ;;  %v5952_v24 = vld [vmem:[#allocation7 + $0x420] sm:$0xff] }
 0x5c5   : > { %8709 = vmatmul.mubr.f32.gmra.mrb[18].mxu1 %v11788_v52  ;;  %v9437_v52 = vpack.c.bf16 %v5951_v23, %v5950_v12  ;;  %v13132_v12 = vld [vmem:[#allocation35_spill] sm:$0xff]  ;;  %v13133_v23 = vld [vmem:[#allocation38_spill] sm:$0xff] }
 0x5c6   : > { %8711 = vmatprep.mubr.f32.mxu1 %v11815_v1  ;;  %v13114_v1 = vld [vmem:[#allocation45_spill] sm:$0xff] }
 0x5c9   : > { %8712 = vmatmul.mubr.f32.gmra.mrb[20].mxu1 %v11812_v10  ;;  %v5953_v10 = vld [vmem:[#allocation7 + $0x428] sm:$0xff] }
 0x5ca   : > { %8714 = vmatprep.mubr.f32.mxu1 %v11835_v7  ;;  %v13115_v7 = vld [vmem:[#allocation48_spill] sm:$0xff] }
 0x5cd   : > { %8715 = vmatmul.mubr.f32.gmra.mrb[22].mxu1 %v13108_v62  ;;  %v13126_v62 = vld [vmem:[#allocation23_spill] sm:$0xff] }
 0x5ce   : > { %8717 = vmatprep.mubr.f32.mxu1 %v13109_v58  ;;  %v13127_v58 = vld [vmem:[#allocation24_spill] sm:$0xff] }
 0x5d1   : > { %8718 = vmatmul.mubr.f32.gmra.mrb[24].mxu1 %v13110_v48  ;;  %v13128_v48 = vld [vmem:[#allocation26_spill] sm:$0xff] }
 0x5d2   : > { %8720 = vmatprep.mubr.f32.mxu1 %v13111_v0 }
 0x5d5   : > { %8721 = vmatmul.mubr.f32.gmra.mrb[26].mxu1 %v13112_v6 }
 0x5d6   : > { %8723 = vmatprep.mubr.f32.mxu1 %v12151_v53  ;;  %v9441_v53 = vpack.c.bf16 %v5953_v10, %v5952_v24  ;;  %v13136_v24 = vld [vmem:[#allocation41_spill] sm:$0xff]  ;;  %v13137_v10 = vld [vmem:[#allocation43_spill] sm:$0xff] }
 0x5d9   : > { %8724 = vmatmul.mubr.f32.gmra.mrb[28].mxu1 %v12156_v44  ;;  %v5955_v44 = vld [vmem:[#allocation7 + $0x438] sm:$0xff] }
 0x5da   : > { %8726 = vmatprep.mubr.f32.mxu1 %v13111_v0  ;;  %v9445_v34 = vpack.c.bf16 %v5955_v44, %v5954_v4  ;;  %v13130_v0 = vld [vmem:[#allocation30_spill] sm:$0xff] }
 0x5dd   : > { %8727 = vmatmul.mubr.f32.gmra.mrb[30].mxu1 %v13112_v6  ;;  %v13131_v6 = vld [vmem:[#allocation31_spill] sm:$0xff] }
 0x5de   : > { %8761 = vmatprep.mubr.f32.mxu1 %v13113_v38  ;;  %v13134_v38 = vld [vmem:[#allocation39_spill] sm:$0xff] }
 0x5e1   : > { %8762 = vmatmul.mubr.f32.vlgmr.msra.gmra.mrb[0].mxu1 %v13114_v1  ;;  %v13138_v1 = vld [vmem:[#allocation51_spill] sm:$0xff] }
 0x5e2   : > { %8764 = vmatprep.mubr.f32.mxu1 %v13115_v7  ;;  %9436 = vmatpush3.bf16.msra.mxu1 %v9433_v2  ;;  %v13123_v2 = vld [vmem:[#allocation18_spill] sm:$0xff]  ;;  %v13139_v7 = vld [vmem:[#allocation53_spill] sm:$0xff] }
 0x5e3   : > { %9438 = vmatprep.subr.bf16.mxu1 %v9437_v52 }
 0x5e5   : > { %8765 = vmatmul.mubr.f32.gmra.mrb[2].mxu1 %v13116_v27 }
 0x5e6   : > { %8767 = vmatprep.mubr.f32.mxu1 %v13117_v18  ;;  %9440 = vmatpush3.bf16.msra.mxu1 %v9437_v52  ;;  %v13135_v52 = vld [vmem:[#allocation40_spill] sm:$0xff] }
 0x5e7   : > { %9442 = vmatprep.subr.bf16.mxu1 %v9441_v53 }
 0x5e9   : > { %8768 = vmatmul.mubr.f32.gmra.mrb[4].mxu1 %v13118_v15 }
 0x5ea   : > { %8770 = vmatprep.mubr.f32.mxu1 %v13119_v63  ;;  %9444 = vmatpush3.bf16.msra.mxu1 %v9441_v53 }
 0x5eb   : > { %9446 = vmatprep.subr.bf16.mxu1 %v9445_v34 }
 0x5ed   : > { %8771 = vmatmul.mubr.f32.gmra.mrb[6].mxu1 %v13075_v41  ;;  %v9461_v41 = vpack.c.bf16 %v5963_v20, %v5962_v22 }
 0x5ee   : > { %8773 = vmatprep.mubr.f32.mxu1 %v13120_v31  ;;  %9448 = vmatpush3.bf16.msra.mxu1 %v9445_v34 }
 0x5ef   : > { %9450 = vmatprep.subr.bf16.mxu1 %v9449_v46 }
 0x5f1   : > { %8774 = vmatmul.mubr.f32.gmra.mrb[8].mxu1 %v13077_v50  ;;  %v13124_v50 = vld [vmem:[#allocation20_spill] sm:$0xff] }
 0x5f2   : > { %8776 = vmatprep.mubr.f32.mxu1 %v13078_v51  ;;  %9452 = vmatpush3.bf16.msra.mxu1 %v9449_v46  ;;  %v13125_v51 = vld [vmem:[#allocation22_spill] sm:$0xff] }
 0x5f3   : > { %9454 = vmatprep.subr.bf16.mxu1 %v9453_v32 }
 0x5f5   : > { %8777 = vmatmul.mubr.f32.gmra.mrb[10].mxu1 %v13121_v19 }
 0x5f6   : > { %8779 = vmatprep.mubr.f32.mxu1 %v13080_v26  ;;  %9456 = vmatpush3.bf16.msra.mxu1 %v9453_v32  ;;  %v13129_v26 = vld [vmem:[#allocation27_spill] sm:$0xff] }
 0x5f7   : > { %9458 = vmatprep.subr.bf16.mxu1 %v9457_v37 }
 0x5f9   : > { %8780 = vmatmul.mubr.f32.gmra.mrb[12].mxu1 %v13122_v47 }
 0x5fa   : > { %8782 = vmatprep.mubr.f32.mxu1 %v13123_v2  ;;  %9460 = vmatpush3.bf16.msra.mxu1 %v9457_v37 }
 0x5fb   : > { %9462 = vmatprep.subr.bf16.mxu1 %v9461_v41 }
 0x5fd   : > { %8783 = vmatmul.mubr.f32.gmra.mrb[14].mxu1 %v13124_v50 }
 0x5fe   : > { %8785 = vmatprep.mubr.f32.mxu1 %v13125_v51  ;;  %9464 = vmatpush3.bf16.msra.mxu1 %v9461_v41 }
 0x601   : > { %8786 = vmatmul.mubr.f32.gmra.mrb[16].mxu1 %v13126_v62 }
 0x602   : > { %8788 = vmatprep.mubr.f32.mxu1 %v13127_v58 }
 0x605   : > { %8789 = vmatmul.mubr.f32.gmra.mrb[18].mxu1 %v13128_v48 }
 0x606   : > { %8791 = vmatprep.mubr.f32.mxu1 %v13129_v26 }
 0x609   : > { %8792 = vmatmul.mubr.f32.gmra.mrb[20].mxu1 %v13130_v0 }
 0x60a   : > { %8794 = vmatprep.mubr.f32.mxu1 %v13131_v6 }
 0x60d   : > { %8795 = vmatmul.mubr.f32.gmra.mrb[22].mxu1 %v13132_v12 }
 0x60e   : > { %8797 = vmatprep.mubr.f32.mxu1 %v13133_v23 }
 0x611   : > { %8798 = vmatmul.mubr.f32.gmra.mrb[24].mxu1 %v13134_v38 }
 0x612   : > { %8800 = vmatprep.mubr.f32.mxu1 %v13135_v52 }
 0x615   : > { %8801 = vmatmul.mubr.f32.gmra.mrb[26].mxu1 %v13136_v24 }
 0x616   : > { %8803 = vmatprep.mubr.f32.mxu1 %v13137_v10 }
 0x619   : > { %8804 = vmatmul.mubr.f32.gmra.mrb[28].mxu1 %v12203_v39 }
 0x61a   : > { %8806 = vmatprep.mubr.f32.mxu1 %v13135_v52 }
 0x61d   : > { %8807 = vmatmul.mubr.f32.gmra.mrb[30].mxu1 %v13136_v24 }
 0x61e   : > { %8841 = vmatprep.mubr.f32.mxu1 %v13098_v8 }
 0x621   : > { %8842 = vmatmul.mubr.f32.vlgmr.msra.gmra.mrb[0].mxu1 %v13099_v5 }
 0x622   : > { %8844 = vmatprep.mubr.f32.mxu1 %v13138_v1 }
 0x625   : > { %8845 = vmatmul.mubr.f32.gmra.mrb[2].mxu1 %v13100_v40 }
 0x626   : > { %8847 = vmatprep.mubr.f32.mxu1 %v13139_v7 }
 0x629   : > { %8848 = vmatmul.mubr.f32.gmra.mrb[4].mxu1 %v13101_v36 }
 0x62a   : > { %8850 = vmatprep.mubr.f32.mxu1 %v11988_v29  ;;  %v13140_v29 = vld [vmem:[#allocation58_spill] sm:$0xff] }
 0x62d   : > { %8851 = vmatmul.mubr.f32.gmra.mrb[6].mxu1 %v13102_v55 }
 0x62e   : > { %8853 = vmatprep.mubr.f32.mxu1 %v11999_v33  ;;  %v13141_v33 = vld [vmem:[#allocation59_spill] sm:$0xff] }
 0x631   : > { %8854 = vmatmul.mubr.f32.gmra.mrb[8].mxu1 %v12005_v17  ;;  %v13142_v17 = vld [vmem:[#allocation60_spill] sm:$0xff] }
 0x632   : > { %8856 = vmatprep.mubr.f32.mxu1 %v12010_v61  ;;  %v13143_v61 = vld [vmem:[#allocation61_spill] sm:$0xff] }
 0x635   : > { %8857 = vmatmul.mubr.f32.gmra.mrb[10].mxu1 %v12018_v30  ;;  %v13144_v30 = vld [vmem:[#allocation47_spill] sm:$0xff] }
 0x636   : > { %8859 = vmatprep.mubr.f32.mxu1 %v12023_v16 }
 0x639   : > { %8860 = vmatmul.mubr.f32.gmra.mrb[12].mxu1 %v12030_v14 }
 0x63a   : > { %8862 = vmatprep.mubr.f32.mxu1 %v12035_v59 }
 0x63d   : > { %8863 = vmatmul.mubr.f32.gmra.mrb[14].mxu1 %v12041_v11 }
 0x63e   : > { %8865 = vmatprep.mubr.f32.mxu1 %v12046_v25 }
 0x641   : > { %8866 = vmatmul.mubr.f32.gmra.mrb[16].mxu1 %v12052_v3 }
 0x642   : > { %8868 = vmatprep.mubr.f32.mxu1 %v13103_v43 }
 0x645   : > { %8869 = vmatmul.mubr.f32.gmra.mrb[18].mxu1 %v12063_v28 }
 0x646   : > { %8871 = vmatprep.mubr.f32.mxu1 %v13104_v45 }
 0x649   : > { %8872 = vmatmul.mubr.f32.gmra.mrb[20].mxu1 %v12074_v57 }
 0x64a   : > { %8874 = vmatprep.mubr.f32.mxu1 %v13105_v21 }
 0x64d   : > { %8875 = vmatmul.mubr.f32.gmra.mrb[22].mxu1 %v13140_v29 }
 0x64e   : > { %8877 = vmatprep.mubr.f32.mxu1 %v13141_v33 }
 0x651   : > { %8878 = vmatmul.mubr.f32.gmra.mrb[24].mxu1 %v13142_v17 }
 0x652   : > { %8880 = vmatprep.mubr.f32.mxu1 %v13143_v61 }
 0x655   : > { %8881 = vmatmul.mubr.f32.gmra.mrb[26].mxu1 %v12105_v49 }
 0x656   : > { %8883 = vmatprep.mubr.f32.mxu1 %v13144_v30 }
 0x659   : > { %8884 = vmatmul.mubr.f32.gmra.mrb[28].mxu1 %v12244_v60 }
 0x65a   : > { %8886 = vmatprep.mubr.f32.mxu1 %v13143_v61 }
 0x65d   : > { %8887 = vmatmul.mubr.f32.gmra.mrb[30].mxu1 %v12105_v49 }
 0x6f4   : > { %v12343_v16 = vpop.f32.mrb[0].mxu1 }
 0x6f5   : > { %v12345_v14 = vpop.f32.mrb[1].mxu1 }
 0x6f6   : > { %v6221_v59 = vadd.f32 %v12343_v16, %v12345_v14 }
 0x6f8   : > { %v12349_v11 = vpop.f32.mrb[2].mxu1 }
 0x6f9   : > { %v12351_v25 = vpop.f32.mrb[3].mxu1 }
 0x6fa   : > { %v6222_v3 = vadd.f32 %v6221_v59, %v12351_v25 }
 0x6fc   : > { %v12354_v28 = vpop.f32.mrb[4].mxu1  ;;  %v6223_v57 = vadd.f32 %v12349_v11, %v6222_v3 }
 0x6fd   : > { %v12357_v39 = vpop.f32.mrb[5].mxu1 }
 0x6fe   : > { %v6224_v49 = vadd.f32 %v6223_v57, %v12357_v39 }
 0x700   : > { %v12360_v8 = vpop.f32.mrb[6].mxu1  ;;  %v6225_v5 = vadd.f32 %v12354_v28, %v6224_v49 }
 0x701   : > { %v12363_v40 = vpop.f32.mrb[7].mxu1 }
 0x702   : > { %v6226_v36 = vadd.f32 %v6225_v5, %v12363_v40 }
 0x704   : > { %v12366_v55 = vpop.f32.mrb[8].mxu1  ;;  %v6227_v43 = vadd.f32 %v12360_v8, %v6226_v36 }
 0x705   : > { %v6070_v45 = vpop.f32.mrb[9].mxu1 }
 0x706   : > { %v6228_v21 = vadd.f32 %v6227_v43, %v6070_v45 }
 0x708   : > { %v12369_v60 = vpop.f32.mrb[10].mxu1  ;;  %v6229_v53 = vadd.f32 %v12366_v55, %v6228_v21 }
 0x709   : > { %v6080_v4 = vpop.f32.mrb[11].mxu1 }
 0x70a   : > { %v6230_v44 = vadd.f32 %v6229_v53, %v6080_v4 }
 0x70c   : > { %v8861_v27 = vpop.f32.mrb[12].mxu1  ;;  %v6231_v18 = vadd.f32 %v12369_v60, %v6230_v44 }
 0x70d   : > { %v6090_v34 = vpop.f32.mrb[13].mxu1 }
 0x70e   : > { %v6232_v13 = vadd.f32 %v6231_v18, %v6090_v34 }
 0x710   : > { %v8864_v42 = vpop.f32.mrb[14].mxu1  ;;  %v6233_v15 = vadd.f32 %v8861_v27, %v6232_v13 }
 0x711   : > { %v6100_v63 = vpop.f32.mrb[15].mxu1 }
 0x712   : > { %v6234_v46 = vadd.f32 %v6233_v15, %v6100_v63 }
 0x714   : > { %v8867_v56 = vpop.f32.mrb[16].mxu1  ;;  %v6235_v54 = vadd.f32 %v8864_v42, %v6234_v46 }
 0x715   : > { %v6110_v31 = vpop.f32.mrb[17].mxu1 }
 0x716   : > { %v6236_v32 = vadd.f32 %v6235_v54, %v6110_v31 }
 0x718   : > { %v8870_v35 = vpop.f32.mrb[18].mxu1  ;;  %v6237_v9 = vadd.f32 %v8867_v56, %v6236_v32 }
 0x719   : > { %v6120_v37 = vpop.f32.mrb[19].mxu1 }
 0x71a   : > { %v6238_v22 = vadd.f32 %v6237_v9, %v6120_v37 }
 0x71c   : > { %v8873_v20 = vpop.f32.mrb[20].mxu1  ;;  %v6239_v19 = vadd.f32 %v8870_v35, %v6238_v22 }
 0x71d   : > { %v6130_v41 = vpop.f32.mrb[21].mxu1 }
 0x71e   : > { %v6240_v47 = vadd.f32 %v6239_v19, %v6130_v41 }
 0x720   : > { %v8876_v2 = vpop.f32.mrb[22].mxu1  ;;  %v6241_v50 = vadd.f32 %v8873_v20, %v6240_v47 }
 0x721   : > { %v6140_v51 = vpop.f32.mrb[23].mxu1 }
 0x722   : > { %v6242_v62 = vadd.f32 %v6241_v50, %v6140_v51 }
 0x724   : > { %v8879_v58 = vpop.f32.mrb[24].mxu1  ;;  %v6243_v48 = vadd.f32 %v8876_v2, %v6242_v62 }
 0x725   : > { %v6150_v26 = vpop.f32.mrb[25].mxu1 }
 0x726   : > { %v6244_v0 = vadd.f32 %v6243_v48, %v6150_v26 }
 0x728   : > { %v8882_v6 = vpop.f32.mrb[26].mxu1  ;;  %v6245_v12 = vadd.f32 %v8879_v58, %v6244_v0 }
 0x729   : > { %v6160_v23 = vpop.f32.mrb[27].mxu1 }
 0x72a   : > { %v6246_v38 = vadd.f32 %v6245_v12, %v6160_v23 }
 0x72c   : > { %v8885_v52 = vpop.f32.mrb[28].mxu1  ;;  %v6247_v24 = vadd.f32 %v8882_v6, %v6246_v38 }
 0x72d   : > { %v6170_v10 = vpop.f32.mrb[29].mxu1 }
 0x72e   : > { %v6248_v1 = vadd.f32 %v6247_v24, %v6170_v10 }
 0x730   : > { %v8888_v7 = vpop.f32.mrb[30].mxu1  ;;  %v6249_v29 = vadd.f32 %v8885_v52, %v6248_v1 }
 0x731   : > { %v6180_v33 = vpop.f32.mrb[31].mxu1 }
 0x732   : > { %v6250_v17 = vadd.f32 %v6249_v29, %v6180_v33 }
 0x734   : > { %v6251_v61 = vadd.f32 %v8888_v7, %v6250_v17 }
 0x736   : > { %v6252_v30 = vrot.slane %v6251_v61, 4 }
 0x738   : > { %v6253_v59 = vadd.f32 %v6252_v30, %v6251_v61 }
 0x73a   : > { %v6254_v3 = vrot.slane %v6253_v59, 2 }
 0x73c   : > { %v6255_v57 = vadd.f32 %v6254_v3, %v6253_v59 }
 0x73e   : > { %v6256_v49 = vrot.slane %v6255_v57, 1 }
 0x740   : > { %v6257_v5 = vadd.f32 %v6256_v49, %v6255_v57 }
 0x742   : > { %v6258_v36 = vmul.f32 0.00390625, %v6257_v5 }
 0x744   : > { %v12374_v43 = vsub.f32 %v12345_v14, %v6258_v36  ;;  %v12377_v21 = vsub.f32 %v12343_v16, %v6258_v36  ;;  %v12380_v53 = vsub.f32 %v12351_v25, %v6258_v36  ;;  %v12383_v44 = vsub.f32 %v12349_v11, %v6258_v36 }
 0x745   : > { %v12386_v18 = vsub.f32 %v12357_v39, %v6258_v36  ;;  %v12389_v13 = vsub.f32 %v12354_v28, %v6258_v36  ;;  %v12392_v15 = vsub.f32 %v12363_v40, %v6258_v36  ;;  %v12395_v14 = vsub.f32 %v12360_v8, %v6258_v36 }
 0x746   : > { %v12397_v16 = vsub.f32 %v6070_v45, %v6258_v36  ;;  %v12400_v25 = vsub.f32 %v12366_v55, %v6258_v36  ;;  %v12402_v46 = vsub.f32 %v6080_v4, %v6258_v36  ;;  %v12405_v11 = vsub.f32 %v12369_v60, %v6258_v36 }
 0x747   : > { %v12407_v39 = vsub.f32 %v6090_v34, %v6258_v36  ;;  %v12409_v28 = vsub.f32 %v8861_v27, %v6258_v36  ;;  %v12411_v54 = vsub.f32 %v6100_v63, %v6258_v36  ;;  %v12413_v40 = vsub.f32 %v8864_v42, %v6258_v36 }
 0x748   : > { %v12415_v8 = vsub.f32 %v6110_v31, %v6258_v36  ;;  %v12417_v45 = vsub.f32 %v8867_v56, %v6258_v36  ;;  %v12419_v32 = vsub.f32 %v6120_v37, %v6258_v36  ;;  %v12421_v55 = vsub.f32 %v8870_v35, %v6258_v36 }
 0x749   : > { %v12423_v4 = vsub.f32 %v6130_v41, %v6258_v36  ;;  %v12425_v60 = vsub.f32 %v8873_v20, %v6258_v36  ;;  %v12427_v34 = vsub.f32 %v6140_v51, %v6258_v36  ;;  %v12429_v27 = vsub.f32 %v8876_v2, %v6258_v36 }
 0x74a   : > { %v12431_v63 = vsub.f32 %v6150_v26, %v6258_v36  ;;  %v12433_v42 = vsub.f32 %v8879_v58, %v6258_v36  ;;  %v12435_v31 = vsub.f32 %v6160_v23, %v6258_v36  ;;  %v12437_v56 = vsub.f32 %v8882_v6, %v6258_v36 }
 0x74b   : > { %v12439_v9 = vsub.f32 %v6170_v10, %v6258_v36  ;;  %v12441_v35 = vsub.f32 %v8885_v52, %v6258_v36  ;;  %v12443_v37 = vsub.f32 %v6180_v33, %v6258_v36  ;;  %v12445_v22 = vsub.f32 %v8888_v7, %v6258_v36 }
 0x74c   : > { %v6291_v20 = vmul.f32 %v12374_v43, %v12374_v43  ;;  %v6292_v19 = vmul.f32 %v12377_v21, %v12377_v21  ;;  %v6293_v41 = vmul.f32 %v12380_v53, %v12380_v53  ;;  %v6294_v2 = vmul.f32 %v12383_v44, %v12383_v44 }
 0x74d   : > { %v6295_v51 = vmul.f32 %v12386_v18, %v12386_v18  ;;  %v6296_v58 = vmul.f32 %v12389_v13, %v12389_v13  ;;  %v6297_v26 = vmul.f32 %v12392_v15, %v12392_v15  ;;  %v6298_v6 = vmul.f32 %v12395_v14, %v12395_v14 }
 0x74e   : > { %v6323_v47 = vadd.f32 %v6292_v19, %v6291_v20  ;;  %v6299_v23 = vmul.f32 %v12397_v16, %v12397_v16  ;;  %v6300_v52 = vmul.f32 %v12400_v25, %v12400_v25  ;;  %v6301_v10 = vmul.f32 %v12402_v46, %v12402_v46 }
 0x74f   : > { %v6302_v7 = vmul.f32 %v12405_v11, %v12405_v11  ;;  %v6303_v33 = vmul.f32 %v12407_v39, %v12407_v39  ;;  %v6304_v61 = vmul.f32 %v12409_v28, %v12409_v28  ;;  %v6305_v59 = vmul.f32 %v12411_v54, %v12411_v54 }
 0x750   : > { %v6324_v50 = vadd.f32 %v6323_v47, %v6293_v41  ;;  %v6306_v57 = vmul.f32 %v12413_v40, %v12413_v40  ;;  %v6307_v5 = vmul.f32 %v12415_v8, %v12415_v8  ;;  %v6308_v20 = vmul.f32 %v12417_v45, %v12417_v45 }
 0x751   : > { %v6309_v41 = vmul.f32 %v12419_v32, %v12419_v32 }
 0x752   : > { %v6325_v62 = vadd.f32 %v6324_v50, %v6294_v2  ;;  %v6310_v2 = vmul.f32 %v12421_v55, %v12421_v55 }
 0x754   : > { %v6326_v48 = vadd.f32 %v6325_v62, %v6295_v51  ;;  %v6311_v51 = vmul.f32 %v12423_v4, %v12423_v4 }
 0x756   : > { %v6327_v0 = vadd.f32 %v6326_v48, %v6296_v58  ;;  %v6312_v58 = vmul.f32 %v12425_v60, %v12425_v60 }
 0x758   : > { %v6328_v12 = vadd.f32 %v6327_v0, %v6297_v26  ;;  %v6313_v26 = vmul.f32 %v12427_v34, %v12427_v34 }
 0x75a   : > { %v6329_v38 = vadd.f32 %v6328_v12, %v6298_v6  ;;  %v6314_v6 = vmul.f32 %v12429_v27, %v12429_v27 }
 0x75c   : > { %v6330_v24 = vadd.f32 %v6329_v38, %v6299_v23  ;;  %v6315_v23 = vmul.f32 %v12431_v63, %v12431_v63 }
 0x75e   : > { %v6331_v1 = vadd.f32 %v6330_v24, %v6300_v52  ;;  %v6316_v52 = vmul.f32 %v12433_v42, %v12433_v42 }
 0x760   : > { %v6332_v29 = vadd.f32 %v6331_v1, %v6301_v10  ;;  %v6317_v10 = vmul.f32 %v12435_v31, %v12435_v31 }
 0x762   : > { %v6333_v17 = vadd.f32 %v6332_v29, %v6302_v7  ;;  %v6318_v7 = vmul.f32 %v12437_v56, %v12437_v56 }
 0x764   : > { %v6334_v30 = vadd.f32 %v6333_v17, %v6303_v33  ;;  %v6319_v33 = vmul.f32 %v12439_v9, %v12439_v9 }
 0x766   : > { %v6335_v3 = vadd.f32 %v6334_v30, %v6304_v61  ;;  %v6320_v61 = vmul.f32 %v12441_v35, %v12441_v35 }
 0x768   : > { %v6336_v49 = vadd.f32 %v6335_v3, %v6305_v59  ;;  %v6321_v59 = vmul.f32 %v12443_v37, %v12443_v37 }
 0x76a   : > { %v6337_v36 = vadd.f32 %v6336_v49, %v6306_v57  ;;  %v6322_v57 = vmul.f32 %v12445_v22, %v12445_v22 }
 0x76c   : > { %v6338_v19 = vadd.f32 %v6337_v36, %v6307_v5 }
 0x76e   : > { %v6339_v47 = vadd.f32 %v6338_v19, %v6308_v20 }
 0x770   : > { %v6340_v50 = vadd.f32 %v6339_v47, %v6309_v41 }
 0x772   : > { %v6341_v62 = vadd.f32 %v6340_v50, %v6310_v2 }
 0x774   : > { %v6342_v48 = vadd.f32 %v6341_v62, %v6311_v51 }
 0x776   : > { %v6343_v0 = vadd.f32 %v6342_v48, %v6312_v58 }
 0x778   : > { %v6344_v12 = vadd.f32 %v6343_v0, %v6313_v26 }
 0x77a   : > { %v6345_v38 = vadd.f32 %v6344_v12, %v6314_v6 }
 0x77c   : > { %v6346_v24 = vadd.f32 %v6345_v38, %v6315_v23 }
 0x77e   : > { %v6347_v1 = vadd.f32 %v6346_v24, %v6316_v52  ;;  %v10052_v52 = vld [vmem:[%s10457_s28 + $0xf0] sm:$0xff] }
 0x780   : > { %v6348_v29 = vadd.f32 %v6347_v1, %v6317_v10  ;;  %v10056_v1 = vld [vmem:[%s10457_s28 + $0x18] sm:$0xff] }
 0x782   : > { %v6349_v17 = vadd.f32 %v6348_v29, %v6318_v7  ;;  %v10057_v7 = vld [vmem:[%s10457_s28 + $0x20] sm:$0xff]  ;;  %v10058_v29 = vld [vmem:[%s10457_s28 + $0x28] sm:$0xff] }
 0x784   : > { %v6350_v30 = vadd.f32 %v6349_v17, %v6319_v33  ;;  %v10059_v33 = vld [vmem:[%s10457_s28 + $0x30] sm:$0xff] }
 0x786   : > { %v6351_v3 = vadd.f32 %v6350_v30, %v6320_v61  ;;  %v10060_v61 = vld [vmem:[%s10457_s28 + $0x38] sm:$0xff] }
 0x788   : > { %v6352_v49 = vadd.f32 %v6351_v3, %v6321_v59  ;;  %v10061_v59 = vld [vmem:[%s10457_s28 + $0x40] sm:$0xff] }
 0x78a   : > { %v6353_v5 = vadd.f32 %v6352_v49, %v6322_v57  ;;  %v10062_v57 = vld [vmem:[%s10457_s28 + $0x48] sm:$0xff] }
 0x78c   : > { %v6354_v36 = vrot.slane %v6353_v5, 4 }
 0x78e   : > { %v6355_v20 = vadd.f32 %v6354_v36, %v6353_v5  ;;  %v10063_v5 = vld [vmem:[%s10457_s28 + $0x50] sm:$0xff] }
 0x790   : > { %v6356_v19 = vrot.slane %v6355_v20, 2 }
 0x792   : > { %v6357_v41 = vadd.f32 %v6356_v19, %v6355_v20  ;;  %v10064_v20 = vld [vmem:[%s10457_s28 + $0x58] sm:$0xff] }
 0x794   : > { %v6358_v47 = vrot.slane %v6357_v41, 1 }
 0x796   : > { %v6359_v2 = vadd.f32 %v6358_v47, %v6357_v41  ;;  %v10065_v41 = vld [vmem:[%s10457_s28 + $0x60] sm:$0xff] }
 0x798   : > { %v6360_v50 = vmul.f32 0.00390625, %v6359_v2  ;;  %v10066_v2 = vld [vmem:[%s10457_s28 + $0x68] sm:$0xff] }
 0x79a   : > { %v6361_v51 = vadd.f32 1e-05, %v6360_v50 }
 0x79c   : > { %10050 = vrsqrt.f32 %v6361_v51  ;;  %v10067_v51 = vld [vmem:[%s10457_s28 + $0x70] sm:$0xff] }
 0x7a6   : > { %v10051_v62 = vpop.eup %10050 }
 0x7a7   : > { %v6393_v58 = vmul.f32 %v10051_v62, %v12443_v37  ;;  %v6363_v48 = vmul.f32 %v10051_v62, %v12374_v43  ;;  %v6364_v26 = vmul.f32 %v10051_v62, %v12377_v21  ;;  %v6365_v0 = vmul.f32 %v10051_v62, %v12380_v53 }
 0x7a8   : > { %v6366_v6 = vmul.f32 %v10051_v62, %v12383_v44  ;;  %v6367_v12 = vmul.f32 %v10051_v62, %v12386_v18  ;;  %v6368_v23 = vmul.f32 %v10051_v62, %v12389_v13  ;;  %v6369_v38 = vmul.f32 %v10051_v62, %v12392_v15 }
 0x7a9   : > { %v6425_v24 = vadd.f32 %v10052_v52, %v6393_v58  ;;  %v6370_v10 = vmul.f32 %v10051_v62, %v12395_v14  ;;  %v6371_v37 = vmul.f32 %v10051_v62, %v12397_v16  ;;  %v6372_v43 = vmul.f32 %v10051_v62, %v12400_v25  ;;  %v10068_v58 = vld [vmem:[%s10457_s28 + $0x78] sm:$0xff] }
 0x7aa   : > { %v6373_v21 = vmul.f32 %v10051_v62, %v12402_v46  ;;  %v6374_v53 = vmul.f32 %v10051_v62, %v12405_v11  ;;  %v6375_v44 = vmul.f32 %v10051_v62, %v12407_v39  ;;  %v6376_v18 = vmul.f32 %v10051_v62, %v12409_v28  ;;  %v10072_v52 = vld [vmem:[%s10457_s28 + $0x98] sm:$0xff] }
 0x7ab   : > { %6457 = vst [vmem:[%s12529_s18 + $0xf0] sm:$0xff] %v6425_v24  ;;  %v6377_v13 = vmul.f32 %v10051_v62, %v12411_v54  ;;  %v6378_v15 = vmul.f32 %v10051_v62, %v12413_v40  ;;  %v6379_v14 = vmul.f32 %v10051_v62, %v12415_v8  ;;  %v6380_v16 = vmul.f32 %v10051_v62, %v12417_v45 }
 0x7ac   : > { %v6381_v25 = vmul.f32 %v10051_v62, %v12419_v32  ;;  %v12538_v46 = vmul.f32 %v10051_v62, %v12421_v55  ;;  %v12541_v11 = vmul.f32 %v10051_v62, %v12423_v4  ;;  %v12544_v39 = vmul.f32 %v10051_v62, %v12425_v60 }
 0x7ad   : > { %v12547_v28 = vmul.f32 %v10051_v62, %v12427_v34  ;;  %v12550_v54 = vmul.f32 %v10051_v62, %v12429_v27  ;;  %v12553_v40 = vmul.f32 %v10051_v62, %v12431_v63  ;;  %v12556_v8 = vmul.f32 %v10051_v62, %v12433_v42  ;;  %v10053_v34 = vld [vmem:[%s10457_s28] sm:$0xff]  ;;  %v10054_v63 = vld [vmem:[%s10457_s28 + $0x8] sm:$0xff] }
 0x7ae   : > { %v12559_v45 = vmul.f32 %v10051_v62, %v12435_v31  ;;  %v12562_v32 = vmul.f32 %v10051_v62, %v12437_v56  ;;  %v12565_v55 = vmul.f32 %v10051_v62, %v12439_v9  ;;  %v12568_v4 = vmul.f32 %v10051_v62, %v12441_v35  ;;  %v10055_v31 = vld [vmem:[%s10457_s28 + $0x10] sm:$0xff] }
 0x7af   : > { %v12571_v60 = vmul.f32 %v10051_v62, %v12445_v22  ;;  %v6395_v27 = vadd.f32 %v10053_v34, %v6363_v48  ;;  %v6396_v42 = vadd.f32 %v10054_v63, %v6364_v26  ;;  %v6397_v56 = vadd.f32 %v10055_v31, %v6365_v0  ;;  %v10069_v26 = vld [vmem:[%s10457_s28 + $0x80] sm:$0xff]  ;;  %v10083_v34 = vld [vmem:[%s10457_s28 + $0xf8] sm:$0xff] }
 0x7b0   : > { %v6398_v9 = vadd.f32 %v10056_v1, %v6366_v6  ;;  %v6399_v35 = vadd.f32 %v10057_v7, %v6367_v12  ;;  %v6400_v22 = vadd.f32 %v10058_v29, %v6368_v23  ;;  %v6401_v17 = vadd.f32 %v10059_v33, %v6369_v38  ;;  %v10070_v6 = vld [vmem:[%s10457_s28 + $0x88] sm:$0xff]  ;;  %v10071_v23 = vld [vmem:[%s10457_s28 + $0x90] sm:$0xff] }
 0x7b1   : > { %v6402_v30 = vadd.f32 %v10060_v61, %v6370_v10  ;;  %v6403_v3 = vadd.f32 %v10061_v59, %v6371_v37  ;;  %v6404_v49 = vadd.f32 %v10062_v57, %v6372_v43  ;;  %v6405_v36 = vadd.f32 %v10063_v5, %v6373_v21  ;;  %6427 = vst [vmem:[%s12529_s18] sm:$0xff] %v6395_v27  ;;  %v10073_v10 = vld [vmem:[%s10457_s28 + $0xa0] sm:$0xff]  ;;  %v10074_v43 = vld [vmem:[%s10457_s28 + $0xa8] sm:$0xff] }
 0x7b2   : > { %6428 = vst [vmem:[%s12529_s18 + $0x8] sm:$0xff] %v6396_v42  ;;  %6429 = vst [vmem:[%s12529_s18 + $0x10] sm:$0xff] %v6397_v56  ;;  %v6406_v19 = vadd.f32 %v10064_v20, %v6374_v53  ;;  %v6407_v47 = vadd.f32 %v10065_v41, %v6375_v44  ;;  %v6408_v50 = vadd.f32 %v10066_v2, %v6376_v18  ;;  %v10075_v53 = vld [vmem:[%s10457_s28 + $0xb0] sm:$0xff]  ;;  %v10076_v18 = vld [vmem:[%s10457_s28 + $0xb8] sm:$0xff] }
 0x7b3   : > { %v6409_v62 = vadd.f32 %v10067_v51, %v6377_v13  ;;  %6430 = vst [vmem:[%s12529_s18 + $0x18] sm:$0xff] %v6398_v9  ;;  %6431 = vst [vmem:[%s12529_s18 + $0x20] sm:$0xff] %v6399_v35  ;;  %v6410_v48 = vadd.f32 %v10068_v58, %v6378_v15  ;;  %v6411_v0 = vadd.f32 %v10069_v26, %v6379_v14  ;;  %v10077_v15 = vld [vmem:[%s10457_s28 + $0xc0] sm:$0xff] }
 0x7b4   : > { %6432 = vst [vmem:[%s12529_s18 + $0x28] sm:$0xff] %v6400_v22  ;;  %6433 = vst [vmem:[%s12529_s18 + $0x30] sm:$0xff] %v6401_v17  ;;  %v6412_v12 = vadd.f32 %v10070_v6, %v6380_v16  ;;  %v6413_v38 = vadd.f32 %v10071_v23, %v6381_v25  ;;  %v6414_v24 = vadd.f32 %v10072_v52, %v12538_v46  ;;  %v10078_v16 = vld [vmem:[%s10457_s28 + $0xc8] sm:$0xff]  ;;  %v10079_v46 = vld [vmem:[%s10457_s28 + $0xd0] sm:$0xff] }
 0x7b5   : > { %6434 = vst [vmem:[%s12529_s18 + $0x38] sm:$0xff] %v6402_v30  ;;  %6435 = vst [vmem:[%s12529_s18 + $0x40] sm:$0xff] %v6403_v3  ;;  %v6415_v37 = vadd.f32 %v10073_v10, %v12541_v11  ;;  %v6416_v21 = vadd.f32 %v10074_v43, %v12544_v39  ;;  %v6417_v44 = vadd.f32 %v10075_v53, %v12547_v28  ;;  %v10080_v39 = vld [vmem:[%s10457_s28 + $0xd8] sm:$0xff] }
 0x7b6   : > { %6436 = vst [vmem:[%s12529_s18 + $0x48] sm:$0xff] %v6404_v49  ;;  %6437 = vst [vmem:[%s12529_s18 + $0x50] sm:$0xff] %v6405_v36  ;;  %v6418_v13 = vadd.f32 %v10076_v18, %v12550_v54  ;;  %v6419_v14 = vadd.f32 %v10077_v15, %v12553_v40  ;;  %v6420_v25 = vadd.f32 %v10078_v16, %v12556_v8  ;;  %v10081_v54 = vld [vmem:[%s10457_s28 + $0xe0] sm:$0xff]  ;;  %v10082_v8 = vld [vmem:[%s10457_s28 + $0xe8] sm:$0xff] }
 0x7b7   : > { %6438 = vst [vmem:[%s12529_s18 + $0x58] sm:$0xff] %v6406_v19  ;;  %6439 = vst [vmem:[%s12529_s18 + $0x60] sm:$0xff] %v6407_v47  ;;  %v6421_v11 = vadd.f32 %v10079_v46, %v12559_v45  ;;  %v6422_v28 = vadd.f32 %v10080_v39, %v12562_v32  ;;  %v6423_v40 = vadd.f32 %v10081_v54, %v12565_v55 }
 0x7b8   : > { %6440 = vst [vmem:[%s12529_s18 + $0x68] sm:$0xff] %v6408_v50  ;;  %6441 = vst [vmem:[%s12529_s18 + $0x70] sm:$0xff] %v6409_v62  ;;  %v6424_v45 = vadd.f32 %v10082_v8, %v12568_v4  ;;  %v6426_v27 = vadd.f32 %v10083_v34, %v12571_v60 }
 0x7b9   : > { %6442 = vst [vmem:[%s12529_s18 + $0x78] sm:$0xff] %v6410_v48  ;;  %6443 = vst [vmem:[%s12529_s18 + $0x80] sm:$0xff] %v6411_v0 }
 0x7ba   : > { %6444 = vst [vmem:[%s12529_s18 + $0x88] sm:$0xff] %v6412_v12  ;;  %6445 = vst [vmem:[%s12529_s18 + $0x90] sm:$0xff] %v6413_v38 }
 0x7bb   : > { %6446 = vst [vmem:[%s12529_s18 + $0x98] sm:$0xff] %v6414_v24  ;;  %6447 = vst [vmem:[%s12529_s18 + $0xa0] sm:$0xff] %v6415_v37 }
 0x7bc   : > { %6448 = vst [vmem:[%s12529_s18 + $0xa8] sm:$0xff] %v6416_v21  ;;  %6449 = vst [vmem:[%s12529_s18 + $0xb0] sm:$0xff] %v6417_v44 }
 0x7bd   : > { %6450 = vst [vmem:[%s12529_s18 + $0xb8] sm:$0xff] %v6418_v13  ;;  %6451 = vst [vmem:[%s12529_s18 + $0xc0] sm:$0xff] %v6419_v14 }
 0x7be   : > { %6452 = vst [vmem:[%s12529_s18 + $0xc8] sm:$0xff] %v6420_v25  ;;  %6453 = vst [vmem:[%s12529_s18 + $0xd0] sm:$0xff] %v6421_v11 }
 0x7bf   : > { %6454 = vst [vmem:[%s12529_s18 + $0xd8] sm:$0xff] %v6422_v28  ;;  %6455 = vst [vmem:[%s12529_s18 + $0xe0] sm:$0xff] %v6423_v40 }
 0x7c0   : > { %6456 = vst [vmem:[%s12529_s18 + $0xe8] sm:$0xff] %v6424_v45  ;;  %6458 = vst [vmem:[%s12529_s18 + $0xf8] sm:$0xff] %v6426_v27 }
 0x7c1   : > { %10183 = shalt.err (!%p10180_p1)
}
 0x7c2   : > { %s10184_s10 = scalar_lea.hbm %s12634_s27, 4096  ;;  %s10188_s26 = scalar_lea.hbm %s12705_s3, 8192 }
 0x7c3   : > { %p10185_p13 = scmp.ne.s32.totalorder %s12634_s27, %s10184_s10  ;;  %p10189_p4 = scmp.lt.u32.totalorder %s12634_s27, %s12705_s3 }
 0x7c4   : > { %p10190_p5 = scmp.lt.u32.totalorder %s10188_s26, %s10184_s10  ;;  %p10192_p11 = scmp.lt.u32.totalorder %s10184_s10, %s12634_s27 }
 0x7c5   : > { %p10186_p6 = pnand %p10185_p13, %p13145_p0 }
 0x7c6   : > { %p10191_p8 = por %p10190_p5, %p10189_p4 }
 0x7c7   : > { %p10187_p10 = pneg %p10186_p6 }
 0x7c8   : > { %p10193_p2 = por %p10192_p11, %p10191_p8 }
 0x7ca   : > { %p10194_p3 = pnand %p10193_p2, %p10187_p10 }
 0x7cc   : > { %10197 = shalt.err (!%p10194_p3)
}
 0x7cd   : > { %s10248_s28 = smov 128   ;;  %s10249_s18 = smov 8  }
 0x7ce   : > { %9987 = dma.vmem_to_hbm [thread:$0]  (%p13145_p0), %s12638_s7, 4096, %s12634_s27, %s6460_s16, %s10248_s28, %s10248_s28, %s10249_s18  }
 0x7cf PF: > { %s6488_s20 = sand.u32 1, %s10228_s12   ;;  %p13146_p7 = scmp.ne.s32.totalorder %s12886_s19, 0 }
 0x7d0   : > { %p13147_p9 = scmp.ge.s32.totalorder %s10240_s15, 2  ;;  %s6489_s8 = scalar_lea.sflag [#allocation4], %s6488_s20 }
 0x7d2   : > { %p10001_p12 = pnand %p13147_p9, %p13146_p7 }
 0x7d4   : > { %10223 = dma.done.wait (!%p10001_p12), %s6489_s8, 4096  }
 0x7d5   : > { %10225 = vsyncadd (!%p10001_p12), %s6489_s8, 4294963200  ;;  %p17_p1 = scmp.ge.s32.totalorder %s10386_s23, 4   ;;  %s13148_s12 = smov %s10232_s13 }
 0x7d6   : > { %s13149_s13 = smov %s10236_s14  ;;  %s13150_s14 = smov %s10402_s9 }
 0x7d7   : > { %s13151_s15 = smov %s10386_s23  ;;  %19 = sbr.rel (!%p17_p1) target bundleno = 6 (0x6), region = 101 }
 0x7de   :  { %6494 = vsyncpa [#allocation3], 1 }
 0x7df   :  { %6496 = vsyncpa [#allocation3 + $0x1], 1 }
 0x7e0   :  { %6497 = vsyncpa [#allocation6], 1 }
 0x7e1   :  { %6498 = vsyncpa [#allocation4], 1 }
 0x7e2   :  { %6500 = vsyncpa [#allocation4 + $0x1], 1 }

</bundles_post_ra>
